<compile_context>
chip_gen: v6e
topology: v6e:2x2x1
jax: 0.10.0
libtpu: 0.0.40
codegen_flags: <defaults>
</compile_context>

<pallas_src>
import numpy as np
import jax
import jax.numpy as jnp
from jax import lax
from jax.experimental import pallas as pl
from jax.experimental.pallas import tpu as pltpu

# ----------------------------------------------------------------------------
# Model constants (PyTorch __init__, all_cdrs=False).
# ----------------------------------------------------------------------------
HIDDEN_LSTM = 24          # hidden_lstm
HIDDEN_ATT = 24           # hidden_attention
HIDDEN_DENSE = 64         # hidden_dense
IN_FEAT = 20              # LSTM input_size
SEQ_TOTAL = 238           # full encoded sequence length

# (name, start, length) in the PyTorch feature order
# [cdr3a_f, cdr3a_r, cdr3b_f, cdr3b_r, pep_f, pep_r].
SEGMENTS = (("cdr3a", 24, 15), ("cdr3b", 52, 17), ("pep", 0, 9))
NSEG = len(SEGMENTS)
NBLK = 2 * NSEG                               # 6 (segment, direction) blocks
MAX_L = max(s[2] for s in SEGMENTS)           # 17 merged recurrence steps
HID_ROWS = NBLK * HIDDEN_LSTM                 # 144 merged hidden rows
GATE_ROWS = 4 * HID_ROWS                      # 576 merged gate rows [i|f|g|o]
IN_STACK = 2 * NSEG * IN_FEAT                 # 120 stacked input rows (fwd|rev)

BLOCK_B = 128                                 # batch tile = lane width
MXU_DTYPE = jnp.bfloat16                      # weight / x storage dtype

# The merged block-diagonal attention packing assumes HA == H (true here).
assert HIDDEN_ATT == HIDDEN_LSTM


# ----------------------------------------------------------------------------
# Fused kernel: merged 3x bidirectional LSTM + attention pooling + dense head.
# ----------------------------------------------------------------------------
def fused_kernel(x_ref,                     # (MAX_L, 120, BT)  bf16 fwd|rev stacked
                 wx_ref, whh_ref, b_ref,    # (576,120) (576,144) bf16, (576,1) f32
                 wk_ref, bk_ref,            # (144,144) bf16, (144,1) f32
                 qmat_ref, expand_ref,      # (6,144) bf16, (144,6) f32
                 att_bias_ref,              # (MAX_L, 6, 1) f32  (0 / -1e30 mask)
                 w1_ref, b1_ref,            # (64,144) bf16, (64,1) f32
                 w2_ref, b2_ref,            # (1,64)  bf16, (1,1)  f32
                 out_ref,                   # (1, BT) f32
                 gx_scr, h_scr, e_scr):     # VMEM scratch
    f32 = jnp.float32
    BT = out_ref.shape[-1]

    # 1) Hoisted input projection (off the serial chain):
    #    gx[t] = Wx @ [x_fwd(t); x_rev(t)] + b  ->  (576, BT).
    @pl.loop(0, MAX_L)
    def _(t):
        gx_scr[t] = (jnp.dot(wx_ref[...], x_ref[t],
                             preferred_element_type=f32) + b_ref[...])

    # 2) Merged recurrence: 3 segments x 2 directions advance together,
    #    17 serial steps total (vs 41 unmerged).  c/h stay in f32.
    def step(t, carry):
        h, c = carry
        gates = gx_scr[t] + jnp.dot(whh_ref[...], h.astype(MXU_DTYPE),
                                    preferred_element_type=f32)
        i = jax.nn.sigmoid(gates[0 * HID_ROWS:1 * HID_ROWS])
        f = jax.nn.sigmoid(gates[1 * HID_ROWS:2 * HID_ROWS])
        g = jnp.tanh(gates[2 * HID_ROWS:3 * HID_ROWS])
        o = jax.nn.sigmoid(gates[3 * HID_ROWS:4 * HID_ROWS])
        c = f * c + i * g
        h = o * jnp.tanh(c)
        h_scr[t] = h                       # full-width lane-dense store
        return h, c

    zeros = jnp.zeros((HID_ROWS, BT), f32)
    lax.fori_loop(0, MAX_L, step, (zeros, zeros))

    # 3) Attention scores for all 6 blocks at once:
    #    e[t] = Q_blocks @ tanh(Wk_blockdiag @ h[t] + bk)  ->  (6, BT).
    @pl.loop(0, MAX_L)
    def _(t):
        k_t = jnp.tanh(jnp.dot(wk_ref[...], h_scr[t].astype(MXU_DTYPE),
                               preferred_element_type=f32) + bk_ref[...])
        e_scr[t] = jnp.dot(qmat_ref[...], k_t.astype(MXU_DTYPE),
                           preferred_element_type=f32)

    # 4) Masked softmax over time (padded steps of short segments excluded).
    e = e_scr[...] + att_bias_ref[...]                      # (MAX_L, 6, BT)
    e = e - jnp.max(e, axis=0, keepdims=True)
    p = jnp.exp(e)
    att = p * pl.reciprocal(jnp.sum(p, axis=0, keepdims=True), approx=True)
    e_scr[...] = att

    # 5) Attention pooling: feat[j*24:(j+1)*24] = sum_t att[t, j] * h[t, blk j].
    #    Row expansion of att is a tiny (144,6)@(6,BT) matmul, no sublane
    #    shuffles or lane concatenation; feat is accumulated in place.
    def pool(t, feat):
        a_rows = jnp.dot(expand_ref[...], e_scr[t], preferred_element_type=f32)
        return feat + a_rows * h_scr[t]

    feat = lax.fori_loop(0, MAX_L, pool, jnp.zeros((HID_ROWS, BT), f32))

    # 6) Dense head (dropout = identity in eval mode).
    hidden = jnp.maximum(
        jnp.dot(w1_ref[...], feat.astype(MXU_DTYPE),
                preferred_element_type=f32) + b1_ref[...], 0.0)
    y = jnp.dot(w2_ref[...], hidden.astype(MXU_DTYPE),
                preferred_element_type=f32) + b2_ref[...]
    out_ref[...] = jax.nn.sigmoid(y)


# ----------------------------------------------------------------------------
# Host-side weight packing into the merged feature-major block layout
# (one time, off the inference hot path).
# ----------------------------------------------------------------------------
def pack_params(params, dtype=MXU_DTYPE):
    H = HIDDEN_LSTM
    wx = np.zeros((GATE_ROWS, IN_STACK), np.float32)
    wh = np.zeros((GATE_ROWS, HID_ROWS), np.float32)
    b = np.zeros((GATE_ROWS, 1), np.float32)
    wk = np.zeros((HID_ROWS, HID_ROWS), np.float32)
    bk = np.zeros((HID_ROWS, 1), np.float32)
    qm = np.zeros((NBLK, HID_ROWS), np.float32)
    for si, (name, _, _) in enumerate(SEGMENTS):
        p = params[name]
        for d, suf in enumerate(("f", "r")):
            blk = 2 * si + d
            wih = np.asarray(p[f"wih_{suf}"])                         # (4H, IN)
            whh = np.asarray(p[f"whh_{suf}"])                         # (4H, H)
            bias = np.asarray(p[f"b_ih_{suf}"]) + np.asarray(p[f"b_hh_{suf}"])
            r0 = blk * H
            cin = (d * NSEG + si) * IN_FEAT
            for g in range(4):                                        # i, f, g, o
                r = slice(g * HID_ROWS + r0, g * HID_ROWS + r0 + H)
                wx[r, cin:cin + IN_FEAT] = wih[g * H:(g + 1) * H]
                wh[r, r0:r0 + H] = whh[g * H:(g + 1) * H]
                b[r, 0] = bias[g * H:(g + 1) * H]
            wk[r0:r0 + H, r0:r0 + H] = np.asarray(p[f"wk_{suf}"])
            bk[r0:r0 + H, 0] = np.asarray(p[f"bk_{suf}"])
            qm[blk, r0:r0 + H] = np.asarray(p[f"q_{suf}"])
    # 0/1 expansion matrix: hidden row r belongs to block r // H.
    expand = (np.arange(HID_ROWS)[:, None] // H == np.arange(NBLK)[None, :])
    # Attention time mask: -inf-like bias for padded steps of each block.
    att_bias = np.zeros((MAX_L, NBLK, 1), np.float32)
    for si, (_, _, L) in enumerate(SEGMENTS):
        att_bias[L:, 2 * si, 0] = -1e30
        att_bias[L:, 2 * si + 1, 0] = -1e30
    head = params["head"]
    return dict(
        wx=jnp.asarray(wx, dtype), whh=jnp.asarray(wh, dtype),
        b=jnp.asarray(b, jnp.float32),
        wk=jnp.asarray(wk, dtype), bk=jnp.asarray(bk, jnp.float32),
        qmat=jnp.asarray(qm, dtype),
        expand=jnp.asarray(expand, jnp.float32),
        att_bias=jnp.asarray(att_bias, jnp.float32),
        w1=jnp.asarray(head["w1"], dtype),
        b1=jnp.asarray(head["b1"], jnp.float32).reshape(-1, 1),
        w2=jnp.asarray(head["w2"], dtype),
        b2=jnp.asarray(head["b2"], jnp.float32).reshape(-1, 1),
    )


# ----------------------------------------------------------------------------
# Forward wrapper: batch-tiled single fused pallas_call.
# ----------------------------------------------------------------------------
def _build_x_operand(x, n_tiles):
    """Slice the 3 segment windows (41 rows total), reverse-copy for the rev
    direction, zero-pad to MAX_L, and lay out feature-major per batch tile:
    (n_tiles, MAX_L, 120, BLOCK_B)."""
    b_pad = n_tiles * BLOCK_B
    xp = jnp.pad(x.astype(jnp.float32), ((0, b_pad - x.shape[0]), (0, 0), (0, 0)))
    fwd, rev = [], []
    for _, start, L in SEGMENTS:
        seg = jnp.transpose(xp[:, :, start:start + L], (2, 1, 0))   # (L, 20, Bp)
        pad = jnp.zeros((MAX_L - L, IN_FEAT, b_pad), jnp.float32)
        fwd.append(jnp.concatenate([seg, pad], axis=0))             # (17, 20, Bp)
        rev.append(jnp.concatenate([seg[::-1], pad], axis=0))
    xs = jnp.concatenate(fwd + rev, axis=1)                         # (17, 120, Bp)
    xs = xs.reshape(MAX_L, IN_STACK, n_tiles, BLOCK_B)
    return jnp.transpose(xs, (2, 0, 1, 3)).astype(MXU_DTYPE)


def _const_spec(a):
    zero = (0,) * a.ndim
    return pl.BlockSpec(a.shape, lambda i, _z=zero: _z)


def _cost_estimate(n_tiles, args, out_elems):
    mm = lambda m, k, n: 2 * m * k * n
    per_tile = (MAX_L * (mm(GATE_ROWS, IN_STACK, BLOCK_B)      # input projection
                         + mm(GATE_ROWS, HID_ROWS, BLOCK_B)    # recurrence
                         + mm(HID_ROWS, HID_ROWS, BLOCK_B)     # attention key
                         + mm(NBLK, HID_ROWS, BLOCK_B)         # scores
                         + mm(HID_ROWS, NBLK, BLOCK_B))        # pooling expand
                + mm(HIDDEN_DENSE, HID_ROWS, BLOCK_B)
                + mm(1, HIDDEN_DENSE, BLOCK_B))
    trans_per_tile = MAX_L * (GATE_ROWS + 2 * HID_ROWS + NBLK) * BLOCK_B + BLOCK_B
    bytes_accessed = sum(int(a.size) * a.dtype.itemsize for a in args) + out_elems * 4
    return pl.CostEstimate(flops=int(n_tiles * per_tile),
                           transcendentals=int(n_tiles * trans_per_tile),
                           bytes_accessed=int(bytes_accessed))


@jax.jit
def attention_net_forward(x, packed):
    B = x.shape[0]
    n_tiles = pl.cdiv(B, BLOCK_B)
    xs = _build_x_operand(x, n_tiles)

    weights = [packed["wx"], packed["whh"], packed["b"],
               packed["wk"], packed["bk"], packed["qmat"],
               packed["expand"], packed["att_bias"],
               packed["w1"], packed["b1"], packed["w2"], packed["b2"]]

    x_spec = pl.BlockSpec((None, MAX_L, IN_STACK, BLOCK_B), lambda i: (i, 0, 0, 0))
    out_spec = pl.BlockSpec((None, 1, BLOCK_B), lambda i: (i, 0, 0))

    out = pl.pallas_call(
        fused_kernel,
        out_shape=jax.ShapeDtypeStruct((n_tiles, 1, BLOCK_B), jnp.float32),
        grid=(n_tiles,),
        in_specs=[x_spec] + [_const_spec(w) for w in weights],
        out_specs=out_spec,
        scratch_shapes=[
            pltpu.VMEM((MAX_L, GATE_ROWS, BLOCK_B), jnp.float32),   # gx
            pltpu.VMEM((MAX_L, HID_ROWS, BLOCK_B), jnp.float32),    # h history
            pltpu.VMEM((MAX_L, NBLK, BLOCK_B), jnp.float32),        # scores / attn
        ],
        compiler_params=pltpu.CompilerParams(
            dimension_semantics=("parallel",),      # batch tiles -> 2 TCs on v7x
            vmem_limit_bytes=32 * 1024 * 1024),
        cost_estimate=_cost_estimate(n_tiles, [xs] + weights, n_tiles * BLOCK_B),
    )(xs, *weights)

    return out.reshape(n_tiles * BLOCK_B)[:B].reshape(B, 1)


# ----------------------------------------------------------------------------
# Deterministic parameter construction (shapes follow the PyTorch __init__).
# ----------------------------------------------------------------------------
def make_seg_params(key, H=HIDDEN_LSTM, HA=HIDDEN_ATT, IN=IN_FEAT):
    ks = jax.random.split(key, 14)
    s = 0.1
    nrm = lambda k, shape: jax.random.normal(k, shape, jnp.float32) * s
    return {
        "wih_f": nrm(ks[0], (4 * H, IN)), "whh_f": nrm(ks[1], (4 * H, H)),
        "b_ih_f": nrm(ks[2], (4 * H,)), "b_hh_f": nrm(ks[3], (4 * H,)),
        "wih_r": nrm(ks[4], (4 * H, IN)), "whh_r": nrm(ks[5], (4 * H, H)),
        "b_ih_r": nrm(ks[6], (4 * H,)), "b_hh_r": nrm(ks[7], (4 * H,)),
        "wk_f": nrm(ks[8], (HA, H)), "bk_f": nrm(ks[9], (HA,)),
        "q_f": nrm(ks[10], (HA,)),
        "wk_r": nrm(ks[11], (HA, H)), "bk_r": nrm(ks[12], (HA,)),
        "q_r": nrm(ks[13], (HA,)),
    }


def make_params(key):
    k_pep, k_a, k_b, k_head = jax.random.split(key, 4)
    kh = jax.random.split(k_head, 4)
    s = 0.1
    nrm = lambda k, shape: jax.random.normal(k, shape, jnp.float32) * s
    return {
        "pep": make_seg_params(k_pep),
        "cdr3a": make_seg_params(k_a),
        "cdr3b": make_seg_params(k_b),
        "head": {
            "w1": nrm(kh[0], (HIDDEN_DENSE, HIDDEN_LSTM * 3 * 2)),
            "b1": nrm(kh[1], (HIDDEN_DENSE,)),
            "w2": nrm(kh[2], (1, HIDDEN_DENSE)),
            "b2": nrm(kh[3], (1,)),
        },
    }


# ----------------------------------------------------------------------------
# Pure-JAX reference (mirrors the PyTorch forward) for a tolerance check.
# ----------------------------------------------------------------------------
def _ref_lstm_dir(x_seg, wih, whh, b_ih, b_hh, reverse):
    B, L, _ = x_seg.shape
    H = whh.shape[1]
    xs = x_seg[:, ::-1, :] if reverse else x_seg
    h = jnp.zeros((B, H), jnp.float32)
    c = jnp.zeros((B, H), jnp.float32)
    outs = []
    for t in range(L):
        gates = xs[:, t, :] @ wih.T + h @ whh.T + b_ih + b_hh
        i = jax.nn.sigmoid(gates[:, 0:H])
        f = jax.nn.sigmoid(gates[:, H:2 * H])
        g = jnp.tanh(gates[:, 2 * H:3 * H])
        o = jax.nn.sigmoid(gates[:, 3 * H:4 * H])
        c = f * c + i * g
        h = o * jnp.tanh(c)
        outs.append(h)
    hs = jnp.stack(outs, axis=1)
    return hs[:, ::-1, :] if reverse else hs


def _ref_attention(h, wk, bk, q):
    k = jnp.tanh(h @ wk.T + bk)
    e = jnp.einsum("blh,h->bl", k, q)
    a = jax.nn.softmax(e, axis=1)
    return jnp.einsum("bl,blh->bh", a, h)


@jax.jit
def reference_forward(x, params):
    xt = jnp.transpose(x, (0, 2, 1)).astype(jnp.float32)
    feats = []
    for name, start, L in SEGMENTS:
        p = params[name]
        seg = xt[:, start:start + L, :]
        hf = _ref_lstm_dir(seg, p["wih_f"], p["whh_f"], p["b_ih_f"], p["b_hh_f"], False)
        hr = _ref_lstm_dir(seg, p["wih_r"], p["whh_r"], p["b_ih_r"], p["b_hh_r"], True)
        feats.append(_ref_attention(hf, p["wk_f"], p["bk_f"], p["q_f"]))
        feats.append(_ref_attention(hr, p["wk_r"], p["bk_r"], p["q_r"]))
    feat = jnp.concatenate(feats, axis=1)
    h1 = jax.nn.relu(feat @ params["head"]["w1"].T + params["head"]["b1"])
    return jax.nn.sigmoid(h1 @ params["head"]["w2"].T + params["head"]["b2"])


if __name__ == "__main__":
    key = jax.random.PRNGKey(0)
    k_x, k_p = jax.random.split(key)
    B = 2
    x = jax.random.normal(k_x, (B, IN_FEAT, SEQ_TOTAL), jnp.float32)
    params = make_params(k_p)
    packed = pack_params(params)   # one-time weight packing (off the hot path)

    out = jax.block_until_ready(attention_net_forward(x, packed))
    ref = jax.block_until_ready(reference_forward(x, params))

    assert out.shape == (B, 1)
    assert bool(jnp.all(jnp.isfinite(out)))
    assert bool(jnp.allclose(out, ref, atol=2e-2)), (out, ref)
    print("KERNEL_OK")

# TODO(synk): the return_attention / clean_attention_output (pandas) path and
# the all_cdrs=True configuration are not implemented in the kernel.
</pallas_src>

<mosaic_0001>
module attributes {stable_mosaic.version = 11 : i64} {
  func.func @fused_kernel(%arg0: i32, %arg1: memref<1x17x120x128xbf16, #tpu.memory_space<vmem>>, %arg2: memref<576x120xbf16, #tpu.memory_space<vmem>>, %arg3: memref<576x144xbf16, #tpu.memory_space<vmem>>, %arg4: memref<576x1xf32, #tpu.memory_space<vmem>>, %arg5: memref<144x144xbf16, #tpu.memory_space<vmem>>, %arg6: memref<144x1xf32, #tpu.memory_space<vmem>>, %arg7: memref<6x144xbf16, #tpu.memory_space<vmem>>, %arg8: memref<144x6xf32, #tpu.memory_space<vmem>>, %arg9: memref<17x6x1xf32, #tpu.memory_space<vmem>>, %arg10: memref<64x144xbf16, #tpu.memory_space<vmem>>, %arg11: memref<64x1xf32, #tpu.memory_space<vmem>>, %arg12: memref<1x64xbf16, #tpu.memory_space<vmem>>, %arg13: memref<1x1xf32, #tpu.memory_space<vmem>>, %arg14: memref<1x1x128xf32, #tpu.memory_space<vmem>>, %arg15: memref<17x576x128xf32, #tpu.memory_space<vmem>>, %arg16: memref<17x144x128xf32, #tpu.memory_space<vmem>>, %arg17: memref<17x6x128xf32, #tpu.memory_space<vmem>>) attributes {dimension_semantics = [#tpu.dimension_semantics<parallel>], iteration_bounds = array<i64: 1>, scalar_prefetch = 0 : i64, scratch_operands = 3 : i64, tpu.core_type = #tpu.core_type<tc>, window_params = [{transform_indices = @transform_0, window_bounds = array<i64: 1, 17, 120, 128>}, {pipeline_mode = #tpu.pipeline_mode<synchronous>, transform_indices = @transform_1, window_bounds = array<i64: 576, 120>}, {pipeline_mode = #tpu.pipeline_mode<synchronous>, transform_indices = @transform_2, window_bounds = array<i64: 576, 144>}, {pipeline_mode = #tpu.pipeline_mode<synchronous>, transform_indices = @transform_3, window_bounds = array<i64: 576, 1>}, {pipeline_mode = #tpu.pipeline_mode<synchronous>, transform_indices = @transform_4, window_bounds = array<i64: 144, 144>}, {pipeline_mode = #tpu.pipeline_mode<synchronous>, transform_indices = @transform_5, window_bounds = array<i64: 144, 1>}, {pipeline_mode = #tpu.pipeline_mode<synchronous>, transform_indices = @transform_6, window_bounds = array<i64: 6, 144>}, {pipeline_mode = #tpu.pipeline_mode<synchronous>, transform_indices = @transform_7, window_bounds = array<i64: 144, 6>}, {pipeline_mode = #tpu.pipeline_mode<synchronous>, transform_indices = @transform_8, window_bounds = array<i64: 17, 6, 1>}, {pipeline_mode = #tpu.pipeline_mode<synchronous>, transform_indices = @transform_9, window_bounds = array<i64: 64, 144>}, {pipeline_mode = #tpu.pipeline_mode<synchronous>, transform_indices = @transform_10, window_bounds = array<i64: 64, 1>}, {pipeline_mode = #tpu.pipeline_mode<synchronous>, transform_indices = @transform_11, window_bounds = array<i64: 1, 64>}, {pipeline_mode = #tpu.pipeline_mode<synchronous>, transform_indices = @transform_12, window_bounds = array<i64: 1, 1>}, {transform_indices = @transform_13, window_bounds = array<i64: 1, 1, 128>}]} {
    %c0_i32 = arith.constant 0 : i32
    %c17_i32 = arith.constant 17 : i32
    %0 = arith.addi %c0_i32, %c17_i32 : i32
    %c1_i32 = arith.constant 1 : i32
    scf.for %arg18 = %c0_i32 to %0 step %c1_i32  : i32 {
      %c1_i32_39 = arith.constant 1 : i32
      %45 = arith.muli %arg18, %c1_i32_39 : i32
      %c0_i32_40 = arith.constant 0 : i32
      %46 = arith.addi %c0_i32_40, %45 : i32
      %c0_41 = arith.constant 0 : index
      %c0_42 = arith.constant 0 : index
      %47 = vector.load %arg2[%c0_41, %c0_42] : memref<576x120xbf16, #tpu.memory_space<vmem>>, vector<576x120xbf16>
      %c0_43 = arith.constant 0 : index
      %48 = arith.index_cast %46 : i32 to index
      %c0_44 = arith.constant 0 : index
      %c0_45 = arith.constant 0 : index
      %49 = vector.load %arg1[%c0_43, %48, %c0_44, %c0_45] : memref<1x17x120x128xbf16, #tpu.memory_space<vmem>>, vector<1x1x120x128xbf16>
      %50 = vector.shape_cast %49 : vector<1x1x120x128xbf16> to vector<120x128xbf16>
      %cst_46 = arith.constant dense<0.000000e+00> : vector<576x128xf32>
      %51 = tpu.matmul %47, %50, %cst_46 {dimension_numbers = #tpu.dot_dimension_numbers<[1], [0], [0], [1], [0, 0, 1, 1], [], []>} : vector<576x120xbf16>, vector<120x128xbf16>, vector<576x128xf32> -> vector<576x128xf32>
      %c0_47 = arith.constant 0 : index
      %c0_48 = arith.constant 0 : index
      %52 = vector.load %arg4[%c0_47, %c0_48] : memref<576x1xf32, #tpu.memory_space<vmem>>, vector<576x1xf32>
      %53 = vector.broadcast %52 : vector<576x1xf32> to vector<576x128xf32>
      %54 = arith.addf %51, %53 : vector<576x128xf32>
      %55 = arith.index_cast %46 : i32 to index
      %c0_49 = arith.constant 0 : index
      %c0_50 = arith.constant 0 : index
      %56 = vector.load %arg15[%55, %c0_49, %c0_50] : memref<17x576x128xf32, #tpu.memory_space<vmem>>, vector<1x576x128xf32>
      %57 = vector.shape_cast %56 : vector<1x576x128xf32> to vector<576x128xf32>
      %58 = vector.shape_cast %54 : vector<576x128xf32> to vector<1x576x128xf32>
      tpu.vector_store %arg15[%55, %c0_49, %c0_50], %58 {strides = array<i32>} : memref<17x576x128xf32, #tpu.memory_space<vmem>>, vector<1x576x128xf32>,
    }
    %c17_i32_0 = arith.constant 17 : i32
    %cst = arith.constant 0.000000e+00 : f32
    %1 = vector.broadcast %cst : f32 to vector<144x128xf32>
    %c0_i32_1 = arith.constant 0 : i32
    %c17_i32_2 = arith.constant 17 : i32
    %2 = arith.addi %c0_i32_1, %c17_i32_2 : i32
    %c1_i32_3 = arith.constant 1 : i32
    %3:2 = scf.for %arg18 = %c0_i32_1 to %2 step %c1_i32_3 iter_args(%arg19 = %1, %arg20 = %1) -> (vector<144x128xf32>, vector<144x128xf32>)  : i32 {
      %45 = arith.index_cast %arg18 : i32 to index
      %c0_39 = arith.constant 0 : index
      %c0_40 = arith.constant 0 : index
      %46 = vector.load %arg15[%45, %c0_39, %c0_40] : memref<17x576x128xf32, #tpu.memory_space<vmem>>, vector<1x576x128xf32>
      %47 = vector.shape_cast %46 : vector<1x576x128xf32> to vector<576x128xf32>
      %c0_41 = arith.constant 0 : index
      %c0_42 = arith.constant 0 : index
      %48 = vector.load %arg3[%c0_41, %c0_42] : memref<576x144xbf16, #tpu.memory_space<vmem>>, vector<576x144xbf16>
      %49 = arith.truncf %arg19 : vector<144x128xf32> to vector<144x128xbf16>
      %cst_43 = arith.constant dense<0.000000e+00> : vector<576x128xf32>
      %50 = tpu.matmul %48, %49, %cst_43 {dimension_numbers = #tpu.dot_dimension_numbers<[1], [0], [0], [1], [0, 0, 1, 1], [], []>} : vector<576x144xbf16>, vector<144x128xbf16>, vector<576x128xf32> -> vector<576x128xf32>
      %51 = arith.addf %47, %50 : vector<576x128xf32>
      %52 = vector.extract_strided_slice %51 {offsets = [0, 0], sizes = [144, 128], strides = [1, 1]} : vector<576x128xf32> to vector<144x128xf32>
      %53 = arith.negf %52 : vector<144x128xf32>
      %54 = math.exp %53 : vector<144x128xf32>
      %cst_44 = arith.constant 1.000000e+00 : f32
      %55 = vector.broadcast %cst_44 : f32 to vector<144x128xf32>
      %56 = arith.addf %55, %54 : vector<144x128xf32>
      %57 = arith.divf %55, %56 : vector<144x128xf32>
      %58 = vector.extract_strided_slice %51 {offsets = [144, 0], sizes = [144, 128], strides = [1, 1]} : vector<576x128xf32> to vector<144x128xf32>
      %59 = arith.negf %58 : vector<144x128xf32>
      %60 = math.exp %59 : vector<144x128xf32>
      %cst_45 = arith.constant 1.000000e+00 : f32
      %61 = vector.broadcast %cst_45 : f32 to vector<144x128xf32>
      %62 = arith.addf %61, %60 : vector<144x128xf32>
      %63 = arith.divf %61, %62 : vector<144x128xf32>
      %64 = vector.extract_strided_slice %51 {offsets = [288, 0], sizes = [144, 128], strides = [1, 1]} : vector<576x128xf32> to vector<144x128xf32>
      %65 = math.tanh %64 : vector<144x128xf32>
      %66 = vector.extract_strided_slice %51 {offsets = [432, 0], sizes = [144, 128], strides = [1, 1]} : vector<576x128xf32> to vector<144x128xf32>
      %67 = arith.negf %66 : vector<144x128xf32>
      %68 = math.exp %67 : vector<144x128xf32>
      %cst_46 = arith.constant 1.000000e+00 : f32
      %69 = vector.broadcast %cst_46 : f32 to vector<144x128xf32>
      %70 = arith.addf %69, %68 : vector<144x128xf32>
      %71 = arith.divf %69, %70 : vector<144x128xf32>
      %72 = arith.mulf %63, %arg20 : vector<144x128xf32>
      %73 = arith.mulf %57, %65 : vector<144x128xf32>
      %74 = arith.addf %72, %73 : vector<144x128xf32>
      %75 = math.tanh %74 : vector<144x128xf32>
      %76 = arith.mulf %71, %75 : vector<144x128xf32>
      %77 = arith.index_cast %arg18 : i32 to index
      %c0_47 = arith.constant 0 : index
      %c0_48 = arith.constant 0 : index
      %78 = vector.load %arg16[%77, %c0_47, %c0_48] : memref<17x144x128xf32, #tpu.memory_space<vmem>>, vector<1x144x128xf32>
      %79 = vector.shape_cast %78 : vector<1x144x128xf32> to vector<144x128xf32>
      %80 = vector.shape_cast %76 : vector<144x128xf32> to vector<1x144x128xf32>
      tpu.vector_store %arg16[%77, %c0_47, %c0_48], %80 {strides = array<i32>} : memref<17x144x128xf32, #tpu.memory_space<vmem>>, vector<1x144x128xf32>,
      scf.yield %76, %74 : vector<144x128xf32>, vector<144x128xf32>
    }
    %c17_i32_4 = arith.constant 17 : i32
    %c0_i32_5 = arith.constant 0 : i32
    %c17_i32_6 = arith.constant 17 : i32
    %4 = arith.addi %c0_i32_5, %c17_i32_6 : i32
    %c1_i32_7 = arith.constant 1 : i32
    scf.for %arg18 = %c0_i32_5 to %4 step %c1_i32_7  : i32 {
      %c1_i32_39 = arith.constant 1 : i32
      %45 = arith.muli %arg18, %c1_i32_39 : i32
      %c0_i32_40 = arith.constant 0 : i32
      %46 = arith.addi %c0_i32_40, %45 : i32
      %c0_41 = arith.constant 0 : index
      %c0_42 = arith.constant 0 : index
      %47 = vector.load %arg5[%c0_41, %c0_42] : memref<144x144xbf16, #tpu.memory_space<vmem>>, vector<144x144xbf16>
      %48 = arith.index_cast %46 : i32 to index
      %c0_43 = arith.constant 0 : index
      %c0_44 = arith.constant 0 : index
      %49 = vector.load %arg16[%48, %c0_43, %c0_44] : memref<17x144x128xf32, #tpu.memory_space<vmem>>, vector<1x144x128xf32>
      %50 = vector.shape_cast %49 : vector<1x144x128xf32> to vector<144x128xf32>
      %51 = arith.truncf %50 : vector<144x128xf32> to vector<144x128xbf16>
      %cst_45 = arith.constant dense<0.000000e+00> : vector<144x128xf32>
      %52 = tpu.matmul %47, %51, %cst_45 {dimension_numbers = #tpu.dot_dimension_numbers<[1], [0], [0], [1], [0, 0, 1, 1], [], []>} : vector<144x144xbf16>, vector<144x128xbf16>, vector<144x128xf32> -> vector<144x128xf32>
      %c0_46 = arith.constant 0 : index
      %c0_47 = arith.constant 0 : index
      %53 = vector.load %arg6[%c0_46, %c0_47] : memref<144x1xf32, #tpu.memory_space<vmem>>, vector<144x1xf32>
      %54 = vector.broadcast %53 : vector<144x1xf32> to vector<144x128xf32>
      %55 = arith.addf %52, %54 : vector<144x128xf32>
      %56 = math.tanh %55 : vector<144x128xf32>
      %c0_48 = arith.constant 0 : index
      %c0_49 = arith.constant 0 : index
      %57 = vector.load %arg7[%c0_48, %c0_49] : memref<6x144xbf16, #tpu.memory_space<vmem>>, vector<6x144xbf16>
      %58 = arith.truncf %56 : vector<144x128xf32> to vector<144x128xbf16>
      %cst_50 = arith.constant dense<0.000000e+00> : vector<6x128xf32>
      %59 = tpu.matmul %57, %58, %cst_50 {dimension_numbers = #tpu.dot_dimension_numbers<[1], [0], [0], [1], [0, 0, 1, 1], [], []>} : vector<6x144xbf16>, vector<144x128xbf16>, vector<6x128xf32> -> vector<6x128xf32>
      %60 = arith.index_cast %46 : i32 to index
      %c0_51 = arith.constant 0 : index
      %c0_52 = arith.constant 0 : index
      %61 = vector.load %arg17[%60, %c0_51, %c0_52] : memref<17x6x128xf32, #tpu.memory_space<vmem>>, vector<1x6x128xf32>
      %62 = vector.shape_cast %61 : vector<1x6x128xf32> to vector<6x128xf32>
      %63 = vector.shape_cast %59 : vector<6x128xf32> to vector<1x6x128xf32>
      tpu.vector_store %arg17[%60, %c0_51, %c0_52], %63 {strides = array<i32>} : memref<17x6x128xf32, #tpu.memory_space<vmem>>, vector<1x6x128xf32>,
    }
    %c17_i32_8 = arith.constant 17 : i32
    %c0 = arith.constant 0 : index
    %c0_9 = arith.constant 0 : index
    %c0_10 = arith.constant 0 : index
    %5 = vector.load %arg17[%c0, %c0_9, %c0_10] : memref<17x6x128xf32, #tpu.memory_space<vmem>>, vector<17x6x128xf32>
    %c0_11 = arith.constant 0 : index
    %c0_12 = arith.constant 0 : index
    %c0_13 = arith.constant 0 : index
    %6 = vector.load %arg9[%c0_11, %c0_12, %c0_13] : memref<17x6x1xf32, #tpu.memory_space<vmem>>, vector<17x6x1xf32>
    %7 = vector.broadcast %6 : vector<17x6x1xf32> to vector<17x6x128xf32>
    %8 = arith.addf %5, %7 : vector<17x6x128xf32>
    %cst_14 = arith.constant dense<0xFF800000> : vector<6x128xf32>
    %9 = vector.multi_reduction <maximumf>, %8, %cst_14 [0] : vector<17x6x128xf32> to vector<6x128xf32>
    %10 = vector.shape_cast %9 : vector<6x128xf32> to vector<1x6x128xf32>
    %11 = vector.broadcast %10 : vector<1x6x128xf32> to vector<17x6x128xf32>
    %12 = arith.subf %8, %11 : vector<17x6x128xf32>
    %13 = math.exp %12 : vector<17x6x128xf32>
    %cst_15 = arith.constant dense<0.000000e+00> : vector<6x128xf32>
    %14 = vector.multi_reduction <add>, %13, %cst_15 [0] : vector<17x6x128xf32> to vector<6x128xf32>
    %15 = vector.shape_cast %14 : vector<6x128xf32> to vector<1x6x128xf32>
    %16 = tpu.reciprocal %15 {approx = true} : vector<1x6x128xf32> -> vector<1x6x128xf32>
    %17 = vector.broadcast %16 : vector<1x6x128xf32> to vector<17x6x128xf32>
    %18 = arith.mulf %13, %17 : vector<17x6x128xf32>
    %c0_16 = arith.constant 0 : index
    %c0_17 = arith.constant 0 : index
    %c0_18 = arith.constant 0 : index
    %19 = vector.load %arg17[%c0_16, %c0_17, %c0_18] : memref<17x6x128xf32, #tpu.memory_space<vmem>>, vector<17x6x128xf32>
    tpu.vector_store %arg17[%c0_16, %c0_17, %c0_18], %18 {strides = array<i32>} : memref<17x6x128xf32, #tpu.memory_space<vmem>>, vector<17x6x128xf32>,
    %cst_19 = arith.constant 0.000000e+00 : f32
    %20 = vector.broadcast %cst_19 : f32 to vector<144x128xf32>
    %c0_i32_20 = arith.constant 0 : i32
    %c17_i32_21 = arith.constant 17 : i32
    %21 = arith.addi %c0_i32_20, %c17_i32_21 : i32
    %c1_i32_22 = arith.constant 1 : i32
    %22 = scf.for %arg18 = %c0_i32_20 to %21 step %c1_i32_22 iter_args(%arg19 = %20) -> (vector<144x128xf32>)  : i32 {
      %c0_39 = arith.constant 0 : index
      %c0_40 = arith.constant 0 : index
      %45 = vector.load %arg8[%c0_39, %c0_40] : memref<144x6xf32, #tpu.memory_space<vmem>>, vector<144x6xf32>
      %46 = arith.index_cast %arg18 : i32 to index
      %c0_41 = arith.constant 0 : index
      %c0_42 = arith.constant 0 : index
      %47 = vector.load %arg17[%46, %c0_41, %c0_42] : memref<17x6x128xf32, #tpu.memory_space<vmem>>, vector<1x6x128xf32>
      %48 = vector.shape_cast %47 : vector<1x6x128xf32> to vector<6x128xf32>
      %cst_43 = arith.constant dense<0.000000e+00> : vector<144x128xf32>
      %49 = tpu.matmul %45, %48, %cst_43 {dimension_numbers = #tpu.dot_dimension_numbers<[1], [0], [0], [1], [0, 0, 1, 1], [], []>} : vector<144x6xf32>, vector<6x128xf32>, vector<144x128xf32> -> vector<144x128xf32>
      %50 = arith.index_cast %arg18 : i32 to index
      %c0_44 = arith.constant 0 : index
      %c0_45 = arith.constant 0 : index
      %51 = vector.load %arg16[%50, %c0_44, %c0_45] : memref<17x144x128xf32, #tpu.memory_space<vmem>>, vector<1x144x128xf32>
      %52 = vector.shape_cast %51 : vector<1x144x128xf32> to vector<144x128xf32>
      %53 = arith.mulf %49, %52 : vector<144x128xf32>
      %54 = arith.addf %arg19, %53 : vector<144x128xf32>
      scf.yield %54 : vector<144x128xf32>
    }
    %c17_i32_23 = arith.constant 17 : i32
    %c0_24 = arith.constant 0 : index
    %c0_25 = arith.constant 0 : index
    %23 = vector.load %arg10[%c0_24, %c0_25] : memref<64x144xbf16, #tpu.memory_space<vmem>>, vector<64x144xbf16>
    %24 = arith.truncf %22 : vector<144x128xf32> to vector<144x128xbf16>
    %cst_26 = arith.constant dense<0.000000e+00> : vector<64x128xf32>
    %25 = tpu.matmul %23, %24, %cst_26 {dimension_numbers = #tpu.dot_dimension_numbers<[1], [0], [0], [1], [0, 0, 1, 1], [], []>} : vector<64x144xbf16>, vector<144x128xbf16>, vector<64x128xf32> -> vector<64x128xf32>
    %c0_27 = arith.constant 0 : index
    %c0_28 = arith.constant 0 : index
    %26 = vector.load %arg11[%c0_27, %c0_28] : memref<64x1xf32, #tpu.memory_space<vmem>>, vector<64x1xf32>
    %27 = vector.broadcast %26 : vector<64x1xf32> to vector<64x128xf32>
    %28 = arith.addf %25, %27 : vector<64x128xf32>
    %cst_29 = arith.constant 0.000000e+00 : f32
    %29 = vector.broadcast %cst_29 : f32 to vector<64x128xf32>
    %30 = arith.maximumf %28, %29 : vector<64x128xf32>
    %c0_30 = arith.constant 0 : index
    %c0_31 = arith.constant 0 : index
    %31 = vector.load %arg12[%c0_30, %c0_31] : memref<1x64xbf16, #tpu.memory_space<vmem>>, vector<1x64xbf16>
    %32 = arith.truncf %30 : vector<64x128xf32> to vector<64x128xbf16>
    %cst_32 = arith.constant dense<0.000000e+00> : vector<1x128xf32>
    %33 = tpu.matmul %31, %32, %cst_32 {dimension_numbers = #tpu.dot_dimension_numbers<[1], [0], [0], [1], [0, 0, 1, 1], [], []>} : vector<1x64xbf16>, vector<64x128xbf16>, vector<1x128xf32> -> vector<1x128xf32>
    %c0_33 = arith.constant 0 : index
    %c0_34 = arith.constant 0 : index
    %34 = vector.load %arg13[%c0_33, %c0_34] : memref<1x1xf32, #tpu.memory_space<vmem>>, vector<1x1xf32>
    %35 = vector.broadcast %34 : vector<1x1xf32> to vector<1x128xf32>
    %36 = arith.addf %33, %35 : vector<1x128xf32>
    %37 = arith.negf %36 : vector<1x128xf32>
    %38 = math.exp %37 : vector<1x128xf32>
    %cst_35 = arith.constant 1.000000e+00 : f32
    %39 = vector.broadcast %cst_35 : f32 to vector<1x128xf32>
    %40 = arith.addf %39, %38 : vector<1x128xf32>
    %41 = arith.divf %39, %40 : vector<1x128xf32>
    %c0_36 = arith.constant 0 : index
    %c0_37 = arith.constant 0 : index
    %c0_38 = arith.constant 0 : index
    %42 = vector.load %arg14[%c0_36, %c0_37, %c0_38] : memref<1x1x128xf32, #tpu.memory_space<vmem>>, vector<1x1x128xf32>
    %43 = vector.shape_cast %42 : vector<1x1x128xf32> to vector<1x128xf32>
    %44 = vector.shape_cast %41 : vector<1x128xf32> to vector<1x1x128xf32>
    tpu.vector_store %arg14[%c0_36, %c0_37, %c0_38], %44 {strides = array<i32>} : memref<1x1x128xf32, #tpu.memory_space<vmem>>, vector<1x1x128xf32>,
    return
  }
  func.func @transform_0(%arg0: i32) -> (i32, i32, i32, i32) {
    %c0_i32 = arith.constant 0 : i32
    %c0_i32_0 = arith.constant 0 : i32
    %c0_i32_1 = arith.constant 0 : i32
    %c0_i32_2 = arith.constant 0 : i32
    return %arg0, %c0_i32, %c0_i32_0, %c0_i32_1 : i32, i32, i32, i32
  }
  func.func @transform_1(%arg0: i32) -> (i32, i32) {
    %c0_i32 = arith.constant 0 : i32
    %c0_i32_0 = arith.constant 0 : i32
    %c0_i32_1 = arith.constant 0 : i32
    return %c0_i32, %c0_i32_0 : i32, i32
  }
  func.func @transform_2(%arg0: i32) -> (i32, i32) {
    %c0_i32 = arith.constant 0 : i32
    %c0_i32_0 = arith.constant 0 : i32
    %c0_i32_1 = arith.constant 0 : i32
    return %c0_i32, %c0_i32_0 : i32, i32
  }
  func.func @transform_3(%arg0: i32) -> (i32, i32) {
    %c0_i32 = arith.constant 0 : i32
    %c0_i32_0 = arith.constant 0 : i32
    %c0_i32_1 = arith.constant 0 : i32
    return %c0_i32, %c0_i32_0 : i32, i32
  }
  func.func @transform_4(%arg0: i32) -> (i32, i32) {
    %c0_i32 = arith.constant 0 : i32
    %c0_i32_0 = arith.constant 0 : i32
    %c0_i32_1 = arith.constant 0 : i32
    return %c0_i32, %c0_i32_0 : i32, i32
  }
  func.func @transform_5(%arg0: i32) -> (i32, i32) {
    %c0_i32 = arith.constant 0 : i32
    %c0_i32_0 = arith.constant 0 : i32
    %c0_i32_1 = arith.constant 0 : i32
    return %c0_i32, %c0_i32_0 : i32, i32
  }
  func.func @transform_6(%arg0: i32) -> (i32, i32) {
    %c0_i32 = arith.constant 0 : i32
    %c0_i32_0 = arith.constant 0 : i32
    %c0_i32_1 = arith.constant 0 : i32
    return %c0_i32, %c0_i32_0 : i32, i32
  }
  func.func @transform_7(%arg0: i32) -> (i32, i32) {
    %c0_i32 = arith.constant 0 : i32
    %c0_i32_0 = arith.constant 0 : i32
    %c0_i32_1 = arith.constant 0 : i32
    return %c0_i32, %c0_i32_0 : i32, i32
  }
  func.func @transform_8(%arg0: i32) -> (i32, i32, i32) {
    %c0_i32 = arith.constant 0 : i32
    %c0_i32_0 = arith.constant 0 : i32
    %c0_i32_1 = arith.constant 0 : i32
    %c0_i32_2 = arith.constant 0 : i32
    return %c0_i32, %c0_i32_0, %c0_i32_1 : i32, i32, i32
  }
  func.func @transform_9(%arg0: i32) -> (i32, i32) {
    %c0_i32 = arith.constant 0 : i32
    %c0_i32_0 = arith.constant 0 : i32
    %c0_i32_1 = arith.constant 0 : i32
    return %c0_i32, %c0_i32_0 : i32, i32
  }
  func.func @transform_10(%arg0: i32) -> (i32, i32) {
    %c0_i32 = arith.constant 0 : i32
    %c0_i32_0 = arith.constant 0 : i32
    %c0_i32_1 = arith.constant 0 : i32
    return %c0_i32, %c0_i32_0 : i32, i32
  }
  func.func @transform_11(%arg0: i32) -> (i32, i32) {
    %c0_i32 = arith.constant 0 : i32
    %c0_i32_0 = arith.constant 0 : i32
    %c0_i32_1 = arith.constant 0 : i32
    return %c0_i32, %c0_i32_0 : i32, i32
  }
  func.func @transform_12(%arg0: i32) -> (i32, i32) {
    %c0_i32 = arith.constant 0 : i32
    %c0_i32_0 = arith.constant 0 : i32
    %c0_i32_1 = arith.constant 0 : i32
    return %c0_i32, %c0_i32_0 : i32, i32
  }
  func.func @transform_13(%arg0: i32) -> (i32, i32, i32) {
    %c0_i32 = arith.constant 0 : i32
    %c0_i32_0 = arith.constant 0 : i32
    %c0_i32_1 = arith.constant 0 : i32
    return %arg0, %c0_i32, %c0_i32_0 : i32, i32, i32
  }
}

</mosaic_0001>

<bundles_post_ra>
// kernel: attention_net_forward.1
= control target key start
LH: loop header
LB: loop body
LE: loop exit
PB: predicated region body
PF: predicated region fallthrough
CT: control target
= control target key end

     0   :  { %s6418_s27 = smov 0   ;;  %s8657_s0 = inlined_call_operand.vmem [shape: bf16[1,17,120,128], index: 0, kind: input, shape index: {}]   ;;  %s8658_s1 = inlined_call_operand.vmem [shape: bf16[576,120], index: 1, kind: input, shape index: {}]   ;;  %s8659_s2 = inlined_call_operand.vmem [shape: bf16[576,144], index: 2, kind: input, shape index: {}]   ;;  %s8660_s3 = inlined_call_operand.vmem [shape: f32[576,1], index: 3, kind: input, shape index: {}]   ;;  %s8661_s4 = inlined_call_operand.vmem [shape: bf16[144,144], index: 4, kind: input, shape index: {}]   ;;  %s8662_s5 = inlined_call_operand.vmem [shape: f32[144,1], index: 5, kind: input, shape index: {}]   ;;  %s8663_s6 = inlined_call_operand.vmem [shape: bf16[6,144], index: 6, kind: input, shape index: {}]   ;;  %s8664_s7 = inlined_call_operand.vmem [shape: f32[144,6], index: 7, kind: input, shape index: {}]   ;;  %s8665_s8 = inlined_call_operand.vmem [shape: f32[17,6,1], index: 8, kind: input, shape index: {}]   ;;  %s8666_s9 = inlined_call_operand.vmem [shape: bf16[64,144], index: 9, kind: input, shape index: {}]   ;;  %s8667_s10 = inlined_call_operand.vmem [shape: f32[64,1], index: 10, kind: input, shape index: {}]   ;;  %s8668_s11 = inlined_call_operand.vmem [shape: bf16[1,64], index: 11, kind: input, shape index: {}]   ;;  %s8669_s12 = inlined_call_operand.<no memory space> [shape: f32[1,1], index: 12, kind: input, shape index: {}]   ;;  %s8670_s13 = inlined_call_operand.vmem [shape: f32[1,1,128], index: 13, kind: output, shape index: {}]  }
   0x1   :  { %v18_v0 = vstv %s8669_s12 }
   0x2   :  { %19 = vst [vmem:[#allocation5] sm:$0x1] %v18_v0 }
   0x3 LB: > { %v145_v1 = vld [vmem:[%s8660_s3 + $0x10] sm:$0xff]  ;;  %v143_v2 = vld [vmem:[%s8660_s3] sm:$0xff]  ;;  %v6339_v3 = vmov 0   ;;  %s4604_s12 = smul.u32 60, %s6109_s27  ;;  %v146_v4 = vld [vmem:[%s8660_s3 + $0x18] sm:$0xff]  ;;  %vm909_vm0 = vcmask 1043456   ;;  %s6109_s27 = sphi %s6418_s27, %s52_s27  }
   0x4   : > { %5311 = vset.pattern.permute.xlu1 %v6339_v3  ;;  %5310 = vset.pattern.permute.xlu0 %v6339_v3  ;;  %v144_v5 = vld [vmem:[%s8660_s3 + $0x8] sm:$0xff]  ;;  %v147_v10 = vld [vmem:[%s8660_s3 + $0x20] sm:$0xff]  ;;  %v150_v12 = vld [vmem:[%s8660_s3 + $0x38] sm:$0xff]  ;;  %vm800_vm1 = vcmask 982016   ;;  %s1234_s28 = smul.u32 576, %s6109_s27  ;;  %s52_s27 = sadd.s32 1, %s6109_s27  }
   0x5   : > { %227 = vperm.xlu1 %5311, %v145_v1   ;;  %217 = vperm.xlu0 %5310, %v143_v2   ;;  %s6439_s21 = scalar_lea.vmem %s8657_s0, %s4604_s12  ;;  %v148_v7 = vld [vmem:[%s8660_s3 + $0x28] sm:$0xff]  ;;  %v149_v13 = vld [vmem:[%s8660_s3 + $0x30] sm:$0xff]  ;;  %v151_v16 = vld [vmem:[%s8660_s3 + $0x40] sm:$0xff]  ;;  %p49_p0 = scmp.ge.s32.totalorder %s52_s27, 17  }
   0x6   : > { %v5312_v6 = vld [vmem:[%s6439_s21 + $0x38] ss:$0 sps:$4 sm:$0xff]   ;;  %v5313_v8 = vld [vmem:[%s6439_s21 + $0x30] sm:$0xff]   ;;  %v5314_v11 = vld [vmem:[%s6439_s21 + $0x28] sm:$0xff]   ;;  %s6881_s29 = scalar_lea.vmem [#allocation2], %s1234_s28  ;;  %s7100_s0 = smov (%p49_p0), 0  }
   0x7   : > { %4838 = vmatprep.subr.msk.bf16.mxu0 %vm909_vm0, %v5312_v6  ;;  %4839 = vmatprep.subr.msk.bf16.mxu1 %vm909_vm0, %v5312_v6  ;;  %v911_v9 = vsel %vm909_vm0, %v5312_v6, 0  ;;  %v152_v14 = vld [vmem:[%s8660_s3 + $0x48] sm:$0xff]  ;;  %v5315_v15 = vld [vmem:[%s6439_s21 + $0x20] sm:$0xff]   ;;  %v5321_v18 = vld [vmem:[%s8658_s1 + $0x90] sm:$0xff]  }
   0x8   : > { %4674 = vmatpush3.bf16.msra.mxu0 %v911_v9  ;;  %4810 = vmatpush3.bf16.msra.mxu1 %v911_v9  ;;  %v5320_v17 = vld [vmem:[%s8658_s1] sm:$0xff]   ;;  %v5316_v19 = vld [vmem:[%s6439_s21 + $0x18] sm:$0xff]   ;;  %v153_v21 = vld [vmem:[%s8660_s3 + $0x50] sm:$0xff] }
   0x9   : > { %232 = vperm.xlu1 %5311, %v146_v4   ;;  %222 = vperm.xlu0 %5310, %v144_v5   ;;  %v154_v20 = vld [vmem:[%s8660_s3 + $0x58] sm:$0xff]  ;;  %v5317_v22 = vld [vmem:[%s6439_s21 + $0x10] sm:$0xff]   ;;  %v156_v23 = vld [vmem:[%s8660_s3 + $0x68] sm:$0xff] }
   0xa   : > { %4675 = vmatprep.subr.bf16.mxu0 %v5313_v8  ;;  %4803 = vmatprep.subr.bf16.mxu1 %v5313_v8  ;;  %v155_v24 = vld [vmem:[%s8660_s3 + $0x60] sm:$0xff]  ;;  %v5318_v25 = vld [vmem:[%s6439_s21 + $0x8] sm:$0xff]   ;;  %v158_v26 = vld [vmem:[%s8660_s3 + $0x78] sm:$0xff] }
   0xb   : > { %4689 = vmatprep.mubr.msk.bf16.mxu0 %vm800_vm1, %v5320_v17  ;;  %4725 = vmatprep.mubr.msk.bf16.mxu1 %vm800_vm1, %v5321_v18  ;;  %v157_v27 = vld [vmem:[%s8660_s3 + $0x70] sm:$0xff]  ;;  %v5319_v28 = vld [vmem:[%s6439_s21] sm:$0xff]   ;;  %v160_v29 = vld [vmem:[%s8660_s3 + $0x88] sm:$0xff] }
   0xc   : > { %4676 = vmatpush3.bf16.msra.mxu0 %v5313_v8  ;;  %4811 = vmatpush3.bf16.msra.mxu1 %v5313_v8  ;;  %v159_v30 = vld [vmem:[%s8660_s3 + $0x80] sm:$0xff]  ;;  %v162_v31 = vld [vmem:[%s8660_s3 + $0x98] sm:$0xff]  ;;  %v161_v32 = vld [vmem:[%s8660_s3 + $0x90] sm:$0xff] }
   0xd   : > { %242 = vperm.xlu1 %5311, %v148_v7   ;;  %237 = vperm.xlu0 %5310, %v147_v10   ;;  %v5322_v33 = vld [vmem:[%s8658_s1 + $0x8] sm:$0xff]   ;;  %v5323_v34 = vld [vmem:[%s8658_s1 + $0x98] sm:$0xff]   ;;  %v5324_v35 = vld [vmem:[%s8658_s1 + $0x10] sm:$0xff]  }
   0xe   : > { %4677 = vmatprep.subr.bf16.mxu0 %v5314_v11  ;;  %4804 = vmatprep.subr.bf16.mxu1 %v5314_v11  ;;  %v5325_v36 = vld [vmem:[%s8658_s1 + $0xa0] sm:$0xff]   ;;  %v164_v37 = vld [vmem:[%s8660_s3 + $0xa8] sm:$0xff]  ;;  %v166_v39 = vld [vmem:[%s8660_s3 + $0xb8] sm:$0xff] }
   0xf   : > { %v163_v38 = vld [vmem:[%s8660_s3 + $0xa0] sm:$0xff]  ;;  %v165_v40 = vld [vmem:[%s8660_s3 + $0xb0] sm:$0xff]  ;;  %v5326_v41 = vld [vmem:[%s8658_s1 + $0x18] sm:$0xff]  }
  0x10   : > { %4678 = vmatpush3.bf16.msra.mxu0 %v5314_v11  ;;  %4812 = vmatpush3.bf16.msra.mxu1 %v5314_v11  ;;  %v5327_v42 = vld [vmem:[%s8658_s1 + $0xa8] sm:$0xff]   ;;  %v5328_v43 = vld [vmem:[%s8658_s1 + $0x20] sm:$0xff]   ;;  %v5329_v44 = vld [vmem:[%s8658_s1 + $0xb0] sm:$0xff]  }
  0x11   : > { %252 = vperm.xlu1 %5311, %v150_v12   ;;  %247 = vperm.xlu0 %5310, %v149_v13   ;;  %v168_v45 = vld [vmem:[%s8660_s3 + $0xc8] sm:$0xff]  ;;  %v167_v46 = vld [vmem:[%s8660_s3 + $0xc0] sm:$0xff]  ;;  %v170_v47 = vld [vmem:[%s8660_s3 + $0xd8] sm:$0xff] }
  0x12   : > { %4679 = vmatprep.subr.bf16.mxu0 %v5315_v15  ;;  %4805 = vmatprep.subr.bf16.mxu1 %v5315_v15  ;;  %v169_v48 = vld [vmem:[%s8660_s3 + $0xd0] sm:$0xff]  ;;  %v5330_v49 = vld [vmem:[%s8658_s1 + $0x28] sm:$0xff]   ;;  %v5331_v50 = vld [vmem:[%s8658_s1 + $0xb8] sm:$0xff]  }
  0x13   : > { %v5332_v51 = vld [vmem:[%s8658_s1 + $0x30] sm:$0xff]   ;;  %v5333_v52 = vld [vmem:[%s8658_s1 + $0xc0] sm:$0xff]   ;;  %v172_v53 = vld [vmem:[%s8660_s3 + $0xe8] sm:$0xff] }
  0x14   : > { %4680 = vmatpush3.bf16.msra.mxu0 %v5315_v15  ;;  %4813 = vmatpush3.bf16.msra.mxu1 %v5315_v15  ;;  %v171_v54 = vld [vmem:[%s8660_s3 + $0xe0] sm:$0xff]  ;;  %v174_v55 = vld [vmem:[%s8660_s3 + $0xf8] sm:$0xff]  ;;  %v173_v56 = vld [vmem:[%s8660_s3 + $0xf0] sm:$0xff] }
  0x15   : > { %262 = vperm.xlu1 %5311, %v152_v14   ;;  %257 = vperm.xlu0 %5310, %v151_v16   ;;  %v5334_v57 = vld [vmem:[%s8658_s1 + $0x38] sm:$0xff]   ;;  %v5335_v58 = vld [vmem:[%s8658_s1 + $0xc8] sm:$0xff]   ;;  %v5336_v59 = vld [vmem:[%s8658_s1 + $0x40] sm:$0xff]  }
  0x16   : > { %4681 = vmatprep.subr.bf16.mxu0 %v5316_v19  ;;  %4806 = vmatprep.subr.bf16.mxu1 %v5316_v19  ;;  %v5337_v60 = vld [vmem:[%s8658_s1 + $0xd0] sm:$0xff]   ;;  %v176_v61 = vld [vmem:[%s8660_s3 + $0x108] sm:$0xff]  ;;  %v175_v62 = vld [vmem:[%s8660_s3 + $0x100] sm:$0xff] }
  0x17   : > { %v178_v63 = vld [vmem:[%s8660_s3 + $0x118] sm:$0xff]  ;;  %v177_v0 = vld [vmem:[%s8660_s3 + $0x110] sm:$0xff]  ;;  %v5338_v1 = vld [vmem:[%s8658_s1 + $0x48] sm:$0xff]  }
  0x18   : > { %4682 = vmatpush3.bf16.msra.mxu0 %v5316_v19  ;;  %4814 = vmatpush3.bf16.msra.mxu1 %v5316_v19  ;;  %v5339_v2 = vld [vmem:[%s8658_s1 + $0xd8] sm:$0xff]   ;;  %v5340_v3 = vld [vmem:[%s8658_s1 + $0x50] sm:$0xff]   ;;  %v5341_v4 = vld [vmem:[%s8658_s1 + $0xe0] sm:$0xff]  }
  0x19   : > { %272 = vperm.xlu1 %5311, %v154_v20   ;;  %267 = vperm.xlu0 %5310, %v153_v21   ;;  %v180_v5 = vld [vmem:[%s8660_s3 + $0x128] sm:$0xff]  ;;  %v179_v6 = vld [vmem:[%s8660_s3 + $0x120] sm:$0xff]  ;;  %v182_v7 = vld [vmem:[%s8660_s3 + $0x138] sm:$0xff] }
  0x1a   : > { %4683 = vmatprep.subr.bf16.mxu0 %v5317_v22  ;;  %4807 = vmatprep.subr.bf16.mxu1 %v5317_v22  ;;  %v181_v8 = vld [vmem:[%s8660_s3 + $0x130] sm:$0xff]  ;;  %v5342_v9 = vld [vmem:[%s8658_s1 + $0x58] sm:$0xff]   ;;  %v5343_v10 = vld [vmem:[%s8658_s1 + $0xe8] sm:$0xff]  }
  0x1b   : > { %v5344_v11 = vld [vmem:[%s8658_s1 + $0x60] sm:$0xff]   ;;  %v5345_v12 = vld [vmem:[%s8658_s1 + $0xf0] sm:$0xff]   ;;  %v184_v13 = vld [vmem:[%s8660_s3 + $0x148] sm:$0xff] }
  0x1c   : > { %4684 = vmatpush3.bf16.msra.mxu0 %v5317_v22  ;;  %4815 = vmatpush3.bf16.msra.mxu1 %v5317_v22  ;;  %v183_v14 = vld [vmem:[%s8660_s3 + $0x140] sm:$0xff]  ;;  %v186_v15 = vld [vmem:[%s8660_s3 + $0x158] sm:$0xff]  ;;  %v185_v16 = vld [vmem:[%s8660_s3 + $0x150] sm:$0xff] }
  0x1d   : > { %282 = vperm.xlu1 %5311, %v156_v23   ;;  %277 = vperm.xlu0 %5310, %v155_v24   ;;  %v5346_v17 = vld [vmem:[%s8658_s1 + $0x68] sm:$0xff]   ;;  %v5347_v18 = vld [vmem:[%s8658_s1 + $0xf8] sm:$0xff]   ;;  %v5348_v19 = vld [vmem:[%s8658_s1 + $0x70] sm:$0xff]  }
  0x1e   : > { %4685 = vmatprep.subr.bf16.mxu0 %v5318_v25  ;;  %4808 = vmatprep.subr.bf16.mxu1 %v5318_v25  ;;  %v5349_v20 = vld [vmem:[%s8658_s1 + $0x100] sm:$0xff]   ;;  %v188_v21 = vld [vmem:[%s8660_s3 + $0x168] sm:$0xff]  ;;  %v190_v23 = vld [vmem:[%s8660_s3 + $0x178] sm:$0xff] }
  0x1f   : > { %v187_v22 = vld [vmem:[%s8660_s3 + $0x160] sm:$0xff]  ;;  %v189_v24 = vld [vmem:[%s8660_s3 + $0x170] sm:$0xff] }
  0x20   : > { %4686 = vmatpush3.bf16.msra.mxu0 %v5318_v25  ;;  %4816 = vmatpush3.bf16.msra.mxu1 %v5318_v25  ;;  %v5350_v25 = vld [vmem:[%s8658_s1 + $0x78] sm:$0xff]  }
  0x21   : > { %292 = vperm.xlu1 %5311, %v158_v26   ;;  %287 = vperm.xlu0 %5310, %v157_v27   ;;  %v5351_v26 = vld [vmem:[%s8658_s1 + $0x108] sm:$0xff]   ;;  %v5352_v27 = vld [vmem:[%s8658_s1 + $0x80] sm:$0xff]  }
  0x22   : > { %4687 = vmatprep.subr.bf16.mxu0 %v5319_v28  ;;  %4809 = vmatprep.subr.bf16.mxu1 %v5319_v28 }
  0x24   : > { %4688 = vmatpush3.bf16.msra.mxu0 %v5319_v28  ;;  %4817 = vmatpush3.bf16.msra.mxu1 %v5319_v28  ;;  %v5353_v28 = vld [vmem:[%s8658_s1 + $0x110] sm:$0xff]  }
  0x25   : > { %302 = vperm.xlu1 %5311, %v160_v29   ;;  %297 = vperm.xlu0 %5310, %v159_v30   ;;  %v192_v29 = vld [vmem:[%s8660_s3 + $0x188] sm:$0xff]  ;;  %v191_v30 = vld [vmem:[%s8660_s3 + $0x180] sm:$0xff] }
  0x27   : > { %4690 = vmatmul.mubr.msk.bf16.vlgmr.msra.gmra.mxu0 %vm800_vm1, %v5322_v33  ;;  %4726 = vmatmul.mubr.msk.bf16.vlgmr.msra.gmra.mxu1 %vm800_vm1, %v5323_v34  ;;  %v5354_v33 = vld [vmem:[%s8658_s1 + $0x88] sm:$0xff]   ;;  %v5355_v34 = vld [vmem:[%s8658_s1 + $0x118] sm:$0xff]  }
  0x28   : > { %4693 = vmatprep.mubr.msk.bf16.mxu0 %vm800_vm1, %v5324_v35  ;;  %4729 = vmatprep.mubr.msk.bf16.mxu1 %vm800_vm1, %v5325_v36  ;;  %v196_v35 = vld [vmem:[%s8660_s3 + $0x1a8] sm:$0xff]  ;;  %v195_v36 = vld [vmem:[%s8660_s3 + $0x1a0] sm:$0xff] }
  0x29   : > { %312 = vperm.xlu1 %5311, %v162_v31   ;;  %307 = vperm.xlu0 %5310, %v161_v32   ;;  %v194_v31 = vld [vmem:[%s8660_s3 + $0x198] sm:$0xff]  ;;  %v193_v32 = vld [vmem:[%s8660_s3 + $0x190] sm:$0xff] }
  0x2d   : > { %322 = vperm.xlu1 %5311, %v164_v37   ;;  %317 = vperm.xlu0 %5310, %v163_v38   ;;  %v198_v37 = vld [vmem:[%s8660_s3 + $0x1b8] sm:$0xff]  ;;  %v197_v38 = vld [vmem:[%s8660_s3 + $0x1b0] sm:$0xff] }
  0x2f   : > { %4694 = vmatmul.mubr.msk.bf16.gmra.mxu0 %vm800_vm1, %v5326_v41  ;;  %4730 = vmatmul.mubr.msk.bf16.gmra.mxu1 %vm800_vm1, %v5327_v42  ;;  %v202_v41 = vld [vmem:[%s8660_s3 + $0x1d8] sm:$0xff]  ;;  %v201_v42 = vld [vmem:[%s8660_s3 + $0x1d0] sm:$0xff] }
  0x30   : > { %4697 = vmatprep.mubr.msk.bf16.mxu0 %vm800_vm1, %v5328_v43  ;;  %4733 = vmatprep.mubr.msk.bf16.mxu1 %vm800_vm1, %v5329_v44  ;;  %v204_v43 = vld [vmem:[%s8660_s3 + $0x1e8] sm:$0xff]  ;;  %v203_v44 = vld [vmem:[%s8660_s3 + $0x1e0] sm:$0xff] }
  0x31   : > { %332 = vperm.xlu1 %5311, %v166_v39   ;;  %327 = vperm.xlu0 %5310, %v165_v40   ;;  %v200_v39 = vld [vmem:[%s8660_s3 + $0x1c8] sm:$0xff]  ;;  %v199_v40 = vld [vmem:[%s8660_s3 + $0x1c0] sm:$0xff] }
  0x35   : > { %342 = vperm.xlu1 %5311, %v168_v45   ;;  %337 = vperm.xlu0 %5310, %v167_v46   ;;  %v206_v45 = vld [vmem:[%s8660_s3 + $0x1f8] sm:$0xff]  ;;  %v205_v46 = vld [vmem:[%s8660_s3 + $0x1f0] sm:$0xff] }
  0x37   : > { %4698 = vmatmul.mubr.msk.bf16.gmra.mxu0 %vm800_vm1, %v5330_v49  ;;  %4734 = vmatmul.mubr.msk.bf16.gmra.mxu1 %vm800_vm1, %v5331_v50  ;;  %v208_v49 = vld [vmem:[%s8660_s3 + $0x208] sm:$0xff]  ;;  %v207_v50 = vld [vmem:[%s8660_s3 + $0x200] sm:$0xff] }
  0x38   : > { %4701 = vmatprep.mubr.msk.bf16.mxu0 %vm800_vm1, %v5332_v51  ;;  %4737 = vmatprep.mubr.msk.bf16.mxu1 %vm800_vm1, %v5333_v52 }
  0x39   : > { %352 = vperm.xlu1 %5311, %v170_v47   ;;  %347 = vperm.xlu0 %5310, %v169_v48  }
  0x3d   : > { %362 = vperm.xlu1 %5311, %v172_v53   ;;  %357 = vperm.xlu0 %5310, %v171_v54   ;;  %v210_v53 = vld [vmem:[%s8660_s3 + $0x218] sm:$0xff]  ;;  %v209_v54 = vld [vmem:[%s8660_s3 + $0x210] sm:$0xff] }
  0x3f   : > { %4702 = vmatmul.mubr.msk.bf16.gmra.mxu0 %vm800_vm1, %v5334_v57  ;;  %4738 = vmatmul.mubr.msk.bf16.gmra.mxu1 %vm800_vm1, %v5335_v58  ;;  %v212_v57 = vld [vmem:[%s8660_s3 + $0x228] sm:$0xff]  ;;  %v211_v58 = vld [vmem:[%s8660_s3 + $0x220] sm:$0xff] }
  0x40   : > { %4705 = vmatprep.mubr.msk.bf16.mxu0 %vm800_vm1, %v5336_v59  ;;  %4741 = vmatprep.mubr.msk.bf16.mxu1 %vm800_vm1, %v5337_v60 }
  0x41   : > { %372 = vperm.xlu1 %5311, %v174_v55   ;;  %367 = vperm.xlu0 %5310, %v173_v56  }
  0x45   : > { %382 = vperm.xlu1 %5311, %v176_v61   ;;  %377 = vperm.xlu0 %5310, %v175_v62   ;;  %v214_v61 = vld [vmem:[%s8660_s3 + $0x238] sm:$0xff]  ;;  %v213_v62 = vld [vmem:[%s8660_s3 + $0x230] sm:$0xff] }
  0x47   : > { %4706 = vmatmul.mubr.msk.bf16.gmra.mxu0 %vm800_vm1, %v5338_v1  ;;  %4742 = vmatmul.mubr.msk.bf16.gmra.mxu1 %vm800_vm1, %v5339_v2 }
  0x48   : > { %4709 = vmatprep.mubr.msk.bf16.mxu0 %vm800_vm1, %v5340_v3  ;;  %4745 = vmatprep.mubr.msk.bf16.mxu1 %vm800_vm1, %v5341_v4 }
  0x49   : > { %392 = vperm.xlu1 %5311, %v178_v63   ;;  %387 = vperm.xlu0 %5310, %v177_v0  }
  0x4d   : > { %402 = vperm.xlu1 %5311, %v180_v5   ;;  %397 = vperm.xlu0 %5310, %v179_v6  }
  0x4f   : > { %4710 = vmatmul.mubr.msk.bf16.gmra.mxu0 %vm800_vm1, %v5342_v9  ;;  %4746 = vmatmul.mubr.msk.bf16.gmra.mxu1 %vm800_vm1, %v5343_v10 }
  0x50   : > { %4713 = vmatprep.mubr.msk.bf16.mxu0 %vm800_vm1, %v5344_v11  ;;  %4749 = vmatprep.mubr.msk.bf16.mxu1 %vm800_vm1, %v5345_v12 }
  0x51   : > { %412 = vperm.xlu1 %5311, %v182_v7   ;;  %407 = vperm.xlu0 %5310, %v181_v8  }
  0x55   : > { %422 = vperm.xlu1 %5311, %v184_v13   ;;  %417 = vperm.xlu0 %5310, %v183_v14  }
  0x57   : > { %4714 = vmatmul.mubr.msk.bf16.gmra.mxu0 %vm800_vm1, %v5346_v17  ;;  %4750 = vmatmul.mubr.msk.bf16.gmra.mxu1 %vm800_vm1, %v5347_v18 }
  0x58   : > { %4717 = vmatprep.mubr.msk.bf16.mxu0 %vm800_vm1, %v5348_v19  ;;  %4753 = vmatprep.mubr.msk.bf16.mxu1 %vm800_vm1, %v5349_v20 }
  0x59   : > { %432 = vperm.xlu1 %5311, %v186_v15   ;;  %427 = vperm.xlu0 %5310, %v185_v16  }
  0x5d   : > { %442 = vperm.xlu1 %5311, %v188_v21   ;;  %437 = vperm.xlu0 %5310, %v187_v22  }
  0x5f   : > { %4718 = vmatmul.mubr.msk.bf16.gmra.mxu0 %vm800_vm1, %v5350_v25  ;;  %4754 = vmatmul.mubr.msk.bf16.gmra.mxu1 %vm800_vm1, %v5351_v26 }
  0x60   : > { %4721 = vmatprep.mubr.msk.bf16.mxu0 %vm800_vm1, %v5352_v27  ;;  %4757 = vmatprep.mubr.msk.bf16.mxu1 %vm800_vm1, %v5353_v28 }
  0x61   : > { %452 = vperm.xlu1 %5311, %v190_v23   ;;  %447 = vperm.xlu0 %5310, %v189_v24  }
  0x65   : > { %462 = vperm.xlu1 %5311, %v192_v29   ;;  %457 = vperm.xlu0 %5310, %v191_v30  }
  0x67   : > { %4722 = vmatmul.mubr.msk.bf16.gmra.mxu0 %vm800_vm1, %v5354_v33  ;;  %4758 = vmatmul.mubr.msk.bf16.gmra.mxu1 %vm800_vm1, %v5355_v34 }
  0x69   : > { %472 = vperm.xlu1 %5311, %v194_v31   ;;  %467 = vperm.xlu0 %5310, %v193_v32  }
  0x6d   : > { %482 = vperm.xlu1 %5311, %v196_v35   ;;  %477 = vperm.xlu0 %5310, %v195_v36  }
  0x71   : > { %492 = vperm.xlu1 %5311, %v198_v37   ;;  %487 = vperm.xlu0 %5310, %v197_v38  }
  0x75   : > { %502 = vperm.xlu1 %5311, %v200_v39   ;;  %497 = vperm.xlu0 %5310, %v199_v40  }
  0x79   : > { %512 = vperm.xlu1 %5311, %v202_v41   ;;  %507 = vperm.xlu0 %5310, %v201_v42  }
  0x7d   : > { %522 = vperm.xlu1 %5311, %v204_v43   ;;  %517 = vperm.xlu0 %5310, %v203_v44  }
  0x80   : > { %v6773_v47 = vpop.permute.xlu1 %227  ;;  %v6775_v48 = vpop.permute.xlu0 %217 }
  0x81   : > { %532 = vperm.xlu1 %5311, %v206_v45   ;;  %527 = vperm.xlu0 %5310, %v205_v46  }
  0x84   : > { %v6783_v51 = vpop.permute.xlu1 %232  ;;  %v6785_v52 = vpop.permute.xlu0 %222 }
  0x85   : > { %542 = vperm.xlu1 %5311, %v208_v49   ;;  %537 = vperm.xlu0 %5310, %v207_v50  }
  0x88   : > { %v6793_v55 = vpop.permute.xlu1 %242  ;;  %v6795_v56 = vpop.permute.xlu0 %237 }
  0x89   : > { %552 = vperm.xlu1 %5311, %v210_v53   ;;  %547 = vperm.xlu0 %5310, %v209_v54  }
  0x8c   : > { %v6803_v59 = vpop.permute.xlu1 %252  ;;  %v6805_v60 = vpop.permute.xlu0 %247 }
  0x8d   : > { %562 = vperm.xlu1 %5311, %v212_v57   ;;  %557 = vperm.xlu0 %5310, %v211_v58  }
  0x90   : > { %v6813_v63 = vpop.permute.xlu1 %262  ;;  %v6815_v0 = vpop.permute.xlu0 %257 }
  0x91   : > { %572 = vperm.xlu1 %5311, %v214_v61   ;;  %567 = vperm.xlu0 %5310, %v213_v62  }
  0x94   : > { %v6817_v1 = vpop.permute.xlu1 %272  ;;  %v6819_v2 = vpop.permute.xlu0 %267 }
  0x98   : > { %v6821_v3 = vpop.permute.xlu1 %282  ;;  %v6823_v4 = vpop.permute.xlu0 %277 }
  0x9c   : > { %v6825_v5 = vpop.permute.xlu1 %292  ;;  %v6827_v6 = vpop.permute.xlu0 %287 }
  0xa0   : > { %v6829_v7 = vpop.permute.xlu1 %302  ;;  %v6831_v8 = vpop.permute.xlu0 %297 }
  0xa4   : > { %v6833_v9 = vpop.permute.xlu1 %312  ;;  %v6835_v10 = vpop.permute.xlu0 %307 }
  0xa8   : > { %v6837_v11 = vpop.permute.xlu1 %322  ;;  %v6839_v12 = vpop.permute.xlu0 %317 }
  0xac   : > { %v6841_v13 = vpop.permute.xlu1 %332  ;;  %v6843_v14 = vpop.permute.xlu0 %327 }
  0xb0   : > { %v6845_v15 = vpop.permute.xlu1 %342  ;;  %v6847_v16 = vpop.permute.xlu0 %337 }
  0xb4   : > { %v6849_v17 = vpop.permute.xlu1 %352  ;;  %v6851_v18 = vpop.permute.xlu0 %347 }
  0xb8   : > { %v6853_v19 = vpop.permute.xlu1 %362  ;;  %v6855_v20 = vpop.permute.xlu0 %357 }
  0xbc   : > { %v6857_v21 = vpop.permute.xlu1 %372  ;;  %v6859_v22 = vpop.permute.xlu0 %367 }
  0xc0   : > { %v6861_v23 = vpop.permute.xlu1 %382  ;;  %v6863_v24 = vpop.permute.xlu0 %377 }
  0xc4   : > { %v6865_v25 = vpop.permute.xlu1 %392  ;;  %v6867_v26 = vpop.permute.xlu0 %387 }
  0xc8   : > { %v403_v27 = vpop.permute.xlu1 %402  ;;  %v398_v28 = vpop.permute.xlu0 %397 }
  0xcc   : > { %v408_v29 = vpop.permute.xlu0 %407  ;;  %v413_v30 = vpop.permute.xlu1 %412 }
  0xd0   : > { %v418_v31 = vpop.permute.xlu0 %417  ;;  %v423_v32 = vpop.permute.xlu1 %422 }
  0xd4   : > { %v428_v33 = vpop.permute.xlu0 %427  ;;  %v433_v34 = vpop.permute.xlu1 %432 }
  0xd8   : > { %v6869_v35 = vpop.permute.xlu0 %437  ;;  %v6871_v36 = vpop.permute.xlu1 %442 }
  0xdc   : > { %v448_v37 = vpop.permute.xlu0 %447  ;;  %v6874_v38 = vpop.permute.xlu1 %452 }
  0xe0   : > { %v6876_v39 = vpop.permute.xlu0 %457  ;;  %v6879_v44 = vpop.permute.xlu1 %462 }
  0xe4   : > { %v6885_v49 = vpop.permute.xlu0 %467 }
  0xe7   : > { %v4691_v40 = vpop.f32.mrf.mxu0  ;;  %v4727_v41 = vpop.f32.mrf.mxu1 }
  0xe8   : > { %v956_v42 = vadd.f32 %v4691_v40, %v6773_v47  ;;  %v1100_v43 = vadd.f32 %v4727_v41, %v408_v29  ;;  %v6891_v29 = vpop.permute.xlu1 %472 }
  0xe9   : > { %v947_v45 = vpop.f32.mrf.mxu0  ;;  %v1091_v46 = vpop.f32.mrf.mxu1 }
  0xea   : > { %1238 = vst [vmem:[%s6881_s29 + $0x10] sm:$0xff] %v956_v42  ;;  %1274 = vst [vmem:[%s6881_s29 + $0x130] sm:$0xff] %v1100_v43  ;;  %v948_v50 = vadd.f32 %v947_v45, %v6775_v48  ;;  %v1092_v47 = vadd.f32 %v1091_v46, %v398_v28  ;;  %v6896_v42 = vpop.permute.xlu0 %477 }
  0xeb   : > { %v4692_v53 = vpop.f32.mrf.mxu0  ;;  %v4728_v54 = vpop.f32.mrf.mxu1 }
  0xec   : > { %1236 = vst [vmem:[%s6881_s29] sm:$0xff] %v948_v50  ;;  %1272 = vst [vmem:[%s6881_s29 + $0x120] sm:$0xff] %v1092_v47  ;;  %v959_v57 = vadd.f32 %v4692_v53, %v6783_v51  ;;  %v1103_v58 = vadd.f32 %v4728_v54, %v413_v30  ;;  %v6904_v47 = vpop.permute.xlu1 %482 }
  0xed   : > { %v950_v61 = vpop.f32.mrf.mxu0  ;;  %v1094_v62 = vpop.f32.mrf.mxu1 }
  0xee   : > { %1239 = vst [vmem:[%s6881_s29 + $0x18] sm:$0xff] %v959_v57  ;;  %1275 = vst [vmem:[%s6881_s29 + $0x138] sm:$0xff] %v1103_v58  ;;  %v951_v48 = vadd.f32 %v950_v61, %v6785_v52  ;;  %v1095_v28 = vadd.f32 %v1094_v62, %v403_v27  ;;  %v6909_v57 = vpop.permute.xlu0 %487 }
  0xef   : > { %v4695_v40 = vpop.f32.mrf.mxu0  ;;  %v4731_v41 = vpop.f32.mrf.mxu1 }
  0xf0   : > { %1237 = vst [vmem:[%s6881_s29 + $0x8] sm:$0xff] %v951_v48  ;;  %1273 = vst [vmem:[%s6881_s29 + $0x128] sm:$0xff] %v1095_v28  ;;  %v972_v51 = vadd.f32 %v4695_v40, %v6805_v60  ;;  %v1116_v30 = vadd.f32 %v4731_v41, %v428_v33  ;;  %v6917_v28 = vpop.permute.xlu1 %492 }
  0xf1   : > { %v963_v43 = vpop.f32.mrf.mxu0  ;;  %v1107_v45 = vpop.f32.mrf.mxu1 }
  0xf2   : > { %1242 = vst [vmem:[%s6881_s29 + $0x30] sm:$0xff] %v972_v51  ;;  %1278 = vst [vmem:[%s6881_s29 + $0x150] sm:$0xff] %v1116_v30  ;;  %v964_v52 = vadd.f32 %v963_v43, %v6795_v56  ;;  %v1108_v27 = vadd.f32 %v1107_v45, %v418_v31  ;;  %v6923_v51 = vpop.permute.xlu0 %497 }
  0xf3   : > { %v4696_v46 = vpop.f32.mrf.mxu0  ;;  %v4732_v50 = vpop.f32.mrf.mxu1 }
  0xf4   : > { %1240 = vst [vmem:[%s6881_s29 + $0x20] sm:$0xff] %v964_v52  ;;  %1276 = vst [vmem:[%s6881_s29 + $0x140] sm:$0xff] %v1108_v27  ;;  %v975_v60 = vadd.f32 %v4696_v46, %v6803_v59  ;;  %v1119_v33 = vadd.f32 %v4732_v50, %v433_v34  ;;  %v6933_v27 = vpop.permute.xlu1 %502 }
  0xf5   : > { %v966_v53 = vpop.f32.mrf.mxu0  ;;  %v1110_v54 = vpop.f32.mrf.mxu1 }
  0xf6   : > { %1243 = vst [vmem:[%s6881_s29 + $0x38] sm:$0xff] %v975_v60  ;;  %1279 = vst [vmem:[%s6881_s29 + $0x158] sm:$0xff] %v1119_v33  ;;  %v967_v56 = vadd.f32 %v966_v53, %v6793_v55  ;;  %v1111_v31 = vadd.f32 %v1110_v54, %v423_v32  ;;  %v508_v60 = vpop.permute.xlu0 %507 }
  0xf7   : > { %v4699_v58 = vpop.f32.mrf.mxu0  ;;  %v4735_v61 = vpop.f32.mrf.mxu1 }
  0xf8   : > { %1241 = vst [vmem:[%s6881_s29 + $0x28] sm:$0xff] %v967_v56  ;;  %1277 = vst [vmem:[%s6881_s29 + $0x148] sm:$0xff] %v1111_v31  ;;  %v988_v59 = vadd.f32 %v4699_v58, %v6819_v2  ;;  %v1132_v34 = vadd.f32 %v4735_v61, %v448_v37  ;;  %v513_v31 = vpop.permute.xlu1 %512 }
  0xf9   : > { %v979_v62 = vpop.f32.mrf.mxu0  ;;  %v1123_v48 = vpop.f32.mrf.mxu1 }
  0xfa   : > { %1246 = vst [vmem:[%s6881_s29 + $0x50] sm:$0xff] %v988_v59  ;;  %1282 = vst [vmem:[%s6881_s29 + $0x170] sm:$0xff] %v1132_v34  ;;  %v980_v55 = vadd.f32 %v979_v62, %v6815_v0  ;;  %v1124_v32 = vadd.f32 %v1123_v48, %v6869_v35  ;;  %v6951_v59 = vpop.permute.xlu0 %517 }
  0xfb   : > { %v4700_v40 = vpop.f32.mrf.mxu0  ;;  %v4736_v41 = vpop.f32.mrf.mxu1 }
  0xfc   : > { %1244 = vst [vmem:[%s6881_s29 + $0x40] sm:$0xff] %v980_v55  ;;  %1280 = vst [vmem:[%s6881_s29 + $0x160] sm:$0xff] %v1124_v32  ;;  %v991_v2 = vadd.f32 %v4700_v40, %v6817_v1  ;;  %v1135_v37 = vadd.f32 %v4736_v41, %v6874_v38  ;;  %v6961_v32 = vpop.permute.xlu1 %522 }
  0xfd   : > { %v982_v30 = vpop.f32.mrf.mxu0  ;;  %v1126_v43 = vpop.f32.mrf.mxu1 }
  0xfe   : > { %1247 = vst [vmem:[%s6881_s29 + $0x58] sm:$0xff] %v991_v2  ;;  %1283 = vst [vmem:[%s6881_s29 + $0x178] sm:$0xff] %v1135_v37  ;;  %v983_v0 = vadd.f32 %v982_v30, %v6813_v63  ;;  %v1127_v35 = vadd.f32 %v1126_v43, %v6871_v36  ;;  %v528_v2 = vpop.permute.xlu0 %527 }
  0xff   : > { %v4703_v45 = vpop.f32.mrf.mxu0  ;;  %v4739_v52 = vpop.f32.mrf.mxu1 }
 0x100   : > { %1245 = vst [vmem:[%s6881_s29 + $0x48] sm:$0xff] %v983_v0  ;;  %1281 = vst [vmem:[%s6881_s29 + $0x168] sm:$0xff] %v1127_v35  ;;  %v1004_v1 = vadd.f32 %v4703_v45, %v6827_v6  ;;  %v1148_v38 = vadd.f32 %v4739_v52, %v6885_v49  ;;  %v533_v35 = vpop.permute.xlu1 %532 }
 0x101   : > { %v995_v46 = vpop.f32.mrf.mxu0  ;;  %v1139_v50 = vpop.f32.mrf.mxu1 }
 0x102   : > { %1250 = vst [vmem:[%s6881_s29 + $0x70] sm:$0xff] %v1004_v1  ;;  %1286 = vst [vmem:[%s6881_s29 + $0x190] sm:$0xff] %v1148_v38  ;;  %v996_v63 = vadd.f32 %v995_v46, %v6823_v4  ;;  %v1140_v36 = vadd.f32 %v1139_v50, %v6876_v39  ;;  %v538_v1 = vpop.permute.xlu0 %537 }
 0x103   : > { %v4704_v33 = vpop.f32.mrf.mxu0  ;;  %v4740_v53 = vpop.f32.mrf.mxu1 }
 0x104   : > { %1248 = vst [vmem:[%s6881_s29 + $0x60] sm:$0xff] %v996_v63  ;;  %1284 = vst [vmem:[%s6881_s29 + $0x180] sm:$0xff] %v1140_v36  ;;  %v1007_v6 = vadd.f32 %v4704_v33, %v6825_v5  ;;  %v1151_v49 = vadd.f32 %v4740_v53, %v6891_v29  ;;  %v543_v36 = vpop.permute.xlu1 %542 }
 0x105   : > { %v998_v54 = vpop.f32.mrf.mxu0  ;;  %v1142_v56 = vpop.f32.mrf.mxu1 }
 0x106   : > { %1251 = vst [vmem:[%s6881_s29 + $0x78] sm:$0xff] %v1007_v6  ;;  %1287 = vst [vmem:[%s6881_s29 + $0x198] sm:$0xff] %v1151_v49  ;;  %v999_v4 = vadd.f32 %v998_v54, %v6821_v3  ;;  %v1143_v39 = vadd.f32 %v1142_v56, %v6879_v44  ;;  %v548_v49 = vpop.permute.xlu0 %547 }
 0x107   : > { %v4707_v58 = vpop.f32.mrf.mxu0  ;;  %v4743_v61 = vpop.f32.mrf.mxu1 }
 0x108   : > { %1249 = vst [vmem:[%s6881_s29 + $0x68] sm:$0xff] %v999_v4  ;;  %1285 = vst [vmem:[%s6881_s29 + $0x188] sm:$0xff] %v1143_v39  ;;  %v1020_v5 = vadd.f32 %v4707_v58, %v6835_v10  ;;  %v1164_v29 = vadd.f32 %v4743_v61, %v6909_v57  ;;  %v553_v58 = vpop.permute.xlu1 %552 }
 0x109   : > { %v1011_v34 = vpop.f32.mrf.mxu0  ;;  %v1155_v62 = vpop.f32.mrf.mxu1 }
 0x10a   : > { %1254 = vst [vmem:[%s6881_s29 + $0x90] sm:$0xff] %v1020_v5  ;;  %1290 = vst [vmem:[%s6881_s29 + $0x1b0] sm:$0xff] %v1164_v29  ;;  %v1012_v3 = vadd.f32 %v1011_v34, %v6831_v8  ;;  %v1156_v44 = vadd.f32 %v1155_v62, %v6896_v42  ;;  %v558_v29 = vpop.permute.xlu0 %557 }
 0x10b   : > { %v4708_v48 = vpop.f32.mrf.mxu0  ;;  %v4744_v55 = vpop.f32.mrf.mxu1 }
 0x10c   : > { %1252 = vst [vmem:[%s6881_s29 + $0x80] sm:$0xff] %v1012_v3  ;;  %1288 = vst [vmem:[%s6881_s29 + $0x1a0] sm:$0xff] %v1156_v44  ;;  %v1023_v10 = vadd.f32 %v4708_v48, %v6833_v9  ;;  %v1167_v57 = vadd.f32 %v4744_v55, %v6917_v28 }
 0x10d   : > { %v1014_v40 = vpop.f32.mrf.mxu0  ;;  %v1158_v41 = vpop.f32.mrf.mxu1 }
 0x10e   : > { %1255 = vst [vmem:[%s6881_s29 + $0x98] sm:$0xff] %v1023_v10  ;;  %1291 = vst [vmem:[%s6881_s29 + $0x1b8] sm:$0xff] %v1167_v57  ;;  %v1015_v8 = vadd.f32 %v1014_v40, %v6829_v7  ;;  %v1159_v42 = vadd.f32 %v1158_v41, %v6904_v47  ;;  %v568_v41 = vpop.permute.xlu0 %567 }
 0x10f   : > { %v4711_v37 = vpop.f32.mrf.mxu0  ;;  %v4747_v30 = vpop.f32.mrf.mxu1 }
 0x110   : > { %1253 = vst [vmem:[%s6881_s29 + $0x88] sm:$0xff] %v1015_v8  ;;  %1289 = vst [vmem:[%s6881_s29 + $0x1a8] sm:$0xff] %v1159_v42  ;;  %v1036_v9 = vadd.f32 %v4711_v37, %v6843_v14  ;;  %v1180_v28 = vadd.f32 %v4747_v30, %v508_v60 }
 0x111   : > { %v1027_v43 = vpop.f32.mrf.mxu0  ;;  %v1171_v0 = vpop.f32.mrf.mxu1 }
 0x112   : > { %1258 = vst [vmem:[%s6881_s29 + $0xb0] sm:$0xff] %v1036_v9  ;;  %1294 = vst [vmem:[%s6881_s29 + $0x1d0] sm:$0xff] %v1180_v28  ;;  %v1028_v7 = vadd.f32 %v1027_v43, %v6839_v12  ;;  %v1172_v47 = vadd.f32 %v1171_v0, %v6923_v51 }
 0x113   : > { %v4712_v45 = vpop.f32.mrf.mxu0  ;;  %v4748_v52 = vpop.f32.mrf.mxu1 }
 0x114   : > { %1256 = vst [vmem:[%s6881_s29 + $0xa0] sm:$0xff] %v1028_v7  ;;  %1292 = vst [vmem:[%s6881_s29 + $0x1c0] sm:$0xff] %v1172_v47  ;;  %v1039_v14 = vadd.f32 %v4712_v45, %v6841_v13  ;;  %v1183_v38 = vadd.f32 %v4748_v52, %v513_v31 }
 0x115   : > { %v1030_v46 = vpop.f32.mrf.mxu0  ;;  %v1174_v50 = vpop.f32.mrf.mxu1 }
 0x116   : > { %1259 = vst [vmem:[%s6881_s29 + $0xb8] sm:$0xff] %v1039_v14  ;;  %1295 = vst [vmem:[%s6881_s29 + $0x1d8] sm:$0xff] %v1183_v38  ;;  %v1031_v12 = vadd.f32 %v1030_v46, %v6837_v11  ;;  %v1175_v51 = vadd.f32 %v1174_v50, %v6933_v27  ;;  %v7030_v14 = vmov (%p49_p0), 0.0   ;;  %v7034_v38 = vmov (%p49_p0), 0.0  }
 0x117   : > { %v4715_v60 = vpop.f32.mrf.mxu0  ;;  %v4751_v63 = vpop.f32.mrf.mxu1  ;;  %v7036_v46 = vmov (%p49_p0), 0.0   ;;  %v7040_v50 = vmov (%p49_p0), 0.0  }
 0x118   : > { %1257 = vst [vmem:[%s6881_s29 + $0xa8] sm:$0xff] %v1031_v12  ;;  %1293 = vst [vmem:[%s6881_s29 + $0x1c8] sm:$0xff] %v1175_v51  ;;  %v1052_v13 = vadd.f32 %v4715_v60, %v6851_v18  ;;  %v1196_v33 = vadd.f32 %v4751_v63, %v528_v2  ;;  %v7042_v12 = vmov (%p49_p0), 0.0   ;;  %v7044_v51 = vmov (%p49_p0), 0.0  }
 0x119   : > { %v1043_v53 = vpop.f32.mrf.mxu0  ;;  %v1187_v6 = vpop.f32.mrf.mxu1  ;;  %v7046_v60 = vmov (%p49_p0), 0.0   ;;  %v7048_v63 = vmov (%p49_p0), 0.0  }
 0x11a   : > { %1262 = vst [vmem:[%s6881_s29 + $0xd0] sm:$0xff] %v1052_v13  ;;  %1298 = vst [vmem:[%s6881_s29 + $0x1f0] sm:$0xff] %v1196_v33  ;;  %v1044_v11 = vadd.f32 %v1043_v53, %v6847_v16  ;;  %v1188_v27 = vadd.f32 %v1187_v6, %v6951_v59  ;;  %v7052_v13 = vmov (%p49_p0), 0.0   ;;  %v7054_v33 = vmov (%p49_p0), 0.0  }
 0x11b   : > { %v4716_v54 = vpop.f32.mrf.mxu0  ;;  %v4752_v56 = vpop.f32.mrf.mxu1  ;;  %v7056_v53 = vmov (%p49_p0), 0.0   ;;  %v7058_v6 = vmov (%p49_p0), 0.0  }
 0x11c   : > { %1260 = vst [vmem:[%s6881_s29 + $0xc0] sm:$0xff] %v1044_v11  ;;  %1296 = vst [vmem:[%s6881_s29 + $0x1e0] sm:$0xff] %v1188_v27  ;;  %v1055_v18 = vadd.f32 %v4716_v54, %v6849_v17  ;;  %v1199_v31 = vadd.f32 %v4752_v56, %v533_v35  ;;  %v7062_v11 = vmov (%p49_p0), 0.0   ;;  %v7064_v27 = vmov (%p49_p0), 0.0  }
 0x11d   : > { %v1046_v4 = vpop.f32.mrf.mxu0  ;;  %v1190_v39 = vpop.f32.mrf.mxu1  ;;  %v7066_v54 = vmov (%p49_p0), 0.0   ;;  %v7068_v56 = vmov (%p49_p0), 0.0  }
 0x11e   : > { %1263 = vst [vmem:[%s6881_s29 + $0xd8] sm:$0xff] %v1055_v18  ;;  %1299 = vst [vmem:[%s6881_s29 + $0x1f8] sm:$0xff] %v1199_v31  ;;  %v1047_v16 = vadd.f32 %v1046_v4, %v6845_v15  ;;  %v1191_v61 = vadd.f32 %v1190_v39, %v6961_v32  ;;  %v563_v32 = vpop.permute.xlu1 %562  ;;  %v7070_v18 = vmov (%p49_p0), 0.0   ;;  %v7072_v31 = vmov (%p49_p0), 0.0  }
 0x11f   : > { %v4719_v59 = vpop.f32.mrf.mxu0  ;;  %v4755_v5 = vpop.f32.mrf.mxu1  ;;  %v7074_v4 = vmov (%p49_p0), 0.0   ;;  %v7076_v39 = vmov (%p49_p0), 0.0  }
 0x120   : > { %1261 = vst [vmem:[%s6881_s29 + $0xc8] sm:$0xff] %v1047_v16  ;;  %1297 = vst [vmem:[%s6881_s29 + $0x1e8] sm:$0xff] %v1191_v61  ;;  %v1068_v17 = vadd.f32 %v4719_v59, %v6859_v22  ;;  %v1212_v34 = vadd.f32 %v4755_v5, %v548_v49  ;;  %v7060_v49 = vmov (%p49_p0), 0.0   ;;  %v7080_v16 = vmov (%p49_p0), 0.0  }
 0x121   : > { %v1059_v62 = vpop.f32.mrf.mxu0  ;;  %v1203_v3 = vpop.f32.mrf.mxu1  ;;  %v7082_v61 = vmov (%p49_p0), 0.0   ;;  %v7084_v59 = vmov (%p49_p0), 0.0   ;;  %v7086_v5 = vmov (%p49_p0), 0.0  }
 0x122   : > { %1266 = vst [vmem:[%s6881_s29 + $0xf0] sm:$0xff] %v1068_v17  ;;  %1302 = vst [vmem:[%s6881_s29 + $0x210] sm:$0xff] %v1212_v34  ;;  %v1060_v15 = vadd.f32 %v1059_v62, %v6855_v20  ;;  %v1204_v44 = vadd.f32 %v1203_v3, %v538_v1  ;;  %v573_v28 = vpop.permute.xlu1 %572  ;;  %v7090_v17 = vmov (%p49_p0), 0.0   ;;  %v7092_v34 = vmov (%p49_p0), 0.0  }
 0x123   : > { %v4720_v48 = vpop.f32.mrf.mxu0  ;;  %v4756_v55 = vpop.f32.mrf.mxu1  ;;  %v7094_v62 = vmov (%p49_p0), 0.0   ;;  %v7096_v3 = vmov (%p49_p0), 0.0  }
 0x124   : > { %1264 = vst [vmem:[%s6881_s29 + $0xe0] sm:$0xff] %v1060_v15  ;;  %1300 = vst [vmem:[%s6881_s29 + $0x200] sm:$0xff] %v1204_v44  ;;  %v1071_v10 = vadd.f32 %v4720_v48, %v6857_v21  ;;  %v1215_v22 = vadd.f32 %v4756_v55, %v553_v58  ;;  %v7078_v58 = vmov (%p49_p0), 0.0   ;;  %v7098_v15 = vmov (%p49_p0), 0.0  }
 0x125   : > { %v1062_v57 = vpop.f32.mrf.mxu0  ;;  %v1206_v40 = vpop.f32.mrf.mxu1 }
 0x126   : > { %1267 = vst [vmem:[%s6881_s29 + $0xf8] sm:$0xff] %v1071_v10  ;;  %1303 = vst [vmem:[%s6881_s29 + $0x218] sm:$0xff] %v1215_v22  ;;  %v1063_v20 = vadd.f32 %v1062_v57, %v6853_v19  ;;  %v1207_v2 = vadd.f32 %v1206_v40, %v543_v36  ;;  %v7050_v36 = vmov (%p49_p0), 0.0  }
 0x127   : > { %v4723_v8 = vpop.f32.mrf.mxu0  ;;  %v4759_v42 = vpop.f32.mrf.mxu1 }
 0x128   : > { %1265 = vst [vmem:[%s6881_s29 + $0xe8] sm:$0xff] %v1063_v20  ;;  %1301 = vst [vmem:[%s6881_s29 + $0x208] sm:$0xff] %v1207_v2  ;;  %v1084_v37 = vadd.f32 %v4723_v8, %v6867_v26  ;;  %v1228_v21 = vadd.f32 %v4759_v42, %v568_v41 }
 0x129   : > { %v1075_v30 = vpop.f32.mrf.mxu0  ;;  %v1219_v9 = vpop.f32.mrf.mxu1 }
 0x12a   : > { %1270 = vst [vmem:[%s6881_s29 + $0x110] sm:$0xff] %v1084_v37  ;;  %1306 = vst [vmem:[%s6881_s29 + $0x230] sm:$0xff] %v1228_v21  ;;  %v1076_v19 = vadd.f32 %v1075_v30, %v6863_v24  ;;  %v1220_v43 = vadd.f32 %v1219_v9, %v558_v29  ;;  %v7028_v24 = vmov (%p49_p0), 0.0   ;;  %v7088_v29 = vmov (%p49_p0), 0.0  }
 0x12b   : > { %v4724_v0 = vpop.f32.mrf.mxu0  ;;  %v4760_v35 = vpop.f32.mrf.mxu1 }
 0x12c   : > { %1268 = vst [vmem:[%s6881_s29 + $0x100] sm:$0xff] %v1076_v19  ;;  %1304 = vst [vmem:[%s6881_s29 + $0x220] sm:$0xff] %v1220_v43  ;;  %v1087_v7 = vadd.f32 %v4724_v0, %v6865_v25  ;;  %v1231_v26 = vadd.f32 %v4760_v35, %v573_v28  ;;  %51 = sbr.rel (!%p49_p0) target bundleno = 3 (0x3), region = 108  ;;  %v7032_v25 = vmov (%p49_p0), 0.0  }
 0x12d   : > { %v1078_v47 = vpop.f32.mrf.mxu0  ;;  %v1222_v45 = vpop.f32.mrf.mxu1 }
 0x12e   : > { %1271 = vst [vmem:[%s6881_s29 + $0x118] sm:$0xff] %v1087_v7  ;;  %1307 = vst [vmem:[%s6881_s29 + $0x238] sm:$0xff] %v1231_v26  ;;  %v1079_v52 = vadd.f32 %v1078_v47, %v6861_v23  ;;  %v1223_v1 = vadd.f32 %v1222_v45, %v563_v32  ;;  %v7038_v23 = vmov (%p49_p0), 0.0  }
 0x130   : > { %1269 = vst [vmem:[%s6881_s29 + $0x108] sm:$0xff] %v1079_v52  ;;  %1305 = vst [vmem:[%s6881_s29 + $0x228] sm:$0xff] %v1223_v1 }
 0x131 LB: > { %v6340_v44 = vmov 0   ;;  %v1503_v48 = vpack.c.bf16 %v6193_v56, %v6197_v18  ;;  %v1502_v55 = vpack.c.bf16 %v6201_v31, %v6205_v4  ;;  %v5358_v32 = vld [vmem:[%s8659_s2 + $0x4] ss:$8 sps:$4 sm:$0xff]   ;;  %v1501_v22 = vpack.c.bf16 %v6209_v39, %v6213_v58  ;;  %v5356_v42 = vld [vmem:[%s8659_s2] ss:$8 sps:$4 sm:$0xff]   ;;  %s1350_s14 = smul.u32 576, %s6257_s0  ;;  %s6257_s0 = sphi %s7100_s0, %s8679_s0   ;;  %v6253_v15 = vphi %v7098_v15, %v7606_v15   ;;  %v6249_v3 = vphi %v7096_v3, %v8678_v3   ;;  %v6245_v62 = vphi %v7094_v62, %v8677_v62   ;;  %v6241_v34 = vphi %v7092_v34, %v7661_v34   ;;  %v6237_v17 = vphi %v7090_v17, %v8676_v17   ;;  %v6233_v29 = vphi %v7088_v29, %v8675_v29   ;;  %v6229_v5 = vphi %v7086_v5, %v7699_v5   ;;  %v6225_v59 = vphi %v7084_v59, %v7710_v59   ;;  %v6221_v61 = vphi %v7082_v61, %v7719_v61   ;;  %v6217_v16 = vphi %v7080_v16, %v7729_v16   ;;  %v6213_v58 = vphi %v7078_v58, %v7739_v58   ;;  %v6209_v39 = vphi %v7076_v39, %v7746_v39   ;;  %v6205_v4 = vphi %v7074_v4, %v8674_v4   ;;  %v6201_v31 = vphi %v7072_v31, %v8673_v31   ;;  %v6197_v18 = vphi %v7070_v18, %v2759_v18   ;;  %v6193_v56 = vphi %v7068_v56, %v2760_v56   ;;  %v6189_v54 = vphi %v7066_v54, %v2761_v54   ;;  %v6185_v27 = vphi %v7064_v27, %v2762_v27   ;;  %v6181_v11 = vphi %v7062_v11, %v7562_v11   ;;  %v6177_v49 = vphi %v7060_v49, %v7572_v49   ;;  %v6173_v6 = vphi %v7058_v6, %v7582_v6   ;;  %v6169_v53 = vphi %v7056_v53, %v7594_v53   ;;  %v6165_v33 = vphi %v7054_v33, %v7610_v33   ;;  %v6161_v13 = vphi %v7052_v13, %v7630_v13   ;;  %v6157_v36 = vphi %v7050_v36, %v7642_v36   ;;  %v6153_v63 = vphi %v7048_v63, %v7658_v63   ;;  %v6149_v60 = vphi %v7046_v60, %v7674_v60   ;;  %v6145_v51 = vphi %v7044_v51, %v7686_v51   ;;  %v6141_v12 = vphi %v7042_v12, %v7703_v12   ;;  %v6137_v50 = vphi %v7040_v50, %v7717_v50   ;;  %v6133_v23 = vphi %v7038_v23, %v7727_v23   ;;  %v6129_v46 = vphi %v7036_v46, %v7736_v46   ;;  %v6125_v38 = vphi %v7034_v38, %v2723_v38   ;;  %v6121_v25 = vphi %v7032_v25, %v2724_v25   ;;  %v6117_v14 = vphi %v7030_v14, %v2725_v14   ;;  %v6113_v24 = vphi %v7028_v24, %v2726_v24  }
 0x132   : > { %1938 = vmatprep.subr.bf16.mxu0 %v6340_v44  ;;  %4818 = vmatprep.subr.bf16.mxu1 %v6340_v44  ;;  %v5364_v10 = vld [vmem:[%s8659_s2 + $0x124] ss:$8 sps:$4 sm:$0xff]   ;;  %vm1829_vm2 = vcmask 130048   ;;  %v1500_v57 = vpack.c.bf16 %v6217_v16, %v6221_v61  ;;  %v1499_v40 = vpack.c.bf16 %v6225_v59, %v6229_v5  ;;  %v1498_v41 = vpack.c.bf16 %v6233_v29, %v6237_v17  ;;  %v5359_v37 = vld [vmem:[%s8659_s2 + $0x14] ss:$8 sps:$4 sm:$0xff]   ;;  %s2763_s15 = smul.u32 144, %s6257_s0 }
 0x133   : > { %1939 = vmatpush1.bf16.msra.mxu0 %v1503_v48  ;;  %4827 = vmatpush1.bf16.msra.mxu1 %v1503_v48  ;;  %v1497_v20 = vpack.c.bf16 %v6241_v34, %v6245_v62  ;;  %v1496_v2 = vpack.c.bf16 %v6249_v3, %v6253_v15  ;;  %v1504_v8 = vpack.c.bf16 %v6185_v27, %v6189_v54  ;;  %v5362_v21 = vld [vmem:[%s8659_s2 + $0x120] ss:$8 sps:$4 sm:$0xff]   ;;  %v5368_v30 = vld [vmem:[%s8659_s2 + $0x134] ss:$8 sps:$4 sm:$0xff]   ;;  %v5361_v9 = vld [vmem:[%s8659_s2 + $0x10] ss:$8 sps:$4 sm:$0xff]  }
 0x134   : > { %1940 = vmatprep.subr.bf16.mxu0 %v6340_v44  ;;  %4819 = vmatprep.subr.bf16.mxu1 %v6340_v44  ;;  %v5365_v28 = vld [vmem:[%s8659_s2 + $0x24] ss:$8 sps:$4 sm:$0xff]   ;;  %v5370_v19 = vld [vmem:[%s8659_s2 + $0x130] ss:$8 sps:$4 sm:$0xff]   ;;  %v5367_v0 = vld [vmem:[%s8659_s2 + $0x20] ss:$8 sps:$4 sm:$0xff]  }
 0x135   : > { %4449 = vmatprep.mubr.msk.bf16.mxu0 %vm1829_vm2, %v5358_v32  ;;  %4467 = vmatprep.mubr.msk.bf16.mxu1 %vm1829_vm2, %v5364_v10  ;;  %v5374_v43 = vld [vmem:[%s8659_s2 + $0x144] ss:$8 sps:$4 sm:$0xff]   ;;  %v5376_v35 = vld [vmem:[%s8659_s2 + $0x140] ss:$8 sps:$4 sm:$0xff]   ;;  %v5371_v7 = vld [vmem:[%s8659_s2 + $0x34] ss:$8 sps:$4 sm:$0xff]  }
 0x136   : > { %v5380_v26 = vld [vmem:[%s8659_s2 + $0x154] ss:$8 sps:$4 sm:$0xff]   ;;  %v5373_v47 = vld [vmem:[%s8659_s2 + $0x30] ss:$8 sps:$4 sm:$0xff]   ;;  %v5377_v52 = vld [vmem:[%s8659_s2 + $0x44] ss:$8 sps:$4 sm:$0xff]  }
 0x137   : > { %1941 = vmatpush1.bf16.msra.mxu0 %v1502_v55  ;;  %4828 = vmatpush1.bf16.msra.mxu1 %v1502_v55  ;;  %v5382_v45 = vld [vmem:[%s8659_s2 + $0x150] ss:$8 sps:$4 sm:$0xff]   ;;  %v5386_v1 = vld [vmem:[%s8659_s2 + $0x164] ss:$8 sps:$4 sm:$0xff]   ;;  %v5379_v27 = vld [vmem:[%s8659_s2 + $0x40] ss:$8 sps:$4 sm:$0xff]  }
 0x138   : > { %1942 = vmatprep.subr.bf16.mxu0 %v6340_v44  ;;  %4820 = vmatprep.subr.bf16.mxu1 %v6340_v44  ;;  %v5388_v54 = vld [vmem:[%s8659_s2 + $0x160] ss:$8 sps:$4 sm:$0xff]   ;;  %v5383_v56 = vld [vmem:[%s8659_s2 + $0x54] ss:$8 sps:$4 sm:$0xff]   ;;  %v5385_v31 = vld [vmem:[%s8659_s2 + $0x50] ss:$8 sps:$4 sm:$0xff]  }
 0x139   : > { %v5392_v18 = vld [vmem:[%s8659_s2 + $0x174] ss:$8 sps:$4 sm:$0xff]   ;;  %v5394_v4 = vld [vmem:[%s8659_s2 + $0x170] ss:$8 sps:$4 sm:$0xff]   ;;  %v5389_v39 = vld [vmem:[%s8659_s2 + $0x64] ss:$8 sps:$4 sm:$0xff]  }
 0x13a   : > { %v5398_v58 = vld [vmem:[%s8659_s2 + $0x184] ss:$8 sps:$4 sm:$0xff]   ;;  %v5391_v16 = vld [vmem:[%s8659_s2 + $0x60] ss:$8 sps:$4 sm:$0xff]   ;;  %v5395_v59 = vld [vmem:[%s8659_s2 + $0x74] ss:$8 sps:$4 sm:$0xff]  }
 0x13b   : > { %1943 = vmatpush1.bf16.msra.mxu0 %v1501_v22  ;;  %4829 = vmatpush1.bf16.msra.mxu1 %v1501_v22  ;;  %v5400_v61 = vld [vmem:[%s8659_s2 + $0x180] ss:$8 sps:$4 sm:$0xff]   ;;  %v5404_v5 = vld [vmem:[%s8659_s2 + $0x194] ss:$8 sps:$4 sm:$0xff]   ;;  %v5397_v29 = vld [vmem:[%s8659_s2 + $0x70] ss:$8 sps:$4 sm:$0xff]  }
 0x13c   : > { %1944 = vmatprep.subr.bf16.mxu0 %v6340_v44  ;;  %4821 = vmatprep.subr.bf16.mxu1 %v6340_v44  ;;  %v5406_v17 = vld [vmem:[%s8659_s2 + $0x190] ss:$8 sps:$4 sm:$0xff]   ;;  %v5401_v34 = vld [vmem:[%s8659_s2 + $0x84] ss:$8 sps:$4 sm:$0xff]   ;;  %v5403_v3 = vld [vmem:[%s8659_s2 + $0x80] ss:$8 sps:$4 sm:$0xff]  }
 0x13d   : > { %v5410_v62 = vld [vmem:[%s8659_s2 + $0x1a4] ss:$8 sps:$4 sm:$0xff]   ;;  %v5412_v15 = vld [vmem:[%s8659_s2 + $0x1a0] ss:$8 sps:$4 sm:$0xff]   ;;  %v5416_v48 = vld [vmem:[%s8659_s2 + $0x1b4] ss:$8 sps:$4 sm:$0xff]  }
 0x13e   : > { %v5409_v55 = vld [vmem:[%s8659_s2 + $0x90] ss:$8 sps:$4 sm:$0xff]   ;;  %v5413_v10 = vld [vmem:[%s8659_s2 + $0xa4] ss:$8 sps:$4 sm:$0xff]   ;;  %s7436_s12 = scalar_lea.vmem [#allocation2], %s1350_s14  ;;  %s7615_s16 = scalar_lea.vmem [#allocation3], %s2763_s15 }
 0x13f   : > { %1945 = vmatpush1.bf16.msra.mxu0 %v1500_v57  ;;  %4830 = vmatpush1.bf16.msra.mxu1 %v1500_v57  ;;  %v5418_v32 = vld [vmem:[%s8659_s2 + $0x1b0] ss:$8 sps:$4 sm:$0xff]   ;;  %v5422_v22 = vld [vmem:[%s8659_s2 + $0x1c4] ss:$8 sps:$4 sm:$0xff]   ;;  %v5415_v57 = vld [vmem:[%s8659_s2 + $0xa0] ss:$8 sps:$4 sm:$0xff]  }
 0x140   : > { %1946 = vmatprep.subr.bf16.mxu0 %v6340_v44  ;;  %4822 = vmatprep.subr.bf16.mxu1 %v6340_v44  ;;  %s1313_s17 = sadd.s32 1, %s6257_s0  }
 0x141   : > { %p7764_p1 = scmp.ge.s32.totalorder %s1313_s17, 17   ;;  %s8679_s0 = smov %s1313_s17 }
 0x142   :  { %s7872_s19 = smov (%p7764_p1), 0  }
 0x143   : > { %1947 = vmatpush1.bf16.msra.mxu0 %v1499_v40  ;;  %4831 = vmatpush1.bf16.msra.mxu1 %v1499_v40  ;;  %v5424_v40 = vld [vmem:[%s8659_s2 + $0x1c0] ss:$8 sps:$4 sm:$0xff]  }
 0x144   : > { %1948 = vmatprep.subr.bf16.mxu0 %v6340_v44  ;;  %4823 = vmatprep.subr.bf16.mxu1 %v6340_v44 }
 0x147   : > { %1949 = vmatpush1.bf16.msra.mxu0 %v1498_v41  ;;  %4832 = vmatpush1.bf16.msra.mxu1 %v1498_v41  ;;  %v5419_v41 = vld [vmem:[%s8659_s2 + $0xb4] ss:$8 sps:$4 sm:$0xff]  }
 0x148   : > { %1950 = vmatprep.subr.bf16.mxu0 %v6340_v44  ;;  %4824 = vmatprep.subr.bf16.mxu1 %v6340_v44 }
 0x14b   : > { %1951 = vmatpush1.bf16.msra.mxu0 %v1497_v20  ;;  %4833 = vmatpush1.bf16.msra.mxu1 %v1497_v20  ;;  %v5428_v20 = vld [vmem:[%s8659_s2 + $0x1d4] ss:$8 sps:$4 sm:$0xff]  }
 0x14c   : > { %1952 = vmatprep.subr.bf16.mxu0 %v6340_v44  ;;  %4825 = vmatprep.subr.bf16.mxu1 %v6340_v44 }
 0x14f   : > { %1953 = vmatpush1.bf16.msra.mxu0 %v1496_v2  ;;  %4834 = vmatpush1.bf16.msra.mxu1 %v1496_v2  ;;  %v5421_v2 = vld [vmem:[%s8659_s2 + $0xb0] ss:$8 sps:$4 sm:$0xff]  }
 0x150   : > { %1968 = vmatprep.subr.bf16.mxu0 %v6340_v44  ;;  %4826 = vmatprep.subr.bf16.mxu1 %v6340_v44  ;;  %v5407_v44 = vld [vmem:[%s8659_s2 + $0x94] ss:$8 sps:$4 sm:$0xff]  }
 0x153   : > { %1969 = vmatpush2.bf16.msra.mxu0 %v1504_v8  ;;  %4835 = vmatpush2.bf16.msra.mxu1 %v1504_v8  ;;  %v5430_v8 = vld [vmem:[%s8659_s2 + $0x1d0] ss:$8 sps:$4 sm:$0xff]  }
 0x156   : > { %1971 = vmatmul.mubr.bf16.vlgmr.msra.gmra.mxu0 %v5356_v42  ;;  %2115 = vmatmul.mubr.bf16.vlgmr.msra.gmra.mxu1 %v5362_v21  ;;  %v5425_v42 = vld [vmem:[%s8659_s2 + $0xc4] ss:$8 sps:$4 sm:$0xff]   ;;  %v5427_v21 = vld [vmem:[%s8659_s2 + $0xc0] ss:$8 sps:$4 sm:$0xff]  }
 0x157   : > { %4450 = vmatprep.mubr.msk.bf16.mxu0 %vm1829_vm2, %v5359_v37  ;;  %4468 = vmatprep.mubr.msk.bf16.mxu1 %vm1829_vm2, %v5368_v30  ;;  %v5434_v37 = vld [vmem:[%s8659_s2 + $0x1e4] ss:$8 sps:$4 sm:$0xff]   ;;  %v5436_v30 = vld [vmem:[%s8659_s2 + $0x1e0] ss:$8 sps:$4 sm:$0xff]  }
 0x15e   : > { %1979 = vmatmul.mubr.bf16.gmra.mxu0 %v5361_v9  ;;  %2123 = vmatmul.mubr.bf16.gmra.mxu1 %v5370_v19  ;;  %v5431_v9 = vld [vmem:[%s8659_s2 + $0xd4] ss:$8 sps:$4 sm:$0xff]   ;;  %v5433_v19 = vld [vmem:[%s8659_s2 + $0xd0] ss:$8 sps:$4 sm:$0xff]  }
 0x15f   : > { %4451 = vmatprep.mubr.msk.bf16.mxu0 %vm1829_vm2, %v5365_v28  ;;  %4469 = vmatprep.mubr.msk.bf16.mxu1 %vm1829_vm2, %v5374_v43  ;;  %v5440_v28 = vld [vmem:[%s8659_s2 + $0x1f4] ss:$8 sps:$4 sm:$0xff]   ;;  %v5442_v43 = vld [vmem:[%s8659_s2 + $0x1f0] ss:$8 sps:$4 sm:$0xff]  }
 0x166   : > { %1987 = vmatmul.mubr.bf16.gmra.mxu0 %v5367_v0  ;;  %2131 = vmatmul.mubr.bf16.gmra.mxu1 %v5376_v35  ;;  %v5437_v0 = vld [vmem:[%s8659_s2 + $0xe4] ss:$8 sps:$4 sm:$0xff]  }
 0x167   : > { %4452 = vmatprep.mubr.msk.bf16.mxu0 %vm1829_vm2, %v5371_v7  ;;  %4470 = vmatprep.mubr.msk.bf16.mxu1 %vm1829_vm2, %v5380_v26  ;;  %v5446_v35 = vld [vmem:[%s8659_s2 + $0x204] ss:$8 sps:$4 sm:$0xff]   ;;  %v5439_v7 = vld [vmem:[%s8659_s2 + $0xe0] ss:$8 sps:$4 sm:$0xff]  }
 0x168   : > { %v5448_v26 = vld [vmem:[%s8659_s2 + $0x200] ss:$8 sps:$4 sm:$0xff]  }
 0x16e   : > { %1995 = vmatmul.mubr.bf16.gmra.mxu0 %v5373_v47  ;;  %2139 = vmatmul.mubr.bf16.gmra.mxu1 %v5382_v45  ;;  %v5443_v47 = vld [vmem:[%s8659_s2 + $0xf4] ss:$8 sps:$4 sm:$0xff]  }
 0x16f   : > { %4453 = vmatprep.mubr.msk.bf16.mxu0 %vm1829_vm2, %v5377_v52  ;;  %4471 = vmatprep.mubr.msk.bf16.mxu1 %vm1829_vm2, %v5386_v1  ;;  %v5452_v45 = vld [vmem:[%s8659_s2 + $0x214] ss:$8 sps:$4 sm:$0xff]   ;;  %v5445_v52 = vld [vmem:[%s8659_s2 + $0xf0] ss:$8 sps:$4 sm:$0xff]  }
 0x170   : > { %v5454_v1 = vld [vmem:[%s8659_s2 + $0x210] ss:$8 sps:$4 sm:$0xff]  }
 0x176   : > { %2003 = vmatmul.mubr.bf16.gmra.mxu0 %v5379_v27  ;;  %2147 = vmatmul.mubr.bf16.gmra.mxu1 %v5388_v54  ;;  %v5449_v27 = vld [vmem:[%s8659_s2 + $0x104] ss:$8 sps:$4 sm:$0xff]  }
 0x177   : > { %4454 = vmatprep.mubr.msk.bf16.mxu0 %vm1829_vm2, %v5383_v56  ;;  %4472 = vmatprep.mubr.msk.bf16.mxu1 %vm1829_vm2, %v5392_v18  ;;  %v5458_v54 = vld [vmem:[%s8659_s2 + $0x224] ss:$8 sps:$4 sm:$0xff]   ;;  %v5451_v56 = vld [vmem:[%s8659_s2 + $0x100] ss:$8 sps:$4 sm:$0xff]  }
 0x178   : > { %v5460_v18 = vld [vmem:[%s8659_s2 + $0x220] ss:$8 sps:$4 sm:$0xff]  }
 0x17e   : > { %2011 = vmatmul.mubr.bf16.gmra.mxu0 %v5385_v31  ;;  %2155 = vmatmul.mubr.bf16.gmra.mxu1 %v5394_v4  ;;  %v5455_v31 = vld [vmem:[%s8659_s2 + $0x114] ss:$8 sps:$4 sm:$0xff]  }
 0x17f   : > { %4455 = vmatprep.mubr.msk.bf16.mxu0 %vm1829_vm2, %v5389_v39  ;;  %4473 = vmatprep.mubr.msk.bf16.mxu1 %vm1829_vm2, %v5398_v58  ;;  %v5461_v4 = vld [vmem:[%s8659_s2 + $0x234] ss:$8 sps:$4 sm:$0xff]   ;;  %v5457_v39 = vld [vmem:[%s8659_s2 + $0x110] ss:$8 sps:$4 sm:$0xff]  }
 0x180   : > { %v5463_v58 = vld [vmem:[%s8659_s2 + $0x230] ss:$8 sps:$4 sm:$0xff]  }
 0x186   : > { %2019 = vmatmul.mubr.bf16.gmra.mxu0 %v5391_v16  ;;  %2163 = vmatmul.mubr.bf16.gmra.mxu1 %v5400_v61  ;;  %v1352_v16 = vld [vmem:[%s7436_s12] sm:$0xff] }
 0x187   : > { %4456 = vmatprep.mubr.msk.bf16.mxu0 %vm1829_vm2, %v5395_v59  ;;  %4474 = vmatprep.mubr.msk.bf16.mxu1 %vm1829_vm2, %v5404_v5 }
 0x18e   : > { %2027 = vmatmul.mubr.bf16.gmra.mxu0 %v5397_v29  ;;  %2171 = vmatmul.mubr.bf16.gmra.mxu1 %v5406_v17  ;;  %v1353_v17 = vld [vmem:[%s7436_s12 + $0x8] sm:$0xff] }
 0x18f   : > { %4457 = vmatprep.mubr.msk.bf16.mxu0 %vm1829_vm2, %v5401_v34  ;;  %4475 = vmatprep.mubr.msk.bf16.mxu1 %vm1829_vm2, %v5410_v62 }
 0x196   : > { %2035 = vmatmul.mubr.bf16.gmra.mxu0 %v5403_v3  ;;  %2179 = vmatmul.mubr.bf16.gmra.mxu1 %v5412_v15 }
 0x197   : > { %4458 = vmatprep.mubr.msk.bf16.mxu0 %vm1829_vm2, %v5407_v44  ;;  %4476 = vmatprep.mubr.msk.bf16.mxu1 %vm1829_vm2, %v5416_v48 }
 0x19e   : > { %2043 = vmatmul.mubr.bf16.gmra.mxu0 %v5409_v55  ;;  %2187 = vmatmul.mubr.bf16.gmra.mxu1 %v5418_v32  ;;  %v1354_v55 = vld [vmem:[%s7436_s12 + $0x10] sm:$0xff] }
 0x19f   : > { %4459 = vmatprep.mubr.msk.bf16.mxu0 %vm1829_vm2, %v5413_v10  ;;  %4477 = vmatprep.mubr.msk.bf16.mxu1 %vm1829_vm2, %v5422_v22 }
 0x1a6   : > { %2051 = vmatmul.mubr.bf16.gmra.mxu0 %v5415_v57  ;;  %2195 = vmatmul.mubr.bf16.gmra.mxu1 %v5424_v40 }
 0x1a7   : > { %4460 = vmatprep.mubr.msk.bf16.mxu0 %vm1829_vm2, %v5419_v41  ;;  %4478 = vmatprep.mubr.msk.bf16.mxu1 %vm1829_vm2, %v5428_v20  ;;  %v1355_v20 = vld [vmem:[%s7436_s12 + $0x18] sm:$0xff] }
 0x1ae   : > { %2059 = vmatmul.mubr.bf16.gmra.mxu0 %v5421_v2  ;;  %2203 = vmatmul.mubr.bf16.gmra.mxu1 %v5430_v8 }
 0x1af   : > { %4461 = vmatprep.mubr.msk.bf16.mxu0 %vm1829_vm2, %v5425_v42  ;;  %4479 = vmatprep.mubr.msk.bf16.mxu1 %vm1829_vm2, %v5434_v37  ;;  %v1388_v37 = vld [vmem:[%s7436_s12 + $0x120] sm:$0xff] }
 0x1b6   : > { %2067 = vmatmul.mubr.bf16.gmra.mxu0 %v5427_v21  ;;  %2211 = vmatmul.mubr.bf16.gmra.mxu1 %v5436_v30 }
 0x1b7   : > { %4462 = vmatprep.mubr.msk.bf16.mxu0 %vm1829_vm2, %v5431_v9  ;;  %4480 = vmatprep.mubr.msk.bf16.mxu1 %vm1829_vm2, %v5440_v28  ;;  %v1356_v28 = vld [vmem:[%s7436_s12 + $0x20] sm:$0xff] }
 0x1be   : > { %2075 = vmatmul.mubr.bf16.gmra.mxu0 %v5433_v19  ;;  %2219 = vmatmul.mubr.bf16.gmra.mxu1 %v5442_v43 }
 0x1bf   : > { %4463 = vmatprep.mubr.msk.bf16.mxu0 %vm1829_vm2, %v5437_v0  ;;  %4481 = vmatprep.mubr.msk.bf16.mxu1 %vm1829_vm2, %v5446_v35 }
 0x1c6   : > { %2083 = vmatmul.mubr.bf16.gmra.mxu0 %v5439_v7  ;;  %2227 = vmatmul.mubr.bf16.gmra.mxu1 %v5448_v26 }
 0x1c7   : > { %4464 = vmatprep.mubr.msk.bf16.mxu0 %vm1829_vm2, %v5443_v47  ;;  %4482 = vmatprep.mubr.msk.bf16.mxu1 %vm1829_vm2, %v5452_v45  ;;  %v1389_v47 = vld [vmem:[%s7436_s12 + $0x128] sm:$0xff] }
 0x1ce   : > { %2091 = vmatmul.mubr.bf16.gmra.mxu0 %v5445_v52  ;;  %2235 = vmatmul.mubr.bf16.gmra.mxu1 %v5454_v1  ;;  %v1357_v1 = vld [vmem:[%s7436_s12 + $0x28] sm:$0xff] }
 0x1cf   : > { %4465 = vmatprep.mubr.msk.bf16.mxu0 %vm1829_vm2, %v5449_v27  ;;  %4483 = vmatprep.mubr.msk.bf16.mxu1 %vm1829_vm2, %v5458_v54 }
 0x1d6   : > { %2099 = vmatmul.mubr.bf16.gmra.mxu0 %v5451_v56  ;;  %2243 = vmatmul.mubr.bf16.gmra.mxu1 %v5460_v18 }
 0x1d7   : > { %4466 = vmatprep.mubr.msk.bf16.mxu0 %vm1829_vm2, %v5455_v31  ;;  %4484 = vmatprep.mubr.msk.bf16.mxu1 %vm1829_vm2, %v5461_v4  ;;  %v1390_v4 = vld [vmem:[%s7436_s12 + $0x130] sm:$0xff] }
 0x1de   : > { %2107 = vmatmul.mubr.bf16.gmra.mxu0 %v5457_v39  ;;  %2251 = vmatmul.mubr.bf16.gmra.mxu1 %v5463_v58 }
 0x216   : > { %v1972_v61 = vpop.f32.mrf.mxu0  ;;  %v2116_v59 = vpop.f32.mrf.mxu1 }
 0x217   : > { %v2259_v5 = vadd.f32 %v1972_v61, %v1352_v16  ;;  %v2295_v0 = vadd.f32 %v2116_v59, %v1388_v37  ;;  %v1358_v59 = vld [vmem:[%s7436_s12 + $0x30] sm:$0xff] }
 0x218   : > { %v1974_v29 = vpop.f32.mrf.mxu0  ;;  %v2118_v34 = vpop.f32.mrf.mxu1 }
 0x219   : > { %v4485_v62 = vmul.f32 -1.442695, %v2259_v5 }
 0x21a   : > { %v1975_v3 = vpop.f32.mrf.mxu0  ;;  %v2119_v15 = vpop.f32.mrf.mxu1 }
 0x21b   : > { %5464 = vpow2.f32 %v4485_v62  ;;  %v2260_v44 = vadd.f32 %v1975_v3, %v1353_v17  ;;  %v2296_v18 = vadd.f32 %v2119_v15, %v1389_v47  ;;  %v1393_v47 = vld [vmem:[%s7436_s12 + $0x148] sm:$0xff] }
 0x21c   : > { %v1977_v48 = vpop.f32.mrf.mxu0  ;;  %v2121_v32 = vpop.f32.mrf.mxu1 }
 0x21d   : > { %v4486_v10 = vmul.f32 -1.442695, %v2260_v44  ;;  %v1391_v44 = vld [vmem:[%s7436_s12 + $0x138] sm:$0xff] }
 0x21e   : > { %v1980_v22 = vpop.f32.mrf.mxu0  ;;  %v2124_v57 = vpop.f32.mrf.mxu1  ;;  %v1359_v32 = vld [vmem:[%s7436_s12 + $0x38] sm:$0xff] }
 0x21f   : > { %5466 = vpow2.f32 %v4486_v10  ;;  %v2261_v40 = vadd.f32 %v1980_v22, %v1354_v55  ;;  %v2297_v34 = vadd.f32 %v2124_v57, %v1390_v4 }
 0x220   : > { %v1982_v41 = vpop.f32.mrf.mxu0  ;;  %v2126_v2 = vpop.f32.mrf.mxu1 }
 0x221   : > { %v4487_v8 = vmul.f32 -1.442695, %v2261_v40 }
 0x222   : > { %v1983_v42 = vpop.f32.mrf.mxu0  ;;  %v2127_v21 = vpop.f32.mrf.mxu1 }
 0x223   : > { %5468 = vpow2.f32 %v4487_v8  ;;  %v2262_v30 = vadd.f32 %v1983_v42, %v1355_v20  ;;  %v2298_v41 = vadd.f32 %v2127_v21, %v1391_v44  ;;  %v1392_v8 = vld [vmem:[%s7436_s12 + $0x140] sm:$0xff] }
 0x224   : > { %v1985_v9 = vpop.f32.mrf.mxu0  ;;  %v2129_v19 = vpop.f32.mrf.mxu1 }
 0x225   : > { %v4488_v43 = vmul.f32 -1.442695, %v2262_v30  ;;  %v1360_v30 = vld [vmem:[%s7436_s12 + $0x40] sm:$0xff] }
 0x226   : > { %v1988_v35 = vpop.f32.mrf.mxu0  ;;  %v2132_v7 = vpop.f32.mrf.mxu1 }
 0x227   : > { %5470 = vpow2.f32 %v4488_v43  ;;  %v2263_v26 = vadd.f32 %v1988_v35, %v1356_v28 }
 0x228   : > { %v5465_v45 = vpop.eup %5464  ;;  %v1990_v52 = vpop.f32.mrf.mxu0  ;;  %5472 = vtanh.f32 %v2295_v0  ;;  %v2299_v0 = vadd.f32 %v2132_v7, %v1392_v8 }
 0x229   : > { %v2134_v27 = vpop.f32.mrf.mxu1  ;;  %v2385_v54 = vadd.f32 1.0, %v5465_v45  ;;  %v4489_v56 = vmul.f32 -1.442695, %v2263_v26 }
 0x22a   : > { %v1991_v31 = vpop.f32.mrf.mxu0 }
 0x22b   : > { %v2135_v39 = vpop.f32.mrf.mxu1  ;;  %5474 = vrcp.f32 %v2385_v54  ;;  %v2264_v58 = vadd.f32 %v1991_v31, %v1357_v1  ;;  %v1361_v1 = vld [vmem:[%s7436_s12 + $0x48] sm:$0xff] }
 0x22c   : > { %v5467_v16 = vpop.eup %5466  ;;  %5476 = vpow2.f32 %v4489_v56  ;;  %v1993_v61 = vpop.f32.mrf.mxu0  ;;  %v2300_v7 = vadd.f32 %v2135_v39, %v1393_v47 }
 0x22d   : > { %v2137_v5 = vpop.f32.mrf.mxu1  ;;  %v2386_v29 = vadd.f32 1.0, %v5467_v16  ;;  %v4490_v17 = vmul.f32 -1.442695, %v2264_v58  ;;  %5478 = vtanh.f32 %v2296_v18 }
 0x22e   : > { %v1996_v62 = vpop.f32.mrf.mxu0 }
 0x22f   : > { %v2140_v3 = vpop.f32.mrf.mxu1  ;;  %5480 = vrcp.f32 %v2386_v29  ;;  %v2265_v15 = vadd.f32 %v1996_v62, %v1358_v59  ;;  %v1394_v59 = vld [vmem:[%s7436_s12 + $0x150] sm:$0xff] }
 0x230   : > { %v5469_v48 = vpop.eup %5468  ;;  %5482 = vpow2.f32 %v4490_v17  ;;  %v1998_v55 = vpop.f32.mrf.mxu0  ;;  %v1362_v17 = vld [vmem:[%s7436_s12 + $0x50] sm:$0xff] }
 0x231   : > { %v2142_v10 = vpop.f32.mrf.mxu1  ;;  %v2387_v22 = vadd.f32 1.0, %v5469_v48  ;;  %5484 = vtanh.f32 %v2297_v34  ;;  %v4491_v40 = vmul.f32 -1.442695, %v2265_v15  ;;  %v2301_v55 = vadd.f32 %v2140_v3, %v1394_v59 }
 0x232   : > { %v1999_v20 = vpop.f32.mrf.mxu0 }
 0x233   : > { %v7450_v2 = vpop.f32.mrf.mxu1  ;;  %5486 = vrcp.f32 %v2387_v22  ;;  %v2266_v57 = vadd.f32 %v1999_v20, %v1359_v32 }
 0x234   : > { %v5471_v42 = vpop.eup %5470  ;;  %5488 = vpow2.f32 %v4491_v40  ;;  %v2001_v37 = vpop.f32.mrf.mxu0  ;;  %v1395_v40 = vld [vmem:[%s7436_s12 + $0x158] sm:$0xff] }
 0x235   : > { %v2145_v9 = vpop.f32.mrf.mxu1  ;;  %v2388_v28 = vadd.f32 1.0, %v5471_v42  ;;  %v4492_v19 = vmul.f32 -1.442695, %v2266_v57  ;;  %v5473_v43 = vpop.eup %5472  ;;  %5490 = vtanh.f32 %v2298_v41  ;;  %v1363_v57 = vld [vmem:[%s7436_s12 + $0x58] sm:$0xff]  ;;  %v2302_v3 = vadd.f32 %v7450_v2, %v1395_v40 }
 0x236   : > { %v2004_v35 = vpop.f32.mrf.mxu0 }
 0x237   : > { %v7454_v21 = vpop.f32.mrf.mxu1  ;;  %5492 = vrcp.f32 %v2388_v28  ;;  %v2267_v26 = vadd.f32 %v2004_v35, %v1360_v30 }
 0x238   : > { %v5475_v45 = vpop.eup %5474  ;;  %5494 = vpow2.f32 %v4492_v19  ;;  %v2006_v52 = vpop.f32.mrf.mxu0  ;;  %v1396_v19 = vld [vmem:[%s7436_s12 + $0x160] sm:$0xff] }
 0x239   : > { %v2150_v27 = vpop.f32.mrf.mxu1  ;;  %v5477_v54 = vpop.eup %5476  ;;  %v7458_v56 = vmul.f32 %v5475_v45, %v5473_v43  ;;  %v4493_v18 = vmul.f32 -1.442695, %v2267_v26  ;;  %5496 = vtanh.f32 %v2299_v0  ;;  %v1364_v45 = vld [vmem:[%s7436_s12 + $0x60] sm:$0xff]  ;;  %v2303_v2 = vadd.f32 %v7454_v21, %v1396_v19 }
 0x23a   : > { %v2389_v31 = vadd.f32 1.0, %v5477_v54  ;;  %v2007_v4 = vpop.f32.mrf.mxu0  ;;  %v5479_v16 = vpop.eup %5478 }
 0x23b   : > { %v7460_v58 = vpop.f32.mrf.mxu1  ;;  %5498 = vpow2.f32 %v4493_v18  ;;  %v2268_v61 = vadd.f32 %v2007_v4, %v1361_v1 }
 0x23c   : > { %v5481_v5 = vpop.eup %5480  ;;  %5500 = vrcp.f32 %v2389_v31  ;;  %v2009_v29 = vpop.f32.mrf.mxu0 }
 0x23d   : > { %v2153_v34 = vpop.f32.mrf.mxu1  ;;  %v5483_v62 = vpop.eup %5482  ;;  %v7464_v15 = vmul.f32 %v5481_v5, %v5479_v16  ;;  %v4494_v44 = vmul.f32 -1.442695, %v2268_v61  ;;  %5502 = vtanh.f32 %v2300_v7  ;;  %v1397_v61 = vld [vmem:[%s7436_s12 + $0x168] sm:$0xff] }
 0x23e   : > { %v5485_v48 = vpop.eup %5484  ;;  %v2390_v39 = vadd.f32 1.0, %v5483_v62  ;;  %v2012_v32 = vpop.f32.mrf.mxu0  ;;  %v1365_v29 = vld [vmem:[%s7436_s12 + $0x68] sm:$0xff] }
 0x23f   : > { %v7466_v10 = vpop.f32.mrf.mxu1  ;;  %5504 = vpow2.f32 %v4494_v44  ;;  %v2269_v22 = vadd.f32 %v2012_v32, %v1362_v17 }
 0x240   : > { %v5487_v41 = vpop.eup %5486  ;;  %5506 = vrcp.f32 %v2390_v39  ;;  %v2014_v20 = vpop.f32.mrf.mxu0 }
 0x241   : > { %v2158_v8 = vpop.f32.mrf.mxu1  ;;  %v5489_v42 = vpop.eup %5488  ;;  %v7470_v37 = vmul.f32 %v5487_v41, %v5485_v48  ;;  %v4495_v30 = vmul.f32 -1.442695, %v2269_v22  ;;  %5508 = vtanh.f32 %v2301_v55  ;;  %v2304_v48 = vadd.f32 %v7460_v58, %v1397_v61  ;;  %v1398_v55 = vld [vmem:[%s7436_s12 + $0x170] sm:$0xff] }
 0x242   : > { %v2391_v9 = vadd.f32 1.0, %v5489_v42  ;;  %v2015_v28 = vpop.f32.mrf.mxu0  ;;  %v5491_v0 = vpop.eup %5490 }
 0x243   : > { %v7474_v43 = vpop.f32.mrf.mxu1  ;;  %5510 = vpow2.f32 %v4495_v30  ;;  %v2270_v35 = vadd.f32 %v2015_v28, %v1363_v57  ;;  %v1366_v57 = vld [vmem:[%s7436_s12 + $0x70] sm:$0xff] }
 0x244   : > { %v5493_v26 = vpop.eup %5492  ;;  %5512 = vrcp.f32 %v2391_v9  ;;  %v2017_v47 = vpop.f32.mrf.mxu0 }
 0x245   : > { %v2161_v52 = vpop.f32.mrf.mxu1  ;;  %v5495_v1 = vpop.eup %5494  ;;  %v7477_v27 = vmul.f32 %v5493_v26, %v5491_v0  ;;  %v4496_v54 = vmul.f32 -1.442695, %v2270_v35  ;;  %5514 = vtanh.f32 %v2302_v3  ;;  %v2305_v3 = vadd.f32 %v7466_v10, %v1398_v55  ;;  %v1399_v26 = vld [vmem:[%s7436_s12 + $0x178] sm:$0xff] }
 0x246   : > { %v2392_v18 = vadd.f32 1.0, %v5495_v1  ;;  %v2020_v31 = vpop.f32.mrf.mxu0  ;;  %v5497_v4 = vpop.eup %5496  ;;  %v1367_v52 = vld [vmem:[%s7436_s12 + $0x78] sm:$0xff] }
 0x247   : > { %v7480_v7 = vpop.f32.mrf.mxu1  ;;  %5516 = vpow2.f32 %v4496_v54  ;;  %v2271_v16 = vadd.f32 %v2020_v31, %v1364_v45  ;;  %v2306_v31 = vadd.f32 %v7474_v43, %v1399_v26 }
 0x248   : > { %v5499_v59 = vpop.eup %5498  ;;  %5518 = vrcp.f32 %v2392_v18  ;;  %v2022_v5 = vpop.f32.mrf.mxu0 }
 0x249   : > { %v2166_v17 = vpop.f32.mrf.mxu1  ;;  %v5501_v34 = vpop.eup %5500  ;;  %v2393_v62 = vadd.f32 1.0, %v5499_v59  ;;  %5520 = vtanh.f32 %v2303_v2  ;;  %v4497_v21 = vmul.f32 -1.442695, %v2271_v16  ;;  %v1400_v5 = vld [vmem:[%s7436_s12 + $0x180] sm:$0xff] }
 0x24a   : > { %v7484_v44 = vmul.f32 %v5501_v34, %v5497_v4  ;;  %v2023_v39 = vpop.f32.mrf.mxu0  ;;  %v5503_v22 = vpop.eup %5502  ;;  %v1368_v34 = vld [vmem:[%s7436_s12 + $0x80] sm:$0xff]  ;;  %v2307_v43 = vadd.f32 %v7480_v7, %v1400_v5 }
 0x24b   : > { %v7488_v32 = vpop.f32.mrf.mxu1  ;;  %5522 = vrcp.f32 %v2393_v62  ;;  %v2272_v40 = vadd.f32 %v2023_v39, %v1365_v29 }
 0x24c   : > { %v5505_v41 = vpop.eup %5504  ;;  %5524 = vpow2.f32 %v4497_v21  ;;  %v2025_v20 = vpop.f32.mrf.mxu0 }
 0x24d   : > { %v2169_v8 = vpop.f32.mrf.mxu1  ;;  %v5507_v42 = vpop.eup %5506  ;;  %v2394_v30 = vadd.f32 1.0, %v5505_v41  ;;  %v4498_v9 = vmul.f32 -1.442695, %v2272_v40  ;;  %5526 = vtanh.f32 %v2304_v48 }
 0x24e   : > { %v7492_v58 = vmul.f32 %v5507_v42, %v5503_v22  ;;  %v2028_v28 = vpop.f32.mrf.mxu0  ;;  %v5509_v0 = vpop.eup %5508 }
 0x24f   : > { %v7494_v19 = vpop.f32.mrf.mxu1  ;;  %5528 = vrcp.f32 %v2394_v30  ;;  %v2273_v35 = vadd.f32 %v2028_v28, %v1366_v57  ;;  %v1401_v57 = vld [vmem:[%s7436_s12 + $0x188] sm:$0xff] }
 0x250   : > { %v5511_v47 = vpop.eup %5510  ;;  %5530 = vpow2.f32 %v4498_v9  ;;  %v2030_v45 = vpop.f32.mrf.mxu0  ;;  %v1369_v30 = vld [vmem:[%s7436_s12 + $0x88] sm:$0xff]  ;;  %v2308_v7 = vadd.f32 %v7488_v32, %v1401_v57  ;;  %v1371_v57 = vld [vmem:[%s7436_s12 + $0x98] sm:$0xff] }
 0x251   : > { %v2174_v1 = vpop.f32.mrf.mxu1  ;;  %v5513_v54 = vpop.eup %5512  ;;  %v2395_v2 = vadd.f32 1.0, %v5511_v47  ;;  %5532 = vtanh.f32 %v2305_v3  ;;  %v4499_v10 = vmul.f32 -1.442695, %v2273_v35  ;;  %v1402_v47 = vld [vmem:[%s7436_s12 + $0x190] sm:$0xff] }
 0x252   : > { %v7498_v18 = vmul.f32 %v5513_v54, %v5509_v0  ;;  %v2031_v4 = vpop.f32.mrf.mxu0  ;;  %v5515_v61 = vpop.eup %5514  ;;  %v1403_v54 = vld [vmem:[%s7436_s12 + $0x198] sm:$0xff] }
 0x253   : > { %v2175_v16 = vpop.f32.mrf.mxu1  ;;  %5534 = vrcp.f32 %v2395_v2  ;;  %v2274_v59 = vadd.f32 %v2031_v4, %v1367_v52 }
 0x254   : > { %v5517_v29 = vpop.eup %5516  ;;  %5536 = vpow2.f32 %v4499_v10  ;;  %v2033_v17 = vpop.f32.mrf.mxu0 }
 0x255   : > { %v2177_v62 = vpop.f32.mrf.mxu1  ;;  %v5519_v21 = vpop.eup %5518  ;;  %v2396_v48 = vadd.f32 1.0, %v5517_v29  ;;  %v4500_v39 = vmul.f32 -1.442695, %v2274_v59  ;;  %5538 = vtanh.f32 %v2306_v31  ;;  %v1370_v31 = vld [vmem:[%s7436_s12 + $0x90] sm:$0xff]  ;;  %v2309_v29 = vadd.f32 %v7494_v19, %v1402_v47 }
 0x256   : > { %v5521_v55 = vpop.eup %5520  ;;  %v7503_v22 = vmul.f32 %v5519_v21, %v5515_v61  ;;  %v2036_v40 = vpop.f32.mrf.mxu0  ;;  %v1406_v61 = vld [vmem:[%s7436_s12 + $0x1b0] sm:$0xff]  ;;  %v2310_v21 = vadd.f32 %v2175_v16, %v1403_v54 }
 0x257   : > { %v2180_v41 = vpop.f32.mrf.mxu1  ;;  %5540 = vrcp.f32 %v2396_v48  ;;  %v2275_v20 = vadd.f32 %v2036_v40, %v1368_v34 }
 0x258   : > { %v5523_v8 = vpop.eup %5522  ;;  %5542 = vpow2.f32 %v4500_v39  ;;  %v2038_v42 = vpop.f32.mrf.mxu0 }
 0x259   : > { %v2182_v9 = vpop.f32.mrf.mxu1  ;;  %v5525_v3 = vpop.eup %5524  ;;  %v7508_v28 = vmul.f32 %v5523_v8, %v5521_v55  ;;  %v4501_v0 = vmul.f32 -1.442695, %v2275_v20  ;;  %5544 = vtanh.f32 %v2307_v43  ;;  %v1404_v55 = vld [vmem:[%s7436_s12 + $0x1a0] sm:$0xff]  ;;  %v1407_v42 = vld [vmem:[%s7436_s12 + $0x1b8] sm:$0xff] }
 0x25a   : > { %v2397_v35 = vadd.f32 1.0, %v5525_v3  ;;  %v2039_v26 = vpop.f32.mrf.mxu0  ;;  %v5527_v52 = vpop.eup %5526 }
 0x25b   : > { %v7512_v45 = vpop.f32.mrf.mxu1  ;;  %5546 = vpow2.f32 %v4501_v0  ;;  %v2276_v1 = vadd.f32 %v2039_v26, %v1369_v30 }
 0x25c   : > { %v5529_v2 = vpop.eup %5528  ;;  %5548 = vrcp.f32 %v2397_v35  ;;  %v2041_v10 = vpop.f32.mrf.mxu0  ;;  %v2311_v35 = vadd.f32 %v2180_v41, %v1404_v55 }
 0x25d   : > { %v2185_v4 = vpop.f32.mrf.mxu1  ;;  %v5531_v59 = vpop.eup %5530  ;;  %v7517_v5 = vmul.f32 %v5529_v2, %v5527_v52  ;;  %v4502_v32 = vmul.f32 -1.442695, %v2276_v1  ;;  %5550 = vtanh.f32 %v2308_v7  ;;  %v1372_v2 = vld [vmem:[%s7436_s12 + $0xa0] sm:$0xff] }
 0x25e   : > { %v5533_v17 = vpop.eup %5532  ;;  %v2398_v34 = vadd.f32 1.0, %v5531_v59  ;;  %v2044_v62 = vpop.f32.mrf.mxu0 }
 0x25f   : > { %v2188_v48 = vpop.f32.mrf.mxu1  ;;  %5552 = vpow2.f32 %v4502_v32  ;;  %v2277_v39 = vadd.f32 %v2044_v62, %v1370_v31  ;;  %v1408_v31 = vld [vmem:[%s7436_s12 + $0x1c0] sm:$0xff] }
 0x260   : > { %v2313_v43 = vadd.f32 %v2188_v48, %v1406_v61  ;;  %v5535_v40 = vpop.eup %5534  ;;  %5554 = vrcp.f32 %v2398_v34  ;;  %v2046_v20 = vpop.f32.mrf.mxu0 }
 0x261   : > { %v2190_v8 = vpop.f32.mrf.mxu1  ;;  %v5537_v30 = vpop.eup %5536  ;;  %v7523_v9 = vmul.f32 %v5535_v40, %v5533_v17  ;;  %5556 = vtanh.f32 %v2309_v29  ;;  %v4503_v19 = vmul.f32 -1.442695, %v2277_v39  ;;  %v1409_v20 = vld [vmem:[%s7436_s12 + $0x1c8] sm:$0xff] }
 0x262   : > { %v4521_v3 = vmul.f32 -1.442695, %v2313_v43  ;;  %v2399_v16 = vadd.f32 1.0, %v5537_v30  ;;  %5558 = vtanh.f32 %v2310_v21  ;;  %v2047_v0 = vpop.f32.mrf.mxu0  ;;  %v5539_v26 = vpop.eup %5538  ;;  %v1405_v21 = vld [vmem:[%s7436_s12 + $0x1a8] sm:$0xff] }
 0x263   : > { %v2191_v7 = vpop.f32.mrf.mxu1  ;;  %5560 = vpow2.f32 %v4503_v19  ;;  %v2278_v47 = vadd.f32 %v2047_v0, %v1371_v57  ;;  %v1373_v43 = vld [vmem:[%s7436_s12 + $0xa8] sm:$0xff] }
 0x264   : > { %v2314_v52 = vadd.f32 %v2191_v7, %v1407_v42  ;;  %v5541_v1 = vpop.eup %5540  ;;  %5562 = vrcp.f32 %v2399_v16  ;;  %v2049_v54 = vpop.f32.mrf.mxu0 }
 0x265   : > { %v2193_v10 = vpop.f32.mrf.mxu1  ;;  %v5543_v4 = vpop.eup %5542  ;;  %v7527_v61 = vmul.f32 %v5541_v1, %v5539_v26  ;;  %v4504_v59 = vmul.f32 -1.442695, %v2278_v47  ;;  %5564 = vpow2.f32 %v4521_v3  ;;  %v2312_v3 = vadd.f32 %v7512_v45, %v1405_v21  ;;  %v1374_v1 = vld [vmem:[%s7436_s12 + $0xb0] sm:$0xff] }
 0x266   : > { %v4522_v41 = vmul.f32 -1.442695, %v2314_v52  ;;  %v2400_v32 = vadd.f32 1.0, %v5543_v4  ;;  %5566 = vtanh.f32 %v2311_v35  ;;  %v2052_v29 = vpop.f32.mrf.mxu0  ;;  %v5545_v34 = vpop.eup %5544 }
 0x267   : > { %v2196_v17 = vpop.f32.mrf.mxu1  ;;  %5568 = vpow2.f32 %v4504_v59  ;;  %v2279_v62 = vadd.f32 %v2052_v29, %v1372_v2  ;;  %v1410_v2 = vld [vmem:[%s7436_s12 + $0x1d0] sm:$0xff] }
 0x268   : > { %v2315_v48 = vadd.f32 %v2196_v17, %v1408_v31  ;;  %v5547_v39 = vpop.eup %5546  ;;  %5570 = vrcp.f32 %v2400_v32  ;;  %v2054_v55 = vpop.f32.mrf.mxu0 }
 0x269   : > { %v2198_v40 = vpop.f32.mrf.mxu1  ;;  %v5549_v57 = vpop.eup %5548  ;;  %v2401_v8 = vadd.f32 1.0, %v5547_v39  ;;  %v4505_v42 = vmul.f32 -1.442695, %v2279_v62  ;;  %5572 = vpow2.f32 %v4522_v41  ;;  %v1375_v39 = vld [vmem:[%s7436_s12 + $0xb8] sm:$0xff] }
 0x26a   : > { %v4523_v30 = vmul.f32 -1.442695, %v2315_v48  ;;  %v7532_v19 = vmul.f32 %v5549_v57, %v5545_v34  ;;  %v2055_v16 = vpop.f32.mrf.mxu0  ;;  %v5551_v35 = vpop.eup %5550 }
 0x26b   : > { %v2199_v0 = vpop.f32.mrf.mxu1  ;;  %5574 = vrcp.f32 %v2401_v8  ;;  %v2280_v7 = vadd.f32 %v2055_v16, %v1373_v43  ;;  %v1411_v43 = vld [vmem:[%s7436_s12 + $0x1d8] sm:$0xff] }
 0x26c   : > { %v2316_v26 = vadd.f32 %v2199_v0, %v1409_v20  ;;  %v5553_v47 = vpop.eup %5552  ;;  %5576 = vpow2.f32 %v4505_v42  ;;  %v2057_v52 = vpop.f32.mrf.mxu0 }
 0x26d   : > { %v2201_v54 = vpop.f32.mrf.mxu1  ;;  %v5555_v10 = vpop.eup %5554  ;;  %v2402_v31 = vadd.f32 1.0, %v5553_v47  ;;  %v4506_v4 = vmul.f32 -1.442695, %v2280_v7  ;;  %5578 = vpow2.f32 %v4523_v30 }
 0x26e   : > { %v4524_v59 = vmul.f32 -1.442695, %v2316_v26  ;;  %v5557_v45 = vpop.eup %5556  ;;  %v7537_v41 = vmul.f32 %v5555_v10, %v5551_v35  ;;  %5580 = vtanh.f32 %v2312_v3  ;;  %v2060_v32 = vpop.f32.mrf.mxu0 }
 0x26f   : > { %v2204_v29 = vpop.f32.mrf.mxu1  ;;  %v5559_v17 = vpop.eup %5558  ;;  %5582 = vrcp.f32 %v2402_v31  ;;  %v2281_v34 = vadd.f32 %v2060_v32, %v1374_v1  ;;  %v1376_v1 = vld [vmem:[%s7436_s12 + $0xc0] sm:$0xff] }
 0x270   : > { %v2317_v62 = vadd.f32 %v2204_v29, %v1410_v2  ;;  %v5561_v21 = vpop.eup %5560  ;;  %5584 = vpow2.f32 %v4506_v4  ;;  %v2062_v48 = vpop.f32.mrf.mxu0  ;;  %v1412_v2 = vld [vmem:[%s7436_s12 + $0x1e0] sm:$0xff] }
 0x271   : > { %v2206_v55 = vpop.f32.mrf.mxu1  ;;  %v5563_v40 = vpop.eup %5562  ;;  %v2493_v20 = vadd.f32 1.0, %v5561_v21  ;;  %v4507_v57 = vmul.f32 -1.442695, %v2281_v34  ;;  %5586 = vpow2.f32 %v4524_v59 }
 0x272   : > { %v5565_v8 = vpop.eup %5564  ;;  %v7541_v42 = vmul.f32 %v5563_v40, %v5557_v45  ;;  %v2063_v30 = vpop.f32.mrf.mxu0  ;;  %v4525_v3 = vmul.f32 -1.442695, %v2317_v62 }
 0x273   : > { %v2207_v16 = vpop.f32.mrf.mxu1  ;;  %v5567_v0 = vpop.eup %5566  ;;  %5588 = vrcp.f32 %v2493_v20  ;;  %v2619_v35 = vadd.f32 1.0, %v5565_v8  ;;  %v2282_v7 = vadd.f32 %v2063_v30, %v1375_v39  ;;  %v1413_v20 = vld [vmem:[%s7436_s12 + $0x1e8] sm:$0xff] }
 0x274   : > { %v2318_v26 = vadd.f32 %v2207_v16, %v1411_v43  ;;  %v5569_v47 = vpop.eup %5568  ;;  %5590 = vpow2.f32 %v4507_v57  ;;  %v2065_v52 = vpop.f32.mrf.mxu0  ;;  %v1377_v43 = vld [vmem:[%s7436_s12 + $0xc8] sm:$0xff] }
 0x275   : > { %v2209_v54 = vpop.f32.mrf.mxu1  ;;  %v5571_v10 = vpop.eup %5570  ;;  %v2494_v31 = vadd.f32 1.0, %v5569_v47  ;;  %5592 = vrcp.f32 %v2619_v35  ;;  %v4508_v4 = vmul.f32 -1.442695, %v2282_v7 }
 0x276   : > { %v5573_v59 = vpop.eup %5572  ;;  %v7545_v45 = vmul.f32 %v5571_v10, %v5559_v17  ;;  %v2068_v32 = vpop.f32.mrf.mxu0  ;;  %5594 = vpow2.f32 %v4525_v3  ;;  %v4526_v29 = vmul.f32 -1.442695, %v2318_v26  ;;  %v1378_v10 = vld [vmem:[%s7436_s12 + $0xd0] sm:$0xff] }
 0x277   : > { %v2212_v34 = vpop.f32.mrf.mxu1  ;;  %5596 = vrcp.f32 %v2494_v31  ;;  %v2620_v62 = vadd.f32 1.0, %v5573_v59  ;;  %v2283_v21 = vadd.f32 %v2068_v32, %v1376_v1 }
 0x278   : > { %v2319_v48 = vadd.f32 %v2212_v34, %v1412_v2  ;;  %v5575_v39 = vpop.eup %5574  ;;  %5598 = vpow2.f32 %v4508_v4  ;;  %v2070_v55 = vpop.f32.mrf.mxu0 }
 0x279   : > { %v2214_v40 = vpop.f32.mrf.mxu1  ;;  %v5577_v57 = vpop.eup %5576  ;;  %v7549_v8 = vmul.f32 %v5575_v39, %v5567_v0  ;;  %5600 = vrcp.f32 %v2620_v62  ;;  %v4509_v17 = vmul.f32 -1.442695, %v2283_v21 }
 0x27a   : > { %v5579_v30 = vpop.eup %5578  ;;  %v2495_v3 = vadd.f32 1.0, %v5577_v57  ;;  %v2071_v16 = vpop.f32.mrf.mxu0  ;;  %5602 = vpow2.f32 %v4526_v29  ;;  %v4527_v35 = vmul.f32 -1.442695, %v2319_v48  ;;  %v1379_v40 = vld [vmem:[%s7436_s12 + $0xd8] sm:$0xff] }
 0x27b   : > { %v2215_v7 = vpop.f32.mrf.mxu1  ;;  %v5581_v26 = vpop.eup %5580  ;;  %v2621_v47 = vadd.f32 1.0, %v5579_v30  ;;  %5604 = vpow2.f32 %v4509_v17  ;;  %v2284_v52 = vadd.f32 %v2071_v16, %v1377_v43 }
 0x27c   : > { %v2320_v1 = vadd.f32 %v2215_v7, %v1413_v20  ;;  %v5583_v54 = vpop.eup %5582  ;;  %5606 = vrcp.f32 %v2495_v3  ;;  %v2073_v2 = vpop.f32.mrf.mxu0  ;;  %v1414_v7 = vld [vmem:[%s7436_s12 + $0x1f0] sm:$0xff] }
 0x27d   : > { %v2217_v0 = vpop.f32.mrf.mxu1  ;;  %v5585_v31 = vpop.eup %5584  ;;  %v7552_v4 = vmul.f32 %v5583_v54, %v5581_v26  ;;  %5608 = vrcp.f32 %v2621_v47  ;;  %v4510_v59 = vmul.f32 -1.442695, %v2284_v52 }
 0x27e   : > { %v5587_v32 = vpop.eup %5586  ;;  %v2496_v29 = vadd.f32 1.0, %v5585_v31  ;;  %v2076_v34 = vpop.f32.mrf.mxu0  ;;  %5610 = vpow2.f32 %v4527_v35  ;;  %v4528_v62 = vmul.f32 -1.442695, %v2320_v1 }
 0x27f   : > { %v2220_v21 = vpop.f32.mrf.mxu1  ;;  %v2622_v48 = vadd.f32 1.0, %v5587_v32  ;;  %5612 = vpow2.f32 %v4510_v59  ;;  %v2285_v39 = vadd.f32 %v2076_v34, %v1378_v10  ;;  %v1380_v10 = vld [vmem:[%s7436_s12 + $0xe0] sm:$0xff] }
 0x280   : > { %v5589_v55 = vpop.eup %5588  ;;  %5614 = vrcp.f32 %v2496_v29  ;;  %v2078_v43 = vpop.f32.mrf.mxu0  ;;  %v2321_v29 = vadd.f32 %v2220_v21, %v1414_v7 }
 0x281   : > { %v2222_v20 = vpop.f32.mrf.mxu1  ;;  %v5591_v57 = vpop.eup %5590  ;;  %v2673_v17 = vmul.f32 %v6181_v11, %v5589_v55  ;;  %5616 = vrcp.f32 %v2622_v48  ;;  %v4511_v30 = vmul.f32 -1.442695, %v2285_v39 }
 0x282   : > { %v7556_v3 = vpop.eup %5592  ;;  %v2497_v16 = vadd.f32 1.0, %v5591_v57  ;;  %v2079_v35 = vpop.f32.mrf.mxu0  ;;  %5618 = vpow2.f32 %v4528_v62  ;;  %v1381_v57 = vld [vmem:[%s7436_s12 + $0xe8] sm:$0xff] }
 0x283   : > { %v7559_v26 = vpop.f32.mrf.mxu1  ;;  %v5595_v47 = vpop.eup %5594  ;;  %v7562_v11 = vadd.f32 %v7458_v56, %v2673_v17   ;;  %5620 = vpow2.f32 %v4511_v30  ;;  %v2286_v52 = vadd.f32 %v2079_v35, %v1379_v40  ;;  %v4529_v35 = vmul.f32 -1.442695, %v2321_v29 }
 0x284   : > { %v5597_v1 = vpop.eup %5596  ;;  %5622 = vrcp.f32 %v2497_v16  ;;  %v2623_v54 = vadd.f32 1.0, %v5595_v47  ;;  %v2081_v2 = vpop.f32.mrf.mxu0 }
 0x285   : > { %v2225_v0 = vpop.f32.mrf.mxu1  ;;  %v5599_v31 = vpop.eup %5598  ;;  %5624 = vtanh.f32 %v7562_v11  ;;  %v2674_v59 = vmul.f32 %v6177_v49, %v5597_v1  ;;  %v4512_v32 = vmul.f32 -1.442695, %v2286_v52 }
 0x286   : > { %v7567_v34 = vpop.eup %5600  ;;  %v2498_v56 = vadd.f32 1.0, %v5599_v31  ;;  %5626 = vrcp.f32 %v2623_v54  ;;  %v2084_v62 = vpop.f32.mrf.mxu0  ;;  %v1382_v31 = vld [vmem:[%s7436_s12 + $0xf0] sm:$0xff] }
 0x287   : > { %v7569_v48 = vpop.f32.mrf.mxu1  ;;  %v5603_v39 = vpop.eup %5602  ;;  %v7572_v49 = vadd.f32 %v7464_v15, %v2674_v59   ;;  %5628 = vpow2.f32 %v4512_v32  ;;  %v2287_v55 = vadd.f32 %v2084_v62, %v1380_v10  ;;  %v1415_v62 = vld [vmem:[%s7436_s12 + $0x1f8] sm:$0xff] }
 0x288   : > { %v5605_v43 = vpop.eup %5604  ;;  %5630 = vrcp.f32 %v2498_v56  ;;  %v2624_v40 = vadd.f32 1.0, %v5603_v39  ;;  %v2086_v20 = vpop.f32.mrf.mxu0 }
 0x289   : > { %v2230_v17 = vpop.f32.mrf.mxu1  ;;  %v5607_v21 = vpop.eup %5606  ;;  %5632 = vtanh.f32 %v7572_v49  ;;  %v2499_v30 = vadd.f32 1.0, %v5605_v43  ;;  %v4513_v16 = vmul.f32 -1.442695, %v2287_v55 }
 0x28a   : > { %v7576_v7 = vpop.eup %5608  ;;  %v2675_v15 = vmul.f32 %v6173_v6, %v5607_v21  ;;  %5634 = vrcp.f32 %v2624_v40  ;;  %v2087_v47 = vpop.f32.mrf.mxu0  ;;  %v2322_v21 = vadd.f32 %v7559_v26, %v1415_v62  ;;  %v1384_v62 = vld [vmem:[%s7436_s12 + $0x100] sm:$0xff] }
 0x28b   : > { %v7579_v52 = vpop.f32.mrf.mxu1  ;;  %v5611_v1 = vpop.eup %5610  ;;  %5636 = vrcp.f32 %v2499_v30  ;;  %v2288_v54 = vadd.f32 %v2087_v47, %v1381_v57 }
 0x28c   : > { %v5613_v2 = vpop.eup %5612  ;;  %v7582_v6 = vadd.f32 %v7470_v37, %v2675_v15   ;;  %v2625_v10 = vadd.f32 1.0, %v5611_v1  ;;  %5638 = vpow2.f32 %v4513_v16  ;;  %v2089_v0 = vpop.f32.mrf.mxu0  ;;  %v1383_v16 = vld [vmem:[%s7436_s12 + $0xf8] sm:$0xff] }
 0x28d   : > { %v2233_v59 = vpop.f32.mrf.mxu1  ;;  %v5615_v32 = vpop.eup %5614  ;;  %v2500_v29 = vadd.f32 1.0, %v5613_v2  ;;  %v4514_v56 = vmul.f32 -1.442695, %v2288_v54  ;;  %5640 = vpow2.f32 %v4529_v35  ;;  %v1416_v35 = vld [vmem:[%s7436_s12 + $0x200] sm:$0xff] }
 0x28e   : > { %v7586_v39 = vpop.eup %5616  ;;  %5642 = vtanh.f32 %v7582_v6  ;;  %v2676_v55 = vmul.f32 %v6169_v53, %v5615_v32  ;;  %v2092_v37 = vpop.f32.mrf.mxu0  ;;  %v2323_v59 = vadd.f32 %v7569_v48, %v1416_v35  ;;  %v1417_v48 = vld [vmem:[%s7436_s12 + $0x208] sm:$0xff] }
 0x28f   : > { %v7591_v43 = vpop.f32.mrf.mxu1  ;;  %v5619_v40 = vpop.eup %5618  ;;  %5644 = vrcp.f32 %v2500_v29  ;;  %v2289_v20 = vadd.f32 %v2092_v37, %v1382_v31  ;;  %v4530_v29 = vmul.f32 -1.442695, %v2322_v21 }
 0x290   : > { %v5621_v57 = vpop.eup %5620  ;;  %v7594_v53 = vadd.f32 %v7477_v27, %v2676_v55   ;;  %5646 = vrcp.f32 %v2625_v10  ;;  %v2626_v17 = vadd.f32 1.0, %v5619_v40  ;;  %v2094_v30 = vpop.f32.mrf.mxu0 }
 0x291   : > { %v2238_v15 = vpop.f32.mrf.mxu1  ;;  %v5623_v47 = vpop.eup %5622  ;;  %v2501_v1 = vadd.f32 1.0, %v5621_v57  ;;  %5648 = vpow2.f32 %v4514_v56  ;;  %v4515_v54 = vmul.f32 -1.442695, %v2289_v20 }
 0x292   : > { %v5625_v2 = vpop.eup %5624  ;;  %5650 = vtanh.f32 %v7594_v53  ;;  %v2677_v0 = vmul.f32 %v6165_v33, %v5623_v47  ;;  %v2095_v27 = vpop.f32.mrf.mxu0 }
 0x293   : > { %v7601_v10 = vpop.f32.mrf.mxu1  ;;  %v7603_v31 = vpop.eup %5626  ;;  %v7606_v15 = vmul.f32 %v5625_v2, %v7556_v3   ;;  %5652 = vrcp.f32 %v2501_v1  ;;  %v2290_v26 = vadd.f32 %v2095_v27, %v1383_v16  ;;  %v4531_v16 = vmul.f32 -1.442695, %v2323_v59  ;;  %v1385_v2 = vld [vmem:[%s7436_s12 + $0x108] sm:$0xff] }
 0x294   : > { %v5629_v32 = vpop.eup %5628  ;;  %v7610_v33 = vadd.f32 %v7484_v44, %v2677_v0   ;;  %5654 = vrcp.f32 %v2626_v17  ;;  %v2097_v56 = vpop.f32.mrf.mxu0  ;;  %v2324_v1 = vadd.f32 %v7579_v52, %v1417_v48 }
 0x295   : > { %v2241_v55 = vpop.f32.mrf.mxu1  ;;  %v5631_v37 = vpop.eup %5630  ;;  %2765 = vst [vmem:[%s7615_s16] sm:$0xff] %v7606_v15  ;;  %v2502_v3 = vadd.f32 1.0, %v5629_v32  ;;  %5656 = vpow2.f32 %v4515_v54  ;;  %v4516_v40 = vmul.f32 -1.442695, %v2290_v26 }
 0x296   : > { %v5633_v20 = vpop.eup %5632  ;;  %5658 = vtanh.f32 %v7610_v33  ;;  %v2678_v44 = vmul.f32 %v6161_v13, %v5631_v37  ;;  %v2100_v57 = vpop.f32.mrf.mxu0 }
 0x297   : > { %v7622_v17 = vpop.f32.mrf.mxu1  ;;  %v7624_v21 = vpop.eup %5634  ;;  %v7627_v30 = vmul.f32 %v5633_v20, %v7567_v34   ;;  %5660 = vrcp.f32 %v2502_v3  ;;  %v2291_v35 = vadd.f32 %v2100_v57, %v1384_v62  ;;  %v1418_v34 = vld [vmem:[%s7436_s12 + $0x210] sm:$0xff] }
 0x298   : > { %v5637_v47 = vpop.eup %5636  ;;  %v7630_v13 = vadd.f32 %v7492_v58, %v2678_v44   ;;  %5662 = vpow2.f32 %v4530_v29  ;;  %v2102_v54 = vpop.f32.mrf.mxu0  ;;  %v2325_v48 = vadd.f32 %v7591_v43, %v1418_v34  ;;  %v1386_v44 = vld [vmem:[%s7436_s12 + $0x110] sm:$0xff] }
 0x299   : > { %v2246_v0 = vpop.f32.mrf.mxu1  ;;  %v5639_v27 = vpop.eup %5638  ;;  %2766 = vst [vmem:[%s7615_s16 + $0x8] sm:$0xff] %v7627_v30  ;;  %v2679_v26 = vmul.f32 %v6157_v36, %v5637_v47  ;;  %5664 = vpow2.f32 %v4516_v40  ;;  %v4517_v58 = vmul.f32 -1.442695, %v2291_v35  ;;  %v4532_v40 = vmul.f32 -1.442695, %v2324_v1 }
 0x29a   : > { %v5641_v32 = vpop.eup %5640  ;;  %5666 = vtanh.f32 %v7630_v13  ;;  %v2503_v59 = vadd.f32 1.0, %v5639_v27  ;;  %v2103_v56 = vpop.f32.mrf.mxu0  ;;  %v4533_v27 = vmul.f32 -1.442695, %v2325_v48 }
 0x29b   : > { %v7639_v29 = vpop.f32.mrf.mxu1  ;;  %v5643_v52 = vpop.eup %5642  ;;  %v7642_v36 = vadd.f32 %v7498_v18, %v2679_v26   ;;  %v2627_v62 = vadd.f32 1.0, %v5641_v32  ;;  %5668 = vpow2.f32 %v4531_v16  ;;  %v2292_v55 = vadd.f32 %v2103_v56, %v1385_v2 }
 0x29c   : > { %v5645_v37 = vpop.eup %5644  ;;  %v7645_v3 = vmul.f32 %v5643_v52, %v7576_v7   ;;  %5670 = vrcp.f32 %v2503_v59  ;;  %v2105_v20 = vpop.f32.mrf.mxu0 }
 0x29d   : > { %v2249_v57 = vpop.f32.mrf.mxu1  ;;  %v7649_v35 = vpop.eup %5646  ;;  %5672 = vtanh.f32 %v7642_v36  ;;  %v2680_v18 = vmul.f32 %v6153_v63, %v5645_v37  ;;  %v4518_v16 = vmul.f32 -1.442695, %v2292_v55 }
 0x29e   : > { %v5649_v47 = vpop.eup %5648  ;;  %2767 = vst [vmem:[%s7615_s16 + $0x10] sm:$0xff] %v7645_v3  ;;  %5674 = vrcp.f32 %v2627_v62  ;;  %v2108_v7 = vpop.f32.mrf.mxu0 }
 0x29f   : > { %v7655_v54 = vpop.f32.mrf.mxu1  ;;  %v5651_v1 = vpop.eup %5650  ;;  %v7658_v63 = vadd.f32 %v7503_v22, %v2680_v18   ;;  %v2504_v43 = vadd.f32 1.0, %v5649_v47  ;;  %5676 = vpow2.f32 %v4517_v58  ;;  %v2293_v2 = vadd.f32 %v2108_v7, %v1386_v44  ;;  %v1419_v22 = vld [vmem:[%s7436_s12 + $0x218] sm:$0xff] }
 0x2a0   : > { %v5653_v0 = vpop.eup %5652  ;;  %v7661_v34 = vmul.f32 %v5651_v1, %v7586_v39   ;;  %5678 = vpow2.f32 %v4532_v40  ;;  %v2110_v26 = vpop.f32.mrf.mxu0  ;;  %v1387_v58 = vld [vmem:[%s7436_s12 + $0x118] sm:$0xff]  ;;  %v2326_v44 = vadd.f32 %v7601_v10, %v1419_v22 }
 0x2a1   : > { %v2254_v32 = vpop.f32.mrf.mxu1  ;;  %v7663_v59 = vpop.eup %5654  ;;  %5680 = vtanh.f32 %v7658_v63  ;;  %v2681_v56 = vmul.f32 %v6149_v60, %v5653_v0  ;;  %v4519_v40 = vmul.f32 -1.442695, %v2293_v2  ;;  %v1421_v2 = vld [vmem:[%s7436_s12 + $0x228] sm:$0xff] }
 0x2a2   : > { %v5657_v52 = vpop.eup %5656  ;;  %2768 = vst [vmem:[%s7615_s16 + $0x18] sm:$0xff] %v7661_v34  ;;  %5682 = vrcp.f32 %v2504_v43  ;;  %v2111_v62 = vpop.f32.mrf.mxu0  ;;  %v1420_v43 = vld [vmem:[%s7436_s12 + $0x220] sm:$0xff]  ;;  %v4534_v32 = vmul.f32 -1.442695, %v2326_v44 }
 0x2a3   : > { %v7671_v55 = vpop.f32.mrf.mxu1  ;;  %v5659_v39 = vpop.eup %5658  ;;  %v7674_v60 = vadd.f32 %v7508_v28, %v2681_v56   ;;  %v2505_v37 = vadd.f32 1.0, %v5657_v52  ;;  %5684 = vpow2.f32 %v4518_v16  ;;  %v2294_v7 = vadd.f32 %v2111_v62, %v1387_v58 }
 0x2a4   : > { %v5661_v48 = vpop.eup %5660  ;;  %v7677_v20 = vmul.f32 %v5659_v39, %v7603_v31   ;;  %5686 = vpow2.f32 %v4533_v27  ;;  %v2113_v57 = vpop.f32.mrf.mxu0  ;;  %v2327_v58 = vadd.f32 %v7622_v17, %v1420_v43 }
 0x2a5   : > { %v2257_v18 = vpop.f32.mrf.mxu1  ;;  %v5663_v47 = vpop.eup %5662  ;;  %5688 = vtanh.f32 %v7674_v60  ;;  %v2682_v28 = vmul.f32 %v6145_v51, %v5661_v48  ;;  %v4520_v52 = vmul.f32 -1.442695, %v2294_v7  ;;  %v1423_v7 = vld [vmem:[%s7436_s12 + $0x238] sm:$0xff] }
 0x2a6   : > { %v5665_v1 = vpop.eup %5664  ;;  %2769 = vst [vmem:[%s7615_s16 + $0x20] sm:$0xff] %v7677_v20  ;;  %5690 = vrcp.f32 %v2505_v37  ;;  %v2628_v16 = vadd.f32 1.0, %v5663_v47  ;;  %v1422_v37 = vld [vmem:[%s7436_s12 + $0x230] sm:$0xff]  ;;  %v4535_v44 = vmul.f32 -1.442695, %v2327_v58 }
 0x2a7   : > { %v5667_v31 = vpop.eup %5666  ;;  %v7686_v51 = vadd.f32 %v7517_v5, %v2682_v28   ;;  %v2506_v10 = vadd.f32 1.0, %v5665_v1  ;;  %5692 = vpow2.f32 %v4519_v40  ;;  %v2329_v18 = vadd.f32 %v7655_v54, %v1422_v37 }
 0x2a8   : > { %v5669_v0 = vpop.eup %5668  ;;  %v7690_v27 = vmul.f32 %v5667_v31, %v7624_v21   ;;  %5694 = vrcp.f32 %v2628_v16  ;;  %v2328_v21 = vadd.f32 %v7639_v29, %v1421_v2  ;;  %v2330_v2 = vadd.f32 %v7671_v55, %v1423_v7 }
 0x2a9   : > { %v5671_v56 = vpop.eup %5670  ;;  %5696 = vtanh.f32 %v7686_v51  ;;  %v2629_v22 = vadd.f32 1.0, %v5669_v0  ;;  %v4537_v31 = vmul.f32 -1.442695, %v2329_v18 }
 0x2aa   : > { %v8671_v26 = vmov %v7690_v27  ;;  %v5673_v5 = vpop.eup %5672  ;;  %v2683_v62 = vmul.f32 %v6141_v12, %v5671_v56  ;;  %5698 = vrcp.f32 %v2506_v10  ;;  %v4536_v57 = vmul.f32 -1.442695, %v2328_v21 }
 0x2ab   : > { %2770 = vst [vmem:[%s7615_s16 + $0x28] sm:$0xff] %v8671_v26  ;;  %v5675_v39 = vpop.eup %5674  ;;  %v7699_v5 = vmul.f32 %v5673_v5, %v7649_v35   ;;  %5700 = vrcp.f32 %v2629_v22  ;;  %v4538_v55 = vmul.f32 -1.442695, %v2330_v2 }
 0x2ac   : > { %v5677_v40 = vpop.eup %5676  ;;  %v7703_v12 = vadd.f32 %v7523_v9, %v2683_v62   ;;  %5702 = vpow2.f32 %v4534_v32 }
 0x2ad   : > { %v5679_v17 = vpop.eup %5678  ;;  %2771 = vst [vmem:[%s7615_s16 + $0x30] sm:$0xff] %v7699_v5  ;;  %v2507_v48 = vadd.f32 1.0, %v5677_v40  ;;  %5704 = vpow2.f32 %v4520_v52 }
 0x2ae   : > { %v5681_v29 = vpop.eup %5680  ;;  %5706 = vtanh.f32 %v7703_v12  ;;  %v2630_v35 = vadd.f32 1.0, %v5679_v17 }
 0x2af   : > { %v5683_v47 = vpop.eup %5682  ;;  %v7710_v59 = vmul.f32 %v5681_v29, %v7663_v59   ;;  %5708 = vrcp.f32 %v2507_v48 }
 0x2b0   : > { %v5685_v9 = vpop.eup %5684  ;;  %v2684_v28 = vmul.f32 %v6137_v50, %v5683_v47  ;;  %5710 = vrcp.f32 %v2630_v35 }
 0x2b1   : > { %v5687_v1 = vpop.eup %5686  ;;  %2772 = vst [vmem:[%s7615_s16 + $0x38] sm:$0xff] %v7710_v59  ;;  %v2508_v16 = vadd.f32 1.0, %v5685_v9  ;;  %5712 = vpow2.f32 %v4535_v44 }
 0x2b2   : > { %v5689_v43 = vpop.eup %5688  ;;  %v7717_v50 = vadd.f32 %v7527_v61, %v2684_v28   ;;  %v2631_v54 = vadd.f32 1.0, %v5687_v1  ;;  %5714 = vpow2.f32 %v4536_v57 }
 0x2b3   : > { %v5691_v10 = vpop.eup %5690  ;;  %v7719_v61 = vmul.f32 %v5689_v43, %v5675_v39   ;;  %5716 = vrcp.f32 %v2508_v16 }
 0x2b4   : > { %v5693_v0 = vpop.eup %5692  ;;  %5718 = vtanh.f32 %v7717_v50  ;;  %v2685_v27 = vmul.f32 %v6133_v23, %v5691_v10 }
 0x2b5   : > { %v5695_v32 = vpop.eup %5694  ;;  %2773 = vst [vmem:[%s7615_s16 + $0x40] sm:$0xff] %v7719_v61  ;;  %5720 = vrcp.f32 %v2631_v54  ;;  %v2509_v56 = vadd.f32 1.0, %v5693_v0 }
 0x2b6   : > { %v5697_v22 = vpop.eup %5696  ;;  %v7727_v23 = vadd.f32 %v7532_v19, %v2685_v27   ;;  %5722 = vpow2.f32 %v4537_v31 }
 0x2b7   : > { %v5699_v52 = vpop.eup %5698  ;;  %v7729_v16 = vmul.f32 %v5697_v22, %v5695_v32   ;;  %5724 = vrcp.f32 %v2509_v56 }
 0x2b8   : > { %v5701_v58 = vpop.eup %5700  ;;  %5726 = vtanh.f32 %v7727_v23  ;;  %v2686_v62 = vmul.f32 %v6129_v46, %v5699_v52 }
 0x2b9   : > { %v5703_v21 = vpop.eup %5702  ;;  %2774 = vst [vmem:[%s7615_s16 + $0x48] sm:$0xff] %v7729_v16  ;;  %5728 = vpow2.f32 %v4538_v55 }
 0x2ba   : > { %v5705_v39 = vpop.eup %5704  ;;  %v7736_v46 = vadd.f32 %v7537_v41, %v2686_v62   ;;  %v2632_v19 = vadd.f32 1.0, %v5703_v21 }
 0x2bb   : > { %v5707_v37 = vpop.eup %5706  ;;  %v2510_v40 = vadd.f32 1.0, %v5705_v39 }
 0x2bc   : > { %v5709_v17 = vpop.eup %5708  ;;  %5730 = vtanh.f32 %v7736_v46  ;;  %v7739_v58 = vmul.f32 %v5707_v37, %v5701_v58  }
 0x2bd   : > { %v5711_v48 = vpop.eup %5710  ;;  %v2687_v44 = vmul.f32 %v6125_v38, %v5709_v17  ;;  %5732 = vrcp.f32 %v2632_v19  ;;  %v8676_v17 = vmov %v7677_v20 }
 0x2be   : > { %v5713_v29 = vpop.eup %5712  ;;  %2775 = vst [vmem:[%s7615_s16 + $0x50] sm:$0xff] %v7739_v58  ;;  %5734 = vrcp.f32 %v2510_v40 }
 0x2bf   : > { %v5715_v41 = vpop.eup %5714  ;;  %v2723_v38 = vadd.f32 %v7541_v42, %v2687_v44   ;;  %v2633_v35 = vadd.f32 1.0, %v5713_v29  ;;  %v8675_v29 = vmov %v8671_v26 }
 0x2c0   : > { %v5717_v57 = vpop.eup %5716  ;;  %v2634_v18 = vadd.f32 1.0, %v5715_v41 }
 0x2c1   : > { %v5719_v47 = vpop.eup %5718  ;;  %5736 = vtanh.f32 %v2723_v38  ;;  %v2688_v9 = vmul.f32 %v6121_v25, %v5717_v57 }
 0x2c2   : > { %v5721_v28 = vpop.eup %5720  ;;  %v7746_v39 = vmul.f32 %v5719_v47, %v5711_v48   ;;  %5738 = vrcp.f32 %v2633_v35 }
 0x2c3   : > { %v5723_v7 = vpop.eup %5722  ;;  %v2724_v25 = vadd.f32 %v7545_v45, %v2688_v9   ;;  %5740 = vrcp.f32 %v2634_v18 }
 0x2c4   : > { %v5725_v1 = vpop.eup %5724  ;;  %2776 = vst [vmem:[%s7615_s16 + $0x58] sm:$0xff] %v7746_v39  ;;  %v2635_v42 = vadd.f32 1.0, %v5723_v7 }
 0x2c5   : > { %v5727_v43 = vpop.eup %5726  ;;  %5742 = vtanh.f32 %v2724_v25  ;;  %v2689_v54 = vmul.f32 %v6117_v14, %v5725_v1 }
 0x2c6   : > { %v2757_v10 = vmul.f32 %v5727_v43, %v5721_v28   ;;  %5744 = vrcp.f32 %v2635_v42  ;;  %v5729_v31 = vpop.eup %5728 }
 0x2c7   : > { %v2725_v14 = vadd.f32 %v7549_v8, %v2689_v54   ;;  %v2636_v27 = vadd.f32 1.0, %v5729_v31 }
 0x2c8   : > { %2777 = vst [vmem:[%s7615_s16 + $0x60] sm:$0xff] %v2757_v10 }
 0x2c9   : > { %v5731_v2 = vpop.eup %5730  ;;  %5746 = vtanh.f32 %v2725_v14 }
 0x2ca   : > { %v5733_v45 = vpop.eup %5732  ;;  %5748 = vrcp.f32 %v2636_v27 }
 0x2cb   : > { %v5735_v0 = vpop.eup %5734  ;;  %v2758_v32 = vmul.f32 %v5733_v45, %v5731_v2  }
 0x2cc   : > { %v2690_v56 = vmul.f32 %v6113_v24, %v5735_v0 }
 0x2cd   : > { %2778 = vst [vmem:[%s7615_s16 + $0x68] sm:$0xff] %v2758_v32  ;;  %v8673_v31 = vmov %v2758_v32 }
 0x2ce   : > { %v5737_v22 = vpop.eup %5736  ;;  %v2726_v24 = vadd.f32 %v7552_v4, %v2690_v56   ;;  %v8674_v4 = vmov %v2757_v10 }
 0x2cf   : > { %v5739_v52 = vpop.eup %5738 }
 0x2d0   : > { %5750 = vtanh.f32 %v2726_v24  ;;  %v2759_v18 = vmul.f32 %v5739_v52, %v5737_v22   ;;  %v5741_v8 = vpop.eup %5740 }
 0x2d2   : > { %v5743_v55 = vpop.eup %5742  ;;  %2779 = vst [vmem:[%s7615_s16 + $0x70] sm:$0xff] %v2759_v18 }
 0x2d3   : > { %v2760_v56 = vmul.f32 %v5743_v55, %v5741_v8   ;;  %v5745_v62 = vpop.eup %5744 }
 0x2d5   : > { %2780 = vst [vmem:[%s7615_s16 + $0x78] sm:$0xff] %v2760_v56 }
 0x2d6   : > { %v5747_v21 = vpop.eup %5746 }
 0x2d7   : > { %v2761_v54 = vmul.f32 %v5747_v21, %v5745_v62   ;;  %v5749_v19 = vpop.eup %5748  ;;  %v8677_v62 = vmov %v7645_v3  ;;  %v8678_v3 = vmov %v7627_v30 }
 0x2d9   : > { %2781 = vst [vmem:[%s7615_s16 + $0x80] sm:$0xff] %v2761_v54 }
 0x2dc   :  { %1312 = sbr.rel (!%p7764_p1) target bundleno = 305 (0x131), region = 119 }
 0x2dd   : > { %v5751_v37 = vpop.eup %5750 }
 0x2de   : > { %v2762_v27 = vmul.f32 %v5751_v37, %v5749_v19  }
 0x2e0   : > { %2782 = vst [vmem:[%s7615_s16 + $0x88] sm:$0xff] %v2762_v27 }
 0x2e1 LB: > { %v6341_v20 = vmov 0   ;;  %v5756_v15 = vld [vmem:[%s8661_s4 + $0x4] ss:$8 sps:$4 sm:$0xff]   ;;  %s2807_s0 = smul.u32 144, %s6261_s19  ;;  %v2850_v36 = vld [vmem:[%s8662_s5 + $0x70] sm:$0xff]  ;;  %v2851_v53 = vld [vmem:[%s8662_s5 + $0x78] sm:$0xff]  ;;  %s6261_s19 = sphi %s7872_s19, %s2788_s19  }
 0x2e2   : > { %3053 = vmatprep.subr.bf16.mxu0 %v6341_v20  ;;  %5752 = vset.pattern.permute.xlu0 %v6341_v20  ;;  %v2848_v13 = vld [vmem:[%s8662_s5 + $0x60] sm:$0xff]  ;;  %v2849_v6 = vld [vmem:[%s8662_s5 + $0x68] sm:$0xff]  ;;  %v2846_v61 = vld [vmem:[%s8662_s5 + $0x50] sm:$0xff] }
 0x2e3   : > { %5753 = vset.pattern.permute.xlu1 %v6341_v20  ;;  %3195 = vmatprep.subr.bf16.mxu1 %v6341_v20  ;;  %s7886_s2 = scalar_lea.vmem [#allocation3], %s2807_s0  ;;  %v2847_v30 = vld [vmem:[%s8662_s5 + $0x58] sm:$0xff]  ;;  %v2844_v26 = vld [vmem:[%s8662_s5 + $0x40] sm:$0xff]  ;;  %v2845_v5 = vld [vmem:[%s8662_s5 + $0x48] sm:$0xff] }
 0x2e4   : > { %4557 = vmatprep.mubr.msk.bf16.mxu0 %vm1829_vm2, %v5756_v15  ;;  %2926 = vperm.xlu0 %5752, %v2850_v36   ;;  %v2842_v40 = vld [vmem:[%s8662_s5 + $0x30] sm:$0xff]  ;;  %v2843_v17 = vld [vmem:[%s8662_s5 + $0x38] sm:$0xff]  ;;  %v2840_v41 = vld [vmem:[%s8662_s5 + $0x20] sm:$0xff] }
 0x2e5   : > { %2916 = vperm.xlu1 %5753, %v2848_v13   ;;  %v2841_v35 = vld [vmem:[%s8662_s5 + $0x28] sm:$0xff]  ;;  %v2838_v9 = vld [vmem:[%s8662_s5 + $0x10] sm:$0xff]  ;;  %v2839_v28 = vld [vmem:[%s8662_s5 + $0x18] sm:$0xff] }
 0x2e6   : > { %v5754_v7 = vld [vmem:[%s8661_s4] ss:$8 sps:$4 sm:$0xff]   ;;  %v5757_v1 = vld [vmem:[%s8661_s4 + $0x14] ss:$8 sps:$4 sm:$0xff]   ;;  %v5759_v31 = vld [vmem:[%s8661_s4 + $0x10] ss:$8 sps:$4 sm:$0xff]  }
 0x2e7   : > { %v2823_v24 = vld [vmem:[%s7886_s2 + $0x70] sm:$0xff]  ;;  %v2824_v14 = vld [vmem:[%s7886_s2 + $0x78] sm:$0xff]  ;;  %v2821_v25 = vld [vmem:[%s7886_s2 + $0x60] sm:$0xff] }
 0x2e8   : > { %v2834_v38 = vpack.c.bf16 %v2824_v14, %v2823_v24  ;;  %v2822_v46 = vld [vmem:[%s7886_s2 + $0x68] sm:$0xff]  ;;  %v2819_v50 = vld [vmem:[%s7886_s2 + $0x50] sm:$0xff]  ;;  %v2820_v12 = vld [vmem:[%s7886_s2 + $0x58] sm:$0xff]  ;;  %2931 = vperm.xlu0 %5752, %v2851_v53  }
 0x2e9   : > { %v2833_v23 = vpack.c.bf16 %v2822_v46, %v2821_v25  ;;  %v2832_v51 = vpack.c.bf16 %v2820_v12, %v2819_v50  ;;  %v2817_v60 = vld [vmem:[%s7886_s2 + $0x40] sm:$0xff]  ;;  %v2818_v63 = vld [vmem:[%s7886_s2 + $0x48] sm:$0xff]  ;;  %v2815_v49 = vld [vmem:[%s7886_s2 + $0x30] sm:$0xff]  ;;  %2921 = vperm.xlu1 %5753, %v2849_v6  }
 0x2ea   : > { %3054 = vmatpush1.bf16.msra.mxu0 %v2834_v38  ;;  %v2831_v33 = vpack.c.bf16 %v2818_v63, %v2817_v60  ;;  %v2816_v11 = vld [vmem:[%s7886_s2 + $0x38] sm:$0xff]  ;;  %v2813_v34 = vld [vmem:[%s7886_s2 + $0x20] sm:$0xff]  ;;  %v2814_v3 = vld [vmem:[%s7886_s2 + $0x28] sm:$0xff] }
 0x2eb   : > { %3055 = vmatprep.subr.bf16.mxu0 %v6341_v20  ;;  %v2830_v4 = vpack.c.bf16 %v2816_v11, %v2815_v49  ;;  %v2829_v59 = vpack.c.bf16 %v2814_v3, %v2813_v34  ;;  %v2811_v16 = vld [vmem:[%s7886_s2 + $0x10] sm:$0xff]  ;;  %v2812_v58 = vld [vmem:[%s7886_s2 + $0x18] sm:$0xff]  ;;  %v2809_v48 = vld [vmem:[%s7886_s2] sm:$0xff] }
 0x2ec   : > { %2906 = vperm.xlu0 %5752, %v2846_v61   ;;  %v2828_v39 = vpack.c.bf16 %v2812_v58, %v2811_v16  ;;  %v2810_v44 = vld [vmem:[%s7886_s2 + $0x8] sm:$0xff]  ;;  %v2825_v57 = vld [vmem:[%s7886_s2 + $0x80] sm:$0xff]  ;;  %v5763_v0 = vld [vmem:[%s8661_s4 + $0x34] ss:$8 sps:$4 sm:$0xff]  }
 0x2ed   : > { %2911 = vperm.xlu1 %5753, %v2847_v30   ;;  %v2827_v29 = vpack.c.bf16 %v2810_v44, %v2809_v48  ;;  %v2826_v18 = vld [vmem:[%s7886_s2 + $0x88] sm:$0xff]  ;;  %v2836_v42 = vld [vmem:[%s8662_s5] sm:$0xff]  ;;  %v5765_v32 = vld [vmem:[%s8661_s4 + $0x30] ss:$8 sps:$4 sm:$0xff]   ;;  %s4569_s2 = sshll.u32 %s6261_s19, 3  ;;  %s2788_s19 = sadd.s32 1, %s6261_s19  }
 0x2ee   : > { %3056 = vmatpush1.bf16.msra.mxu0 %v2833_v23  ;;  %v2835_v47 = vpack.c.bf16 %v2826_v18, %v2825_v57  ;;  %v2837_v43 = vld [vmem:[%s8662_s5 + $0x8] sm:$0xff]  ;;  %v2852_v54 = vld [vmem:[%s8662_s5 + $0x80] sm:$0xff]  ;;  %v5769_v22 = vld [vmem:[%s8661_s4 + $0x54] ss:$8 sps:$4 sm:$0xff]   ;;  %s3236_s30 = scalar_lea.vmem [#allocation4], %s4569_s2  ;;  %p2785_p2 = scmp.ge.s32.totalorder %s2788_s19, 17  }
 0x2ef   : > { %3057 = vmatprep.subr.bf16.mxu0 %v6341_v20  ;;  %v2853_v10 = vld [vmem:[%s8662_s5 + $0x88] sm:$0xff]  ;;  %v5771_v52 = vld [vmem:[%s8661_s4 + $0x50] ss:$8 sps:$4 sm:$0xff]   ;;  %v5775_v62 = vld [vmem:[%s8661_s4 + $0x74] ss:$8 sps:$4 sm:$0xff]   ;;  %vm3374_vm3 = vcmask (%p2785_p2), 1045504  }
 0x2f0   : > { %2896 = vperm.xlu0 %5752, %v2844_v26   ;;  %v5760_v2 = vld [vmem:[%s8661_s4 + $0x24] ss:$8 sps:$4 sm:$0xff]   ;;  %v5762_v45 = vld [vmem:[%s8661_s4 + $0x20] ss:$8 sps:$4 sm:$0xff]   ;;  %v5777_v21 = vld [vmem:[%s8661_s4 + $0x70] ss:$8 sps:$4 sm:$0xff]  }
 0x2f1   : > { %2901 = vperm.xlu1 %5753, %v2845_v5   ;;  %v5766_v27 = vld [vmem:[%s8661_s4 + $0x44] ss:$8 sps:$4 sm:$0xff]   ;;  %v5768_v56 = vld [vmem:[%s8661_s4 + $0x40] ss:$8 sps:$4 sm:$0xff]  }
 0x2f2   : > { %3058 = vmatpush1.bf16.msra.mxu0 %v2832_v51  ;;  %v5772_v8 = vld [vmem:[%s8661_s4 + $0x64] ss:$8 sps:$4 sm:$0xff]   ;;  %v5774_v55 = vld [vmem:[%s8661_s4 + $0x60] ss:$8 sps:$4 sm:$0xff]  }
 0x2f3   : > { %3059 = vmatprep.subr.bf16.mxu0 %v6341_v20  ;;  %v5778_v19 = vld [vmem:[%s8661_s4 + $0x84] ss:$8 sps:$4 sm:$0xff]   ;;  %v5780_v37 = vld [vmem:[%s8661_s4 + $0x80] ss:$8 sps:$4 sm:$0xff]  }
 0x2f4   : > { %2886 = vperm.xlu0 %5752, %v2842_v40   ;;  %v8044_v51 = vld [vmem:[%s8663_s6] sm:$0x77] }
 0x2f5   : > { %2891 = vperm.xlu1 %5753, %v2843_v17   ;;  %v4567_v60 = vcombine.high %v8044_v51, %v8044_v51 }
 0x2f6   : > { %3060 = vmatpush1.bf16.msra.mxu0 %v2831_v33 }
 0x2f7   : > { %3061 = vmatprep.subr.bf16.mxu0 %v6341_v20  ;;  %4568 = vmatprep.mubr.msk.bf16.mxu1 %vm1829_vm2, %v4567_v60 }
 0x2f8   : > { %2876 = vperm.xlu0 %5752, %v2840_v41  }
 0x2f9   : > { %2881 = vperm.xlu1 %5753, %v2841_v35  }
 0x2fa   : > { %3062 = vmatpush1.bf16.msra.mxu0 %v2830_v4 }
 0x2fb   : > { %3063 = vmatprep.subr.bf16.mxu0 %v6341_v20 }
 0x2fc   : > { %2866 = vperm.xlu0 %5752, %v2838_v9  }
 0x2fd   : > { %2871 = vperm.xlu1 %5753, %v2839_v28  }
 0x2fe   : > { %3064 = vmatpush1.bf16.msra.mxu0 %v2829_v59 }
 0x2ff   : > { %3065 = vmatprep.subr.bf16.mxu0 %v6341_v20 }
 0x300   : > { %2856 = vperm.xlu0 %5752, %v2836_v42  }
 0x301   : > { %2861 = vperm.xlu1 %5753, %v2837_v43  }
 0x302   : > { %3066 = vmatpush1.bf16.msra.mxu0 %v2828_v39 }
 0x303   : > { %3067 = vmatprep.subr.bf16.mxu0 %v6341_v20 }
 0x304   : > { %2936 = vperm.xlu0 %5752, %v2852_v54  }
 0x305   : > { %2941 = vperm.xlu1 %5753, %v2853_v10  }
 0x306   : > { %3068 = vmatpush1.bf16.msra.mxu0 %v2827_v29 }
 0x307   : > { %3083 = vmatprep.subr.bf16.mxu0 %v6341_v20 }
 0x30a   : > { %3084 = vmatpush2.bf16.msra.mxu0 %v2835_v47 }
 0x30d   : > { %3086 = vmatmul.mubr.bf16.vlgmr.msra.gmra.mxu0 %v5754_v7 }
 0x30e   : > { %4558 = vmatprep.mubr.msk.bf16.mxu0 %vm1829_vm2, %v5757_v1 }
 0x315   : > { %3094 = vmatmul.mubr.bf16.gmra.mxu0 %v5759_v31 }
 0x316   : > { %4559 = vmatprep.mubr.msk.bf16.mxu0 %vm1829_vm2, %v5760_v2 }
 0x31d   : > { %3102 = vmatmul.mubr.bf16.gmra.mxu0 %v5762_v45 }
 0x31e   : > { %4560 = vmatprep.mubr.msk.bf16.mxu0 %vm1829_vm2, %v5763_v0 }
 0x325   : > { %3110 = vmatmul.mubr.bf16.gmra.mxu0 %v5765_v32 }
 0x326   : > { %4561 = vmatprep.mubr.msk.bf16.mxu0 %vm1829_vm2, %v5766_v27 }
 0x32d   : > { %3118 = vmatmul.mubr.bf16.gmra.mxu0 %v5768_v56 }
 0x32e   : > { %4562 = vmatprep.mubr.msk.bf16.mxu0 %vm1829_vm2, %v5769_v22 }
 0x335   : > { %3126 = vmatmul.mubr.bf16.gmra.mxu0 %v5771_v52 }
 0x336   : > { %4563 = vmatprep.mubr.msk.bf16.mxu0 %vm1829_vm2, %v5772_v8 }
 0x33d   : > { %3134 = vmatmul.mubr.bf16.gmra.mxu0 %v5774_v55 }
 0x33e   : > { %4564 = vmatprep.mubr.msk.bf16.mxu0 %vm1829_vm2, %v5775_v62 }
 0x345   : > { %3142 = vmatmul.mubr.bf16.gmra.mxu0 %v5777_v21 }
 0x346   : > { %4565 = vmatprep.mubr.msk.bf16.mxu0 %vm1829_vm2, %v5778_v19 }
 0x34d   : > { %3150 = vmatmul.mubr.bf16.gmra.mxu0 %v5780_v37 }
 0x35f   : > { %v2927_v15 = vpop.permute.xlu0 %2926 }
 0x360   : > { %v8027_v24 = vpop.permute.xlu1 %2916 }
 0x363   : > { %v8029_v14 = vpop.permute.xlu0 %2931 }
 0x364   : > { %v2922_v25 = vpop.permute.xlu1 %2921 }
 0x367   : > { %v8031_v38 = vpop.permute.xlu0 %2906 }
 0x368   : > { %v8033_v46 = vpop.permute.xlu1 %2911 }
 0x36b   : > { %v8035_v23 = vpop.permute.xlu0 %2896 }
 0x36c   : > { %v8037_v50 = vpop.permute.xlu1 %2901 }
 0x36f   : > { %v8039_v12 = vpop.permute.xlu0 %2886 }
 0x370   : > { %v8048_v63 = vpop.permute.xlu1 %2891 }
 0x373   : > { %v8051_v36 = vpop.permute.xlu0 %2876 }
 0x374   : > { %v8053_v13 = vpop.permute.xlu1 %2881 }
 0x377   : > { %v2867_v33 = vpop.permute.xlu0 %2866 }
 0x378   : > { %v2872_v53 = vpop.permute.xlu1 %2871 }
 0x37b   : > { %v2857_v6 = vpop.permute.xlu0 %2856 }
 0x37c   : > { %v2862_v4 = vpop.permute.xlu1 %2861 }
 0x3cd   : > { %v3087_v49 = vpop.f32.mrf.mxu0 }
 0x3ce   : > { %v3088_v11 = vadd.f32 %v3087_v49, %v2857_v6 }
 0x3cf   : > { %v3089_v61 = vpop.f32.mrf.mxu0 }
 0x3d0   : > { %5783 = vtanh.f32 %v3088_v11 }
 0x3d1   : > { %v3090_v30 = vpop.f32.mrf.mxu0 }
 0x3d2   : > { %v3091_v34 = vadd.f32 %v3090_v30, %v2862_v4 }
 0x3d3   : > { %v3092_v3 = vpop.f32.mrf.mxu0 }
 0x3d4   : > { %5785 = vtanh.f32 %v3091_v34 }
 0x3d5   : > { %v3095_v59 = vpop.f32.mrf.mxu0 }
 0x3d6   : > { %v3096_v26 = vadd.f32 %v3095_v59, %v2867_v33 }
 0x3d7   : > { %v3097_v5 = vpop.f32.mrf.mxu0 }
 0x3d8   : > { %5787 = vtanh.f32 %v3096_v26  ;;  %v2942_v5 = vpop.permute.xlu1 %2941 }
 0x3d9   : > { %v3098_v16 = vpop.f32.mrf.mxu0 }
 0x3da   : > { %v3099_v58 = vadd.f32 %v3098_v16, %v2872_v53 }
 0x3db   : > { %v3100_v39 = vpop.f32.mrf.mxu0 }
 0x3dc   : > { %5789 = vtanh.f32 %v3099_v58  ;;  %v2937_v39 = vpop.permute.xlu0 %2936 }
 0x3dd   : > { %v3103_v40 = vpop.f32.mrf.mxu0  ;;  %v8055_v48 = vpop.eup %5783 }
 0x3df   : > { %v3105_v17 = vpop.f32.mrf.mxu0 }
 0x3e1   : > { %v8057_v44 = vpop.eup %5785  ;;  %v3106_v29 = vpop.f32.mrf.mxu0 }
 0x3e2   : > { %v3177_v41 = vpack.c.bf16 %v8057_v44, %v8055_v48  ;;  %v3107_v30 = vadd.f32 %v3106_v29, %v8053_v13  ;;  %v6342_v48 = vmov (%p2785_p2), 0   ;;  %v3257_v44 = vld [vmem:[%s8665_s8 + $0x10] sm:$0x3f] (%p2785_p2) }
 0x3e3   : > { %v3108_v35 = vpop.f32.mrf.mxu0  ;;  %5820 = vset.pattern.permute.xlu1 (%p2785_p2), %v6342_v48  ;;  %5819 = vset.pattern.permute.xlu0 (%p2785_p2), %v6342_v48 }
 0x3e5   : > { %v3111_v57 = vpop.f32.mrf.mxu0  ;;  %v8061_v47 = vpop.eup %5787 }
 0x3e6   : > { %v3112_v4 = vadd.f32 %v3111_v57, %v8039_v12 }
 0x3e7   : > { %v3113_v18 = vpop.f32.mrf.mxu0 }
 0x3e9   : > { %v8063_v9 = vpop.eup %5789  ;;  %v3114_v28 = vpop.f32.mrf.mxu0 }
 0x3ea   : > { %v3178_v7 = vpack.c.bf16 %v8063_v9, %v8061_v47  ;;  %v3115_v61 = vadd.f32 %v3114_v28, %v8048_v63 }
 0x3eb   : > { %v3116_v1 = vpop.f32.mrf.mxu0 }
 0x3ed   : > { %v3119_v42 = vpop.f32.mrf.mxu0 }
 0x3ef   : > { %v3121_v43 = vpop.f32.mrf.mxu0 }
 0x3f0   : > { %v4566_v43 = vcombine.low %v8044_v51, %v8044_v51  ;;  %v3255_v51 = vld [vmem:[%s8665_s8] sm:$0x3f] (%p2785_p2) }
 0x3f1   : > { %v3122_v54 = vpop.f32.mrf.mxu0  ;;  %3274 = vperm.xlu0 (%p2785_p2), %5819, %v3255_v51  }
 0x3f3   : > { %v3124_v10 = vpop.f32.mrf.mxu0 }
 0x3f4   :  { %v3260_v10 = vld [vmem:[%s8665_s8 + $0x28] sm:$0x3f] (%p2785_p2) }
 0x3f5   : > { %v3127_v31 = vpop.f32.mrf.mxu0 }
 0x3f6   : > { %v3128_v49 = vadd.f32 %v3127_v31, %v8031_v38  ;;  %v3258_v31 = vld [vmem:[%s8665_s8 + $0x18] sm:$0x3f] (%p2785_p2) }
 0x3f7   : > { %v3129_v2 = vpop.f32.mrf.mxu0 }
 0x3f8   :  { %v3262_v2 = vld [vmem:[%s8665_s8 + $0x38] sm:$0x3f] (%p2785_p2) }
 0x3f9   : > { %v3130_v45 = vpop.f32.mrf.mxu0 }
 0x3fa   : > { %v3131_v53 = vadd.f32 %v3130_v45, %v8033_v46  ;;  %v3261_v45 = vld [vmem:[%s8665_s8 + $0x30] sm:$0x3f] (%p2785_p2) }
 0x3fb   : > { %v3132_v0 = vpop.f32.mrf.mxu0 }
 0x3fc   :  { %v3264_v0 = vld [vmem:[%s8665_s8 + $0x48] sm:$0x3f] (%p2785_p2) }
 0x3fd   : > { %v3135_v32 = vpop.f32.mrf.mxu0 }
 0x3fe   : > { %v3136_v60 = vadd.f32 %v3135_v32, %v8027_v24  ;;  %v3263_v32 = vld [vmem:[%s8665_s8 + $0x40] sm:$0x3f] (%p2785_p2) }
 0x3ff   : > { %v3137_v27 = vpop.f32.mrf.mxu0 }
 0x400   :  { %v3266_v27 = vld [vmem:[%s8665_s8 + $0x58] sm:$0x3f] (%p2785_p2) }
 0x401   : > { %v3138_v56 = vpop.f32.mrf.mxu0 }
 0x402   : > { %v3139_v21 = vadd.f32 %v3138_v56, %v2922_v25  ;;  %v3265_v56 = vld [vmem:[%s8665_s8 + $0x50] sm:$0x3f] (%p2785_p2) }
 0x403   : > { %v3140_v22 = vpop.f32.mrf.mxu0 }
 0x404   :  { %v3268_v22 = vld [vmem:[%s8665_s8 + $0x68] sm:$0x3f] (%p2785_p2) }
 0x405   : > { %v3143_v52 = vpop.f32.mrf.mxu0 }
 0x406   : > { %v3144_v8 = vadd.f32 %v3143_v52, %v2927_v15  ;;  %v3123_v15 = vadd.f32 %v3122_v54, %v8037_v50  ;;  %v3104_v50 = vadd.f32 %v3103_v40, %v8051_v36  ;;  %v3267_v52 = vld [vmem:[%s8665_s8 + $0x60] sm:$0x3f] (%p2785_p2) }
 0x407   : > { %v3145_v55 = vpop.f32.mrf.mxu0 }
 0x408   : > { %5791 = vtanh.f32 %v3144_v8  ;;  %v3270_v8 = vld [vmem:[%s8665_s8 + $0x78] sm:$0x3f] (%p2785_p2)  ;;  %v3269_v55 = vld [vmem:[%s8665_s8 + $0x70] sm:$0x3f] (%p2785_p2) }
 0x409   : > { %v3146_v62 = vpop.f32.mrf.mxu0 }
 0x40a   : > { %v3147_v19 = vadd.f32 %v3146_v62, %v8029_v14  ;;  %v3120_v14 = vadd.f32 %v3119_v42, %v8035_v23  ;;  %v3271_v62 = vld [vmem:[%s8665_s8 + $0x80] sm:$0x3f] (%p2785_p2) }
 0x40b   : > { %v3148_v37 = vpop.f32.mrf.mxu0 }
 0x40c   : > { %5793 = vtanh.f32 %v3147_v19 }
 0x40d   : > { %v3151_v33 = vpop.f32.mrf.mxu0  ;;  %5795 = vtanh.f32 %v3139_v21 }
 0x40e   : > { %5797 = vtanh.f32 %v3136_v60  ;;  %v3152_v40 = vadd.f32 %v3151_v33, %v2937_v39 }
 0x40f   : > { %v3153_v6 = vpop.f32.mrf.mxu0  ;;  %5799 = vtanh.f32 %v3131_v53 }
 0x410   : > { %5801 = vtanh.f32 %v3128_v49 }
 0x411   : > { %v3154_v11 = vpop.f32.mrf.mxu0  ;;  %5803 = vtanh.f32 %v3123_v15 }
 0x412   : > { %5805 = vtanh.f32 %v3120_v14  ;;  %v3155_v36 = vadd.f32 %v3154_v11, %v2942_v5 }
 0x413   : > { %v3156_v25 = vpop.f32.mrf.mxu0  ;;  %5807 = vtanh.f32 %v3115_v61 }
 0x414   : > { %5809 = vtanh.f32 %v3112_v4 }
 0x415   : > { %v5792_v24 = vpop.eup %5791  ;;  %5811 = vtanh.f32 %v3107_v30 }
 0x416   : > { %5813 = vtanh.f32 %v3104_v50 }
 0x417   : > { %5815 = vtanh.f32 %v3155_v36 }
 0x418   : > { %5817 = vtanh.f32 %v3152_v40 }
 0x419   : > { %v5794_v46 = vpop.eup %5793 }
 0x41a   : > { %v3184_v38 = vpack.c.bf16 %v5794_v46, %v5792_v24  ;;  %v5796_v34 = vpop.eup %5795 }
 0x41b   : > { %v5798_v3 = vpop.eup %5797 }
 0x41c   : > { %3196 = vmatpush1.bf16.msra.mxu1 %v3184_v38  ;;  %v3183_v23 = vpack.c.bf16 %v5796_v34, %v5798_v3  ;;  %v5800_v63 = vpop.eup %5799 }
 0x41d   : > { %3197 = vmatprep.subr.bf16.mxu1 %v6341_v20  ;;  %v5802_v12 = vpop.eup %5801 }
 0x41e   : > { %v3182_v59 = vpack.c.bf16 %v5800_v63, %v5802_v12  ;;  %v5804_v13 = vpop.eup %5803 }
 0x41f   : > { %v5806_v26 = vpop.eup %5805 }
 0x420   : > { %3198 = vmatpush1.bf16.msra.mxu1 %v3183_v23  ;;  %v3181_v16 = vpack.c.bf16 %v5804_v13, %v5806_v26  ;;  %v5808_v58 = vpop.eup %5807 }
 0x421   : > { %3199 = vmatprep.subr.bf16.mxu1 %v6341_v20  ;;  %v5810_v17 = vpop.eup %5809 }
 0x422   : > { %v3180_v29 = vpack.c.bf16 %v5808_v58, %v5810_v17  ;;  %v5812_v35 = vpop.eup %5811 }
 0x423   : > { %v5814_v57 = vpop.eup %5813 }
 0x424   : > { %3200 = vmatpush1.bf16.msra.mxu1 %v3182_v59  ;;  %v3179_v18 = vpack.c.bf16 %v5812_v35, %v5814_v57  ;;  %v5816_v28 = vpop.eup %5815 }
 0x425   : > { %3201 = vmatprep.subr.bf16.mxu1 %v6341_v20  ;;  %v5818_v1 = vpop.eup %5817 }
 0x426   : > { %v3185_v42 = vpack.c.bf16 %v5816_v28, %v5818_v1 }
 0x428   : > { %3202 = vmatpush1.bf16.msra.mxu1 %v3181_v16 }
 0x429   : > { %3203 = vmatprep.subr.bf16.mxu1 %v6341_v20 }
 0x42c   : > { %3204 = vmatpush1.bf16.msra.mxu1 %v3180_v29 }
 0x42d   : > { %3205 = vmatprep.subr.bf16.mxu1 %v6341_v20 }
 0x430   : > { %3206 = vmatpush1.bf16.msra.mxu1 %v3179_v18 }
 0x431   : > { %3207 = vmatprep.subr.bf16.mxu1 %v6341_v20 }
 0x434   : > { %3208 = vmatpush1.bf16.msra.mxu1 %v3178_v7 }
 0x435   : > { %3209 = vmatprep.subr.bf16.mxu1 %v6341_v20 }
 0x438   : > { %3210 = vmatpush1.bf16.msra.mxu1 %v3177_v41  ;;  %v3259_v41 = vld [vmem:[%s8665_s8 + $0x20] sm:$0x3f] (%p2785_p2) }
 0x439   : > { %3225 = vmatprep.subr.bf16.mxu1 %v6341_v20  ;;  %v3256_v20 = vld [vmem:[%s8665_s8 + $0x8] sm:$0x3f] (%p2785_p2)  ;;  %3294 = vperm.xlu0 (%p2785_p2), %5819, %v3259_v41   ;;  %s8319_s8 = smov (%p2785_p2), 0  }
 0x43a   :  { %3279 = vperm.xlu1 (%p2785_p2), %5820, %v3256_v20  }
 0x43c   : > { %3226 = vmatpush2.bf16.msra.mxu1 %v3185_v42 }
 0x43d   :  { %3289 = vperm.xlu0 (%p2785_p2), %5819, %v3258_v31  }
 0x43e   :  { %3284 = vperm.xlu1 (%p2785_p2), %5820, %v3257_v44  }
 0x43f   : > { %3228 = vmatmul.mubr.bf16.vlgmr.msra.gmra.mxu1 %v4566_v43 }
 0x441   :  { %3304 = vperm.xlu0 (%p2785_p2), %5819, %v3261_v45  }
 0x442   :  { %3299 = vperm.xlu1 (%p2785_p2), %5820, %v3260_v10  }
 0x445   :  { %3314 = vperm.xlu0 (%p2785_p2), %5819, %v3263_v32  }
 0x446   :  { %3309 = vperm.xlu1 (%p2785_p2), %5820, %v3262_v2  }
 0x449   :  { %3324 = vperm.xlu0 (%p2785_p2), %5819, %v3265_v56  }
 0x44a   :  { %3319 = vperm.xlu1 (%p2785_p2), %5820, %v3264_v0  }
 0x44d   :  { %3334 = vperm.xlu0 (%p2785_p2), %5819, %v3267_v52  }
 0x44e   :  { %3329 = vperm.xlu1 (%p2785_p2), %5820, %v3266_v27  }
 0x451   :  { %3344 = vperm.xlu0 (%p2785_p2), %5819, %v3269_v55  }
 0x452   :  { %3339 = vperm.xlu1 (%p2785_p2), %5820, %v3268_v22  }
 0x455   :  { %3354 = vperm.xlu0 (%p2785_p2), %5819, %v3271_v62  }
 0x456   :  { %3349 = vperm.xlu1 (%p2785_p2), %5820, %v3270_v8  }
 0x46c   :  { %v3275_v19 = vpop.permute.xlu0 (%p2785_p2), %3274 }
 0x4b4   :  { %v3295_v60 = vpop.permute.xlu0 (%p2785_p2), %3294 }
 0x4b5   :  { %v3280_v21 = vpop.permute.xlu1 (%p2785_p2), %3279 }
 0x4b8   :  { %v3290_v53 = vpop.permute.xlu0 (%p2785_p2), %3289 }
 0x4b9   :  { %v3285_v37 = vpop.permute.xlu1 (%p2785_p2), %3284 }
 0x4bc   :  { %v3305_v49 = vpop.permute.xlu0 (%p2785_p2), %3304 }
 0x4bd   :  { %v3300_v33 = vpop.permute.xlu1 (%p2785_p2), %3299 }
 0x4c0   :  { %v3315_v15 = vpop.permute.xlu0 (%p2785_p2), %3314 }
 0x4c1   :  { %v3310_v6 = vpop.permute.xlu1 (%p2785_p2), %3309 }
 0x4c4   :  { %v3325_v38 = vpop.permute.xlu0 (%p2785_p2), %3324 }
 0x4c5   :  { %v3320_v11 = vpop.permute.xlu1 (%p2785_p2), %3319 }
 0x4c8   :  { %v3335_v29 = vpop.permute.xlu0 (%p2785_p2), %3334 }
 0x4c9   :  { %v3330_v30 = vpop.permute.xlu1 (%p2785_p2), %3329 }
 0x4cc   :  { %v3345_v45 = vpop.permute.xlu0 (%p2785_p2), %3344 }
 0x4cd   :  { %v3340_v17 = vpop.permute.xlu1 (%p2785_p2), %3339 }
 0x4d1   :  { %v3350_v2 = vpop.permute.xlu1 (%p2785_p2), %3349 }
 0x4ff   : > { %v3229_v54 = vpop.f32.mrf.mxu1 }
 0x500   : > { %3237 = vst [vmem:[%s3236_s30] sm:$0x3f] %v3229_v54 }
 0x501   : > { %v3231_v47 = vpop.f32.mrf.mxu1  ;;  %2787 = sbr.rel (!%p2785_p2) target bundleno = 737 (0x2e1), region = 130 }
 0x503   : > { %v3232_v9 = vpop.f32.mrf.mxu1 }
 0x505   : > { %v3233_v7 = vpop.f32.mrf.mxu1 }
 0x507   :  { %v3238_v25 = vld [vmem:[#allocation4] sm:$0x3f]  ;;  %v3240_v14 = vld [vmem:[#allocation4 + $0x10] sm:$0x3f]  ;;  %v3243_v24 = vld [vmem:[#allocation4 + $0x28] sm:$0x3f] }
 0x508   :  { %v3242_v61 = vld [vmem:[#allocation4 + $0x20] sm:$0x3f]  ;;  %v3245_v4 = vld [vmem:[#allocation4 + $0x38] sm:$0x3f]  ;;  %v3244_v46 = vld [vmem:[#allocation4 + $0x30] sm:$0x3f]  ;;  %v8150_v23 = vadd.f32 %v3275_v19, %v3238_v25  ;;  %v8152_v63 = vadd.f32 %v3285_v37, %v3240_v14  ;;  %v8160_v36 = vadd.f32 %v3300_v33, %v3243_v24 }
 0x509   :  { %v3241_v34 = vld [vmem:[#allocation4 + $0x18] sm:$0x3f]  ;;  %v3246_v50 = vld [vmem:[#allocation4 + $0x40] sm:$0x3f]  ;;  %v8154_v12 = vadd.f32 %v3295_v60, %v3242_v61  ;;  %v3248_v59 = vld [vmem:[#allocation4 + $0x50] sm:$0x3f]  ;;  %v8156_v26 = vadd.f32 %v3310_v6, %v3245_v4  ;;  %v8158_v5 = vadd.f32 %v3305_v49, %v3244_v46 }
 0x50a   :  { %v3249_v3 = vld [vmem:[#allocation4 + $0x58] sm:$0x3f]  ;;  %v3239_v13 = vld [vmem:[#allocation4 + $0x8] sm:$0x3f]  ;;  %v8162_v16 = vadd.f32 %v3290_v53, %v3241_v34  ;;  %v8164_v39 = vadd.f32 %v3315_v15, %v3246_v50  ;;  %v3250_v35 = vld [vmem:[#allocation4 + $0x60] sm:$0x3f]  ;;  %v8168_v57 = vadd.f32 %v3325_v38, %v3248_v59 }
 0x50b   :  { %v3247_v58 = vld [vmem:[#allocation4 + $0x48] sm:$0x3f]  ;;  %v8166_v40 = vadd.f32 %v3330_v30, %v3249_v3  ;;  %v3253_v28 = vld [vmem:[#allocation4 + $0x78] sm:$0x3f]  ;;  %v3358_v1 = vadd.f32 %v3280_v21, %v3239_v13  ;;  %v3375_v42 = vsel %vm3374_vm3, %v8150_v23, -inf  ;;  %v3377_v43 = vsel %vm3374_vm3, %v8152_v63, -inf }
 0x50c   :  { %v3251_v18 = vld [vmem:[#allocation4 + $0x68] sm:$0x3f]  ;;  %v3379_v54 = vsel %vm3374_vm3, %v8154_v12, -inf  ;;  %v3252_v47 = vld [vmem:[#allocation4 + $0x70] sm:$0x3f]  ;;  %v3385_v9 = vsel %vm3374_vm3, %v8156_v26, -inf  ;;  %v8180_v20 = vadd.f32 %v3320_v11, %v3247_v58  ;;  %v8182_v51 = vadd.f32 %v3335_v29, %v3250_v35  ;;  %v3355_v11 = vpop.permute.xlu0 %3354 }
 0x50d   :  { %v3383_v7 = vsel %vm3374_vm3, %v8158_v5, -inf  ;;  %v3381_v44 = vsel %vm3374_vm3, %v8160_v36, -inf  ;;  %v3378_v41 = vsel %vm3374_vm3, %v8162_v16, -inf  ;;  %v3387_v10 = vsel %vm3374_vm3, %v8164_v39, -inf  ;;  %v3254_v62 = vld [vmem:[#allocation4 + $0x80] sm:$0x3f] }
 0x50e   :  { %v3393_v31 = vsel %vm3374_vm3, %v8166_v40, -inf  ;;  %v3391_v0 = vsel %vm3374_vm3, %v8168_v57, -inf  ;;  %v8194_v32 = vadd.f32 %v3340_v17, %v3251_v18  ;;  %v8196_v27 = vadd.f32 %v3350_v2, %v3253_v28 }
 0x50f   :  { %v8198_v56 = vadd.f32 %v3345_v45, %v3252_v47  ;;  %v3376_v22 = vsel %vm3374_vm3, %v3358_v1, -inf  ;;  %v3380_v52 = vmax.f32 %v3375_v42, %v3379_v54  ;;  %v3386_v8 = vmax.f32 %v3378_v41, %v3385_v9 }
 0x510   :  { %v3384_v55 = vmax.f32 %v3377_v43, %v3383_v7  ;;  %v3389_v21 = vsel %vm3374_vm3, %v8180_v20, -inf  ;;  %v3395_v19 = vsel %vm3374_vm3, %v8182_v51, -inf  ;;  %v3401_v37 = vsel %vm3374_vm3, %v8196_v27, -inf }
 0x511   :  { %v3399_v60 = vsel %vm3374_vm3, %v8198_v56, -inf  ;;  %v3382_v33 = vmax.f32 %v3376_v22, %v3381_v44  ;;  %v3388_v53 = vmax.f32 %v3380_v52, %v3387_v10  ;;  %v3394_v6 = vmax.f32 %v3386_v8, %v3393_v31 }
 0x512   :  { %v3392_v49 = vmax.f32 %v3384_v55, %v3391_v0  ;;  %v3397_v15 = vsel %vm3374_vm3, %v8194_v32, -inf  ;;  %v8211_v25 = vadd.f32 %v3355_v11, %v3254_v62 }
 0x513   :  { %v3390_v14 = vmax.f32 %v3382_v33, %v3389_v21  ;;  %v3396_v61 = vmax.f32 %v3388_v53, %v3395_v19  ;;  %v3402_v24 = vmax.f32 %v3394_v6, %v3401_v37 }
 0x514   :  { %v3400_v4 = vmax.f32 %v3392_v49, %v3399_v60  ;;  %v3403_v46 = vsel %vm3374_vm3, %v8211_v25, -inf }
 0x515   :  { %v3398_v30 = vmax.f32 %v3390_v14, %v3397_v15  ;;  %v3404_v38 = vmax.f32 %v3396_v61, %v3403_v46 }
 0x516   :  { %v3406_v34 = vmax.f32 %v3400_v4, %v3402_v24 }
 0x517   :  { %v3405_v50 = vmax.f32 %v3404_v38, %v3398_v30 }
 0x519   :  { %v8215_v3 = vmax.f32 %v3405_v50, %v3406_v34 }
 0x51b   :  { %v3408_v59 = vsub.f32 %v8150_v23, %v8215_v3  ;;  %v3409_v13 = vsub.f32 %v3358_v1, %v8215_v3  ;;  %v3410_v58 = vsub.f32 %v8152_v63, %v8215_v3  ;;  %v3411_v17 = vsub.f32 %v8162_v16, %v8215_v3 }
 0x51c   :  { %v3412_v29 = vsub.f32 %v8154_v12, %v8215_v3  ;;  %v3413_v42 = vsub.f32 %v8160_v36, %v8215_v3  ;;  %v3414_v23 = vsub.f32 %v8158_v5, %v8215_v3  ;;  %v3415_v63 = vsub.f32 %v8156_v26, %v8215_v3 }
 0x51d   :  { %v3425_v35 = vmul.f32 1.442695, %v3408_v59  ;;  %v3427_v18 = vmul.f32 1.442695, %v3409_v13  ;;  %v3429_v28 = vmul.f32 1.442695, %v3410_v58  ;;  %v3416_v12 = vsub.f32 %v8164_v39, %v8215_v3 }
 0x51e   :  { %v3431_v43 = vmul.f32 1.442695, %v3411_v17  ;;  %v3433_v1 = vmul.f32 1.442695, %v3412_v29  ;;  %v3435_v16 = vmul.f32 1.442695, %v3413_v42  ;;  %v3417_v36 = vsub.f32 %v8180_v20, %v8215_v3 }
 0x51f   :  { %5821 = vpow2.f32 %v3425_v35  ;;  %v3437_v54 = vmul.f32 1.442695, %v3414_v23  ;;  %v3439_v47 = vmul.f32 1.442695, %v3415_v63  ;;  %v3418_v5 = vsub.f32 %v8168_v57, %v8215_v3 }
 0x520   :  { %5823 = vpow2.f32 %v3427_v18  ;;  %v3441_v9 = vmul.f32 1.442695, %v3416_v12  ;;  %v3419_v26 = vsub.f32 %v8166_v40, %v8215_v3  ;;  %v3443_v7 = vmul.f32 1.442695, %v3417_v36 }
 0x521   :  { %5825 = vpow2.f32 %v3429_v28  ;;  %v3420_v39 = vsub.f32 %v8182_v51, %v8215_v3  ;;  %v3445_v41 = vmul.f32 1.442695, %v3418_v5  ;;  %v3421_v31 = vsub.f32 %v8194_v32, %v8215_v3 }
 0x522   :  { %5827 = vpow2.f32 %v3431_v43  ;;  %v3447_v40 = vmul.f32 1.442695, %v3419_v26  ;;  %v3422_v0 = vsub.f32 %v8198_v56, %v8215_v3  ;;  %v3423_v32 = vsub.f32 %v8196_v27, %v8215_v3 }
 0x523   :  { %5829 = vpow2.f32 %v3433_v1  ;;  %v3449_v22 = vmul.f32 1.442695, %v3420_v39  ;;  %v3451_v62 = vmul.f32 1.442695, %v3421_v31  ;;  %v3424_v56 = vsub.f32 %v8211_v25, %v8215_v3 }
 0x524   :  { %5831 = vpow2.f32 %v3435_v16  ;;  %v3453_v60 = vmul.f32 1.442695, %v3422_v0  ;;  %v3455_v49 = vmul.f32 1.442695, %v3423_v32 }
 0x525   :  { %5833 = vpow2.f32 %v3437_v54  ;;  %v3457_v14 = vmul.f32 1.442695, %v3424_v56  ;;  %v8291_v56 = vmov 0.0  }
 0x526   :  { %5835 = vpow2.f32 %v3439_v47 }
 0x527   :  { %5837 = vpow2.f32 %v3441_v9 }
 0x528   :  { %5839 = vpow2.f32 %v3443_v7 }
 0x529   :  { %5841 = vpow2.f32 %v3445_v41 }
 0x52a   :  { %5843 = vpow2.f32 %v3447_v40 }
 0x52b   :  { %5845 = vpow2.f32 %v3449_v22 }
 0x52c   :  { %v8240_v44 = vpop.eup %5821  ;;  %5847 = vpow2.f32 %v3451_v62 }
 0x52d   :  { %v8244_v20 = vpop.eup %5823  ;;  %v3459_v10 = vsel %vm3374_vm3, %v8240_v44, 0.0  ;;  %5849 = vpow2.f32 %v3453_v60  ;;  %v8293_v60 = vmov 0.0  }
 0x52e   :  { %v8248_v57 = vpop.eup %5825  ;;  %v3460_v2 = vsel %vm3374_vm3, %v8244_v20, 0.0  ;;  %5851 = vpow2.f32 %v3455_v49  ;;  %v8301_v49 = vmov 0.0  }
 0x52f   :  { %v8254_v45 = vpop.eup %5827  ;;  %v3461_v51 = vadd.f32 %v3460_v2, %v3459_v10  ;;  %v3462_v52 = vsel %vm3374_vm3, %v8248_v57, 0.0  ;;  %5853 = vpow2.f32 %v3457_v14  ;;  %v8309_v14 = vmov 0.0  }
 0x530   :  { %v5830_v8 = vpop.eup %5829  ;;  %v3464_v21 = vsel %vm3374_vm3, %v8254_v45, 0.0 }
 0x531   :  { %v3463_v55 = vadd.f32 %v3462_v52, %v3461_v51  ;;  %v5832_v19 = vpop.eup %5831  ;;  %v3466_v33 = vsel %vm3374_vm3, %v5830_v8, 0.0 }
 0x532   :  { %v5834_v53 = vpop.eup %5833  ;;  %v3468_v27 = vsel %vm3374_vm3, %v5832_v19, 0.0 }
 0x533   :  { %v3465_v37 = vadd.f32 %v3464_v21, %v3463_v55  ;;  %v5836_v11 = vpop.eup %5835  ;;  %v3470_v61 = vsel %vm3374_vm3, %v5834_v53, 0.0 }
 0x534   :  { %v5838_v24 = vpop.eup %5837  ;;  %v3472_v25 = vsel %vm3374_vm3, %v5836_v11, 0.0 }
 0x535   :  { %v3467_v6 = vadd.f32 %v3466_v33, %v3465_v37  ;;  %v5840_v46 = vpop.eup %5839  ;;  %v3474_v38 = vsel %vm3374_vm3, %v5838_v24, 0.0  ;;  %v8289_v37 = vmov 0.0   ;;  %v8295_v33 = vmov 0.0  }
 0x536   :  { %v5842_v34 = vpop.eup %5841  ;;  %v3476_v3 = vsel %vm3374_vm3, %v5840_v46, 0.0 }
 0x537   :  { %v3469_v15 = vadd.f32 %v3468_v27, %v3467_v6  ;;  %v5844_v59 = vpop.eup %5843  ;;  %v3478_v58 = vsel %vm3374_vm3, %v5842_v34, 0.0  ;;  %v8299_v6 = vmov 0.0   ;;  %v8303_v27 = vmov 0.0  }
 0x538   :  { %v5846_v17 = vpop.eup %5845  ;;  %v3480_v35 = vsel %vm3374_vm3, %v5844_v59, 0.0 }
 0x539   :  { %v3471_v4 = vadd.f32 %v3470_v61, %v3469_v15  ;;  %v5848_v18 = vpop.eup %5847  ;;  %v3482_v42 = vsel %vm3374_vm3, %v5846_v17, 0.0  ;;  %v8307_v15 = vmov 0.0   ;;  %v8311_v61 = vmov 0.0  }
 0x53a   :  { %v5850_v43 = vpop.eup %5849  ;;  %v3484_v1 = vsel %vm3374_vm3, %v5848_v18, 0.0 }
 0x53b   :  { %v3473_v30 = vadd.f32 %v3472_v25, %v3471_v4  ;;  %v5852_v63 = vpop.eup %5851  ;;  %v3486_v12 = vsel %vm3374_vm3, %v5850_v43, 0.0  ;;  %v8315_v4 = vmov 0.0   ;;  %v8317_v25 = vmov 0.0  }
 0x53c   :  { %v5854_v54 = vpop.eup %5853  ;;  %v3488_v47 = vsel %vm3374_vm3, %v5852_v63, 0.0 }
 0x53d   :  { %v3475_v50 = vadd.f32 %v3474_v38, %v3473_v30  ;;  %v3490_v9 = vsel %vm3374_vm3, %v5854_v54, 0.0 }
 0x53f   :  { %v3477_v13 = vadd.f32 %v3476_v3, %v3475_v50 }
 0x541   :  { %v3479_v29 = vadd.f32 %v3478_v58, %v3477_v13 }
 0x543   :  { %v3481_v28 = vadd.f32 %v3480_v35, %v3479_v29 }
 0x545   :  { %v3483_v23 = vadd.f32 %v3482_v42, %v3481_v28 }
 0x547   :  { %v3485_v16 = vadd.f32 %v3484_v1, %v3483_v23 }
 0x549   :  { %v3487_v36 = vadd.f32 %v3486_v12, %v3485_v16 }
 0x54b   :  { %v3489_v5 = vadd.f32 %v3488_v47, %v3487_v36 }
 0x54d   :  { %v3491_v26 = vadd.f32 %v3490_v9, %v3489_v5 }
 0x54f   :  { %5855 = vrcp.f32 %v3491_v26 }
 0x55c   :  { %v5856_v7 = vpop.eup %5855 }
 0x55d   :  { %v3493_v39 = vmul.f32 %v5856_v7, %v8240_v44  ;;  %v3494_v41 = vmul.f32 %v5856_v7, %v8244_v20  ;;  %v3495_v10 = vmul.f32 %v5856_v7, %v8248_v57  ;;  %v3496_v31 = vmul.f32 %v5856_v7, %v8254_v45 }
 0x55e   :  { %v3497_v40 = vmul.f32 %v5856_v7, %v5830_v8  ;;  %v3498_v2 = vmul.f32 %v5856_v7, %v5832_v19  ;;  %v3499_v51 = vmul.f32 %v5856_v7, %v5834_v53  ;;  %v3500_v0 = vmul.f32 %v5856_v7, %v5836_v11 }
 0x55f   :  { %v3501_v22 = vmul.f32 %v5856_v7, %v5838_v24  ;;  %v3502_v52 = vmul.f32 %v5856_v7, %v5840_v46  ;;  %v3503_v55 = vmul.f32 %v5856_v7, %v5842_v34  ;;  %v3504_v32 = vmul.f32 %v5856_v7, %v5844_v59  ;;  %3510 = vst [vmem:[#allocation4] sm:$0x3f] %v3493_v39 }
 0x560   :  { %3511 = vst [vmem:[#allocation4 + $0x8] sm:$0x3f] %v3494_v41  ;;  %3512 = vst [vmem:[#allocation4 + $0x10] sm:$0x3f] %v3495_v10  ;;  %v3505_v62 = vmul.f32 %v5856_v7, %v5846_v17  ;;  %v3506_v44 = vmul.f32 %v5856_v7, %v5848_v18  ;;  %v3507_v21 = vmul.f32 %v5856_v7, %v5850_v43  ;;  %v8283_v45 = vmov 0.0  }
 0x561   :  { %3513 = vst [vmem:[#allocation4 + $0x18] sm:$0x3f] %v3496_v31  ;;  %v3508_v20 = vmul.f32 %v5856_v7, %v5852_v63  ;;  %3514 = vst [vmem:[#allocation4 + $0x20] sm:$0x3f] %v3497_v40  ;;  %v3509_v57 = vmul.f32 %v5856_v7, %v5854_v54  ;;  %v8285_v8 = vmov 0.0   ;;  %v8287_v19 = vmov 0.0  }
 0x562   :  { %3515 = vst [vmem:[#allocation4 + $0x28] sm:$0x3f] %v3498_v2  ;;  %3516 = vst [vmem:[#allocation4 + $0x30] sm:$0x3f] %v3499_v51  ;;  %v8297_v53 = vmov 0.0   ;;  %v8305_v11 = vmov 0.0  }
 0x563   :  { %3517 = vst [vmem:[#allocation4 + $0x38] sm:$0x3f] %v3500_v0  ;;  %3518 = vst [vmem:[#allocation4 + $0x40] sm:$0x3f] %v3501_v22  ;;  %v8313_v24 = vmov 0.0  }
 0x564   :  { %3519 = vst [vmem:[#allocation4 + $0x48] sm:$0x3f] %v3502_v52  ;;  %3520 = vst [vmem:[#allocation4 + $0x50] sm:$0x3f] %v3503_v55 }
 0x565   :  { %3521 = vst [vmem:[#allocation4 + $0x58] sm:$0x3f] %v3504_v32  ;;  %3522 = vst [vmem:[#allocation4 + $0x60] sm:$0x3f] %v3505_v62 }
 0x566   :  { %3523 = vst [vmem:[#allocation4 + $0x68] sm:$0x3f] %v3506_v44  ;;  %3524 = vst [vmem:[#allocation4 + $0x70] sm:$0x3f] %v3507_v21 }
 0x567   :  { %3525 = vst [vmem:[#allocation4 + $0x78] sm:$0x3f] %v3508_v20  ;;  %3526 = vst [vmem:[#allocation4 + $0x80] sm:$0x3f] %v3509_v57 }
 0x568 LB: > { %v3551_v46 = vld [vmem:[%s8664_s7] sm:$0xff]  ;;  %vm3572_vm4 = vcmask 48128   ;;  %v3561_v30 = vld [vmem:[%s8664_s7 + $0x50] sm:$0xff]  ;;  %s4570_s23 = sshll.u32 %s6337_s8, 3  ;;  %v3552_v34 = vld [vmem:[%s8664_s7 + $0x8] sm:$0xff]  ;;  %s3785_s27 = smul.u32 144, %s6337_s8  ;;  %s6337_s8 = sphi %s8319_s8, %s3532_s8   ;;  %v6333_v25 = vphi %v8317_v25, %v8711_v25   ;;  %v6329_v4 = vphi %v8315_v4, %v8710_v4   ;;  %v6325_v24 = vphi %v8313_v24, %v8709_v24   ;;  %v6321_v61 = vphi %v8311_v61, %v8708_v61   ;;  %v6317_v14 = vphi %v8309_v14, %v8707_v14   ;;  %v6313_v15 = vphi %v8307_v15, %v8706_v15   ;;  %v6309_v11 = vphi %v8305_v11, %v8705_v11   ;;  %v6305_v27 = vphi %v8303_v27, %v8704_v27   ;;  %v6301_v49 = vphi %v8301_v49, %v8703_v49   ;;  %v6297_v6 = vphi %v8299_v6, %v8702_v6   ;;  %v6293_v53 = vphi %v8297_v53, %v8701_v53   ;;  %v6289_v33 = vphi %v8295_v33, %v8700_v33   ;;  %v6285_v60 = vphi %v8293_v60, %v8699_v60   ;;  %v6281_v56 = vphi %v8291_v56, %v8698_v56   ;;  %v6277_v37 = vphi %v8289_v37, %v8697_v37   ;;  %v6273_v19 = vphi %v8287_v19, %v8696_v19   ;;  %v6269_v8 = vphi %v8285_v8, %v8695_v8   ;;  %v6265_v45 = vphi %v8283_v45, %v8694_v45  }
 0x569   : > { %4763 = vmatprep.mubr.msk.f32.mxu0 %vm3572_vm4, %v3551_v46  ;;  %4778 = vmatprep.mubr.msk.f32.mxu1 %vm3572_vm4, %v3561_v30  ;;  %s3570_s21 = scalar_lea.vmem [#allocation4], %s4570_s23  ;;  %v3562_v50 = vld [vmem:[%s8664_s7 + $0x58] sm:$0xff]  ;;  %v3553_v3 = vld [vmem:[%s8664_s7 + $0x10] sm:$0xff]  ;;  %v3563_v59 = vld [vmem:[%s8664_s7 + $0x60] sm:$0xff]  ;;  %s3532_s8 = sadd.s32 1, %s6337_s8  }
 0x56a   : > { %v3554_v13 = vld [vmem:[%s8664_s7 + $0x18] sm:$0xff]  ;;  %v3564_v58 = vld [vmem:[%s8664_s7 + $0x68] sm:$0xff]  ;;  %v3555_v17 = vld [vmem:[%s8664_s7 + $0x20] sm:$0xff]  ;;  %s8454_s2 = scalar_lea.vmem [#allocation3], %s3785_s27  ;;  %p8518_p3 = scmp.ge.s32.totalorder %s3532_s8, 17  }
 0x56b   : > { %v3565_v29 = vld [vmem:[%s8664_s7 + $0x70] sm:$0xff]  ;;  %v3556_v35 = vld [vmem:[%s8664_s7 + $0x28] sm:$0xff]  ;;  %v3566_v18 = vld [vmem:[%s8664_s7 + $0x78] sm:$0xff]  ;;  %5857 = vset.pattern.permute.xlu0 (%p8518_p3), %v6342_v48  ;;  %5858 = vset.pattern.permute.xlu1 (%p8518_p3), %v6342_v48  ;;  %vm6344_vm5 = vmmov (%p8518_p3), 0   ;;  %vm4043_vm6 = vcmask (%p8518_p3), 523264  }
 0x56c   : > { %v3557_v28 = vld [vmem:[%s8664_s7 + $0x30] sm:$0xff]  ;;  %v3567_v42 = vld [vmem:[%s8664_s7 + $0x80] sm:$0xff]  ;;  %v3558_v43 = vld [vmem:[%s8664_s7 + $0x38] sm:$0xff] }
 0x56d   : > { %v3568_v23 = vld [vmem:[%s8664_s7 + $0x88] sm:$0xff]  ;;  %v3559_v1 = vld [vmem:[%s8664_s7 + $0x40] sm:$0xff]  ;;  %v3798_v12 = vld [vmem:[%s8454_s2 + $0x58] sm:$0xff] }
 0x56e   : > { %v3571_v38 = vld [vmem:[%s3570_s21] sm:$0x3f]  ;;  %v3560_v63 = vld [vmem:[%s8664_s7 + $0x48] sm:$0xff]  ;;  %v3797_v5 = vld [vmem:[%s8454_s2 + $0x50] sm:$0xff] }
 0x56f   : > { %4761 = vmatprep.subr.msk.mxu0 %vm3374_vm3, %v3571_v38  ;;  %4836 = vmatprep.subr.msk.mxu1 %vm3374_vm3, %v3571_v38  ;;  %v3788_v16 = vld [vmem:[%s8454_s2 + $0x8] sm:$0xff]  ;;  %v3787_v36 = vld [vmem:[%s8454_s2] sm:$0xff]  ;;  %v3790_v39 = vld [vmem:[%s8454_s2 + $0x18] sm:$0xff] }
 0x570   : > { %4762 = vmatpush3.msk.msra.mxu0 %vm3374_vm3, %v3571_v38  ;;  %4837 = vmatpush3.msk.msra.mxu1 %vm3374_vm3, %v3571_v38  ;;  %v3800_v10 = vld [vmem:[%s8454_s2 + $0x68] sm:$0xff]  ;;  %v3789_v22 = vld [vmem:[%s8454_s2 + $0x10] sm:$0xff]  ;;  %v3799_v55 = vld [vmem:[%s8454_s2 + $0x60] sm:$0xff] }
 0x571   : > { %4764 = vmatmul.mubr.msk.f32.vlgmr.msra.gmra.mxu0 %vm3572_vm4, %v3552_v34  ;;  %4779 = vmatmul.mubr.msk.f32.vlgmr.msra.gmra.mxu1 %vm3572_vm4, %v3562_v50  ;;  %v3792_v57 = vld [vmem:[%s8454_s2 + $0x28] sm:$0xff]  ;;  %v3791_v50 = vld [vmem:[%s8454_s2 + $0x20] sm:$0xff] }
 0x572   : > { %4766 = vmatprep.mubr.msk.f32.mxu0 %vm3572_vm4, %v3553_v3  ;;  %4781 = vmatprep.mubr.msk.f32.mxu1 %vm3572_vm4, %v3563_v59 }
 0x573   :  { %3955 = vmatprep.subr.bf16.mxu0 (%p8518_p3), %v6342_v48 }
 0x575   : > { %4767 = vmatmul.mubr.msk.f32.gmra.mxu0 %vm3572_vm4, %v3554_v13  ;;  %4782 = vmatmul.mubr.msk.f32.gmra.mxu1 %vm3572_vm4, %v3564_v58 }
 0x576   : > { %4769 = vmatprep.mubr.msk.f32.mxu0 %vm3572_vm4, %v3555_v17  ;;  %4784 = vmatprep.mubr.msk.f32.mxu1 %vm3572_vm4, %v3565_v29  ;;  %v3794_v29 = vld [vmem:[%s8454_s2 + $0x38] sm:$0xff] }
 0x579   : > { %4770 = vmatmul.mubr.msk.f32.gmra.mxu0 %vm3572_vm4, %v3556_v35  ;;  %4785 = vmatmul.mubr.msk.f32.gmra.mxu1 %vm3572_vm4, %v3566_v18 }
 0x57a   : > { %4772 = vmatprep.mubr.msk.f32.mxu0 %vm3572_vm4, %v3557_v28  ;;  %4787 = vmatprep.mubr.msk.f32.mxu1 %vm3572_vm4, %v3567_v42 }
 0x57d   : > { %4773 = vmatmul.mubr.msk.f32.gmra.mxu0 %vm3572_vm4, %v3558_v43  ;;  %4788 = vmatmul.mubr.msk.f32.gmra.mxu1 %vm3572_vm4, %v3568_v23 }
 0x57e   : > { %4775 = vmatprep.mubr.msk.f32.mxu0 %vm3572_vm4, %v3559_v1 }
 0x581   : > { %4776 = vmatmul.mubr.msk.f32.gmra.mxu0 %vm3572_vm4, %v3560_v63  ;;  %v3803_v63 = vld [vmem:[%s8454_s2 + $0x80] sm:$0xff] }
 0x631   : > { %v4765_v54 = vpop.f32.mrf.mxu0  ;;  %v4780_v47 = vpop.f32.mrf.mxu1 }
 0x632   : > { %v3806_v9 = vmul.f32 %v4765_v54, %v3788_v16  ;;  %v3816_v26 = vmul.f32 %v4780_v47, %v3798_v12  ;;  %v3796_v47 = vld [vmem:[%s8454_s2 + $0x48] sm:$0xff] }
 0x633   : > { %v3696_v7 = vpop.f32.mrf.mxu0  ;;  %v3746_v41 = vpop.f32.mrf.mxu1 }
 0x634   : > { %v8462_v4 = vadd.f32 %v6329_v4, %v3806_v9   ;;  %v3805_v40 = vmul.f32 %v3787_v36, %v3696_v7  ;;  %v8465_v33 = vadd.f32 %v6289_v33, %v3816_v26   ;;  %v3815_v51 = vmul.f32 %v3797_v5, %v3746_v41 }
 0x635   : > { %v4768_v0 = vpop.f32.mrf.mxu0  ;;  %v4783_v52 = vpop.f32.mrf.mxu1 }
 0x636   : > { %v8680_v31 = vmov %v8462_v4  ;;  %v8681_v2 = vmov %v8465_v33  ;;  %v8470_v25 = vadd.f32 %v6333_v25, %v3805_v40   ;;  %v3808_v62 = vmul.f32 %v4768_v0, %v3790_v39  ;;  %v3802_v33 = vld [vmem:[%s8454_s2 + $0x78] sm:$0xff]  ;;  %v3795_v39 = vld [vmem:[%s8454_s2 + $0x40] sm:$0xff] }
 0x637   : > { %v8473_v53 = vadd.f32 %v6293_v53, %v3815_v51   ;;  %v3818_v21 = vmul.f32 %v4783_v52, %v3800_v10  ;;  %v3706_v20 = vpop.f32.mrf.mxu0  ;;  %v3756_v4 = vpop.f32.mrf.mxu1  ;;  %v5861_v52 = vld [vmem:[%s8666_s9 + $0x4] ss:$8 sps:$4 sm:$0xff] (%p8518_p3)  }
 0x638   : > { %v8682_v32 = vmov %v8470_v25  ;;  %v8478_v61 = vadd.f32 %v6321_v61, %v3808_v62   ;;  %v3807_v30 = vmul.f32 %v3789_v22, %v3706_v20  ;;  %v3817_v34 = vmul.f32 %v3799_v55, %v3756_v4  ;;  %4598 = vmatprep.mubr.msk.bf16.mxu0 (%p8518_p3), %vm1829_vm2, %v5861_v52  ;;  %v3861_v62 = vld [vmem:[%s8667_s10 + $0x18] sm:$0xff] (%p8518_p3)  ;;  %v3859_v20 = vld [vmem:[%s8667_s10 + $0x8] sm:$0xff] (%p8518_p3) }
 0x639   : > { %v8683_v44 = vmov %v8473_v53  ;;  %v8481_v56 = vadd.f32 %v6281_v56, %v3818_v21   ;;  %v4771_v25 = vpop.f32.mrf.mxu0  ;;  %v4786_v3 = vpop.f32.mrf.mxu1  ;;  %v3801_v53 = vld [vmem:[%s8454_s2 + $0x70] sm:$0xff]  ;;  %v8710_v4 = vmov %v8680_v31  ;;  %v3858_v21 = vld [vmem:[%s8667_s10] sm:$0xff] (%p8518_p3) }
 0x63a   : > { %v8684_v46 = vmov %v8478_v61  ;;  %v8486_v24 = vadd.f32 %v6325_v24, %v3807_v30   ;;  %v3810_v13 = vmul.f32 %v4771_v25, %v3792_v57  ;;  %v8489_v60 = vadd.f32 %v6285_v60, %v3817_v34   ;;  %v4033_v4 = vld [vmem:[#allocation5] sm:$0x1] (%p8518_p3)  ;;  %v5859_v34 = vld [vmem:[%s8666_s9] ss:$8 sps:$4 sm:$0xff] (%p8518_p3)  }
 0x63b   : > { %v8685_v38 = vmov %v8481_v56  ;;  %v3820_v17 = vmul.f32 %v4786_v3, %v3802_v33  ;;  %v3716_v61 = vpop.f32.mrf.mxu0  ;;  %v3766_v35 = vpop.f32.mrf.mxu1  ;;  %v3804_v56 = vld [vmem:[%s8454_s2 + $0x88] sm:$0xff]  ;;  %v8700_v33 = vmov %v8681_v2  ;;  %v8711_v25 = vmov %v8682_v32 }
 0x63c   : > { %v8686_v59 = vmov %v8486_v24  ;;  %v8687_v58 = vmov %v8489_v60  ;;  %v8494_v15 = vadd.f32 %v6313_v15, %v3810_v13   ;;  %v3809_v28 = vmul.f32 %v3791_v50, %v3716_v61  ;;  %v3793_v24 = vld [vmem:[%s8454_s2 + $0x30] sm:$0xff] }
 0x63d   : > { %v3838_v42 = vadd.f32 %v6273_v19, %v3820_v17   ;;  %v3819_v43 = vmul.f32 %v3801_v53, %v3766_v35  ;;  %v4774_v23 = vpop.f32.mrf.mxu0  ;;  %v4789_v1 = vpop.f32.mrf.mxu1  ;;  %v8701_v53 = vmov %v8683_v44  ;;  %v8708_v61 = vmov %v8684_v46  ;;  %v5868_v25 = vld [vmem:[%s8666_s9 + $0x34] ss:$8 sps:$4 sm:$0xff] (%p8518_p3)   ;;  %v5870_v50 = vld [vmem:[%s8666_s9 + $0x30] ss:$8 sps:$4 sm:$0xff] (%p8518_p3)  }
 0x63e   : > { %v8688_v18 = vmov %v8494_v15  ;;  %v8500_v14 = vadd.f32 %v6317_v14, %v3809_v28   ;;  %v3812_v60 = vmul.f32 %v4774_v23, %v3794_v29  ;;  %v3822_v54 = vmul.f32 %v4789_v1, %v3804_v56 }
 0x63f   : > { %v3837_v12 = vadd.f32 %v6277_v37, %v3819_v43   ;;  %v3726_v36 = vpop.f32.mrf.mxu0  ;;  %v3776_v5 = vpop.f32.mrf.mxu1  ;;  %v8698_v56 = vmov %v8685_v38  ;;  %v3855_v55 = vpack.c.bf16 (%p8518_p3), %v8685_v38, %v8687_v58  ;;  %v3850_v33 = vpack.c.bf16 (%p8518_p3), %v8684_v46, %v8686_v59  ;;  %v5862_v46 = vld [vmem:[%s8666_s9 + $0x14] ss:$8 sps:$4 sm:$0xff] (%p8518_p3)  }
 0x640   : > { %v8689_v16 = vmov %v8500_v14  ;;  %v8505_v27 = vadd.f32 %v6305_v27, %v3812_v60   ;;  %v3811_v19 = vmul.f32 %v3793_v24, %v3726_v36  ;;  %v8508_v45 = vadd.f32 %v6265_v45, %v3822_v54  }
 0x641   : > { %v3821_v15 = vmul.f32 %v3803_v63, %v3776_v5  ;;  %v4777_v7 = vpop.f32.mrf.mxu0  ;;  %v8699_v60 = vmov %v8687_v58  ;;  %v8709_v24 = vmov %v8686_v59  ;;  %v3856_v22 = vpack.c.bf16 (%p8518_p3), %v3838_v42, %v3837_v12 }
 0x642   : > { %v8690_v9 = vmov %v8505_v27  ;;  %v8691_v26 = vmov %v8508_v45  ;;  %v3829_v41 = vadd.f32 %v6309_v11, %v3811_v19   ;;  %v3814_v14 = vmul.f32 %v4777_v7, %v3796_v47 }
 0x643   : > { %v8513_v8 = vadd.f32 %v6269_v8, %v3821_v15   ;;  %v3736_v37 = vpop.f32.mrf.mxu0  ;;  %v8694_v45 = vmov %v8691_v26  ;;  %v8696_v19 = vmov %v3838_v42  ;;  %v8704_v27 = vmov %v8690_v9  ;;  %3956 = vmatpush1.bf16.msra.mxu0 (%p8518_p3), %v3856_v22 }
 0x644   : > { %v3832_v40 = vadd.f32 %v6297_v6, %v3814_v14   ;;  %v3813_v51 = vmul.f32 %v3795_v39, %v3736_v37  ;;  %v8697_v37 = vmov %v3837_v12  ;;  %v8705_v11 = vmov %v3829_v41  ;;  %3531 = sbr.rel (!%p8518_p3) target bundleno = 1384 (0x568), region = 141  ;;  %3957 = vmatprep.subr.bf16.mxu0 (%p8518_p3), %v6342_v48  ;;  %v3864_v45 = vld [vmem:[%s8667_s10 + $0x30] sm:$0xff] (%p8518_p3)  ;;  %v3863_v27 = vld [vmem:[%s8667_s10 + $0x28] sm:$0xff] (%p8518_p3) }
 0x645   : > { %v8692_v10 = vmov %v8513_v8  ;;  %v8706_v15 = vmov %v8688_v18  ;;  %v8707_v14 = vmov %v8689_v16  ;;  %3898 = vperm.xlu0 (%p8518_p3), %5857, %v3864_v45   ;;  %v3851_v57 = vpack.c.bf16 (%p8518_p3), %v8688_v18, %v8689_v16 }
 0x646   : > { %v3831_v0 = vadd.f32 %v6301_v49, %v3813_v51   ;;  %v8695_v8 = vmov %v8692_v10  ;;  %v8702_v6 = vmov %v3832_v40  ;;  %v3849_v30 = vpack.c.bf16 (%p8518_p3), %v8680_v31, %v8682_v32  ;;  %v5864_v31 = vld [vmem:[%s8666_s9 + $0x10] ss:$8 sps:$4 sm:$0xff] (%p8518_p3)   ;;  %v5867_v32 = vld [vmem:[%s8666_s9 + $0x20] ss:$8 sps:$4 sm:$0xff] (%p8518_p3)  }
 0x647   :  { %3958 = vmatpush1.bf16.msra.mxu0 (%p8518_p3), %v3855_v55  ;;  %v3854_v8 = vpack.c.bf16 (%p8518_p3), %v8681_v2, %v8683_v44  ;;  %v3862_v6 = vld [vmem:[%s8667_s10 + $0x20] sm:$0xff] (%p8518_p3)  ;;  %v3860_v2 = vld [vmem:[%s8667_s10 + $0x10] sm:$0xff] (%p8518_p3)  ;;  %v3852_v44 = vpack.c.bf16 (%p8518_p3), %v8690_v9, %v3829_v41  ;;  %v3857_v38 = vpack.c.bf16 (%p8518_p3), %v8691_v26, %v8692_v10  ;;  %v6343_v3 = vmov (%p8518_p3), 0.0  }
 0x648   : > { %v8703_v49 = vmov %v3831_v0  ;;  %3959 = vmatprep.subr.bf16.mxu0 (%p8518_p3), %v6342_v48  ;;  %3888 = vperm.xlu1 (%p8518_p3), %5858, %v3862_v6   ;;  %v3853_v11 = vpack.c.bf16 (%p8518_p3), %v3832_v40, %v3831_v0 }
 0x649   :  { %v3865_v49 = vld [vmem:[%s8667_s10 + $0x38] sm:$0xff]  ;;  %4790 = vmatprep.subr.bf16.mxu1 %v6343_v3  ;;  %4798 = vmatprep.mubr.msk.bf16.mxu1 %vm6344_vm5, %v6343_v3 }
 0x64a   :  { %3903 = vperm.xlu0 %5857, %v3865_v49  }
 0x64b   :  { %3960 = vmatpush1.bf16.msra.mxu0 %v3854_v8 }
 0x64c   :  { %3961 = vmatprep.subr.bf16.mxu0 %v6342_v48  ;;  %3893 = vperm.xlu1 %5858, %v3863_v27   ;;  %v4028_v27 = vld [vmem:[%s8668_s11] sm:$0x1] }
 0x64e   :  { %3878 = vperm.xlu0 %5857, %v3860_v2  }
 0x64f   :  { %3962 = vmatpush1.bf16.msra.mxu0 %v3853_v11  ;;  %v4039_v11 = vlaneseq }
 0x650   :  { %3963 = vmatprep.subr.bf16.mxu0 %v6342_v48  ;;  %3883 = vperm.xlu1 %5858, %v3861_v62  }
 0x651   :  { %v4040_v2 = vshrl.u32 %v4039_v11, 7 }
 0x652   :  { %3868 = vperm.xlu0 %5857, %v3858_v21  }
 0x653   :  { %3964 = vmatpush1.bf16.msra.mxu0 %v3852_v44  ;;  %v4041_v62 = vsub.s32 0, %v4040_v2 }
 0x654   :  { %3965 = vmatprep.subr.bf16.mxu0 %v6342_v48  ;;  %3873 = vperm.xlu1 %5858, %v3859_v20  }
 0x656   :  { %4036 = vperm.xlu0 %5857, %v4033_v4  }
 0x657   :  { %3966 = vmatpush1.bf16.msra.mxu0 %v3851_v57 }
 0x658   :  { %3967 = vmatprep.subr.bf16.mxu0 %v6342_v48 }
 0x65b   :  { %3968 = vmatpush1.bf16.msra.mxu0 %v3850_v33 }
 0x65c   :  { %3969 = vmatprep.subr.bf16.mxu0 %v6342_v48 }
 0x65f   :  { %3970 = vmatpush1.bf16.msra.mxu0 %v3849_v30 }
 0x660   :  { %3985 = vmatprep.subr.bf16.mxu0 %v6342_v48  ;;  %v5865_v48 = vld [vmem:[%s8666_s9 + $0x24] ss:$8 sps:$4 sm:$0xff]  }
 0x663   :  { %3986 = vmatpush2.bf16.msra.mxu0 %v3857_v38 }
 0x666   :  { %3988 = vmatmul.mubr.bf16.vlgmr.msra.gmra.mxu0 %v5859_v34 }
 0x667   :  { %4599 = vmatprep.mubr.msk.bf16.mxu0 %vm1829_vm2, %v5862_v46 }
 0x66e   :  { %3996 = vmatmul.mubr.bf16.gmra.mxu0 %v5864_v31 }
 0x66f   :  { %4600 = vmatprep.mubr.msk.bf16.mxu0 %vm1829_vm2, %v5865_v48 }
 0x676   :  { %4004 = vmatmul.mubr.bf16.gmra.mxu0 %v5867_v32 }
 0x677   :  { %4601 = vmatprep.mubr.msk.bf16.mxu0 %vm1829_vm2, %v5868_v25 }
 0x67e   :  { %4012 = vmatmul.mubr.bf16.gmra.mxu0 %v5870_v50 }
 0x6c0   :  { %v3899_v28 = vpop.permute.xlu0 %3898 }
 0x6c3   :  { %v3889_v56 = vpop.permute.xlu1 %3888 }
 0x6c5   :  { %v3904_v1 = vpop.permute.xlu0 %3903 }
 0x6c7   :  { %v3894_v23 = vpop.permute.xlu1 %3893 }
 0x6c9   :  { %v3879_v5 = vpop.permute.xlu0 %3878 }
 0x6cb   :  { %v3884_v12 = vpop.permute.xlu1 %3883 }
 0x6cd   :  { %v3869_v40 = vpop.permute.xlu0 %3868 }
 0x6cf   :  { %v3874_v14 = vpop.permute.xlu1 %3873 }
 0x6d1   :  { %v4037_v44 = vpop.permute.xlu0 %4036 }
 0x6d2   :  { %v4042_v21 = vrot.slane %v4037_v44, %v4041_v62 }
 0x726   :  { %v3989_v53 = vpop.f32.mrf.mxu0 }
 0x727   :  { %v3990_v52 = vadd.f32 %v3989_v53, %v3869_v40 }
 0x728   :  { %v3991_v59 = vpop.f32.mrf.mxu0 }
 0x729   :  { %v4020_v6 = vmax.f32 %v3990_v52, 0.0 }
 0x72a   :  { %v3992_v13 = vpop.f32.mrf.mxu0 }
 0x72b   :  { %v3993_v51 = vadd.f32 %v3992_v13, %v3874_v14 }
 0x72c   :  { %v3994_v58 = vpop.f32.mrf.mxu0 }
 0x72d   :  { %v4021_v45 = vmax.f32 %v3993_v51, 0.0 }
 0x72e   :  { %v3997_v17 = vpop.f32.mrf.mxu0 }
 0x72f   :  { %v3998_v10 = vadd.f32 %v3997_v17, %v3879_v5  ;;  %v4029_v49 = vpack.c.bf16 %v4021_v45, %v4020_v6 }
 0x730   :  { %v3999_v61 = vpop.f32.mrf.mxu0 }
 0x731   :  { %v4022_v55 = vmax.f32 %v3998_v10, 0.0 }
 0x732   :  { %v4000_v29 = vpop.f32.mrf.mxu0 }
 0x733   :  { %v4001_v7 = vadd.f32 %v4000_v29, %v3884_v12 }
 0x734   :  { %v4002_v35 = vpop.f32.mrf.mxu0 }
 0x735   :  { %v4023_v0 = vmax.f32 %v4001_v7, 0.0 }
 0x736   :  { %v4005_v18 = vpop.f32.mrf.mxu0 }
 0x737   :  { %v4006_v19 = vadd.f32 %v4005_v18, %v3889_v56  ;;  %v4030_v8 = vpack.c.bf16 %v4023_v0, %v4022_v55 }
 0x738   :  { %v4007_v42 = vpop.f32.mrf.mxu0 }
 0x739   :  { %v4024_v37 = vmax.f32 %v4006_v19, 0.0 }
 0x73a   :  { %v4008_v43 = vpop.f32.mrf.mxu0 }
 0x73b   :  { %v4009_v36 = vadd.f32 %v4008_v43, %v3894_v23 }
 0x73c   :  { %v4010_v24 = vpop.f32.mrf.mxu0 }
 0x73d   :  { %v4025_v39 = vmax.f32 %v4009_v36, 0.0 }
 0x73e   :  { %v4013_v63 = vpop.f32.mrf.mxu0 }
 0x73f   :  { %v4014_v60 = vadd.f32 %v4013_v63, %v3899_v28  ;;  %v4031_v22 = vpack.c.bf16 %v4025_v39, %v4024_v37 }
 0x740   :  { %v4015_v16 = vpop.f32.mrf.mxu0 }
 0x741   :  { %v4026_v26 = vmax.f32 %v4014_v60, 0.0 }
 0x742   :  { %v4016_v54 = vpop.f32.mrf.mxu0 }
 0x743   :  { %v4017_v47 = vadd.f32 %v4016_v54, %v3904_v1 }
 0x744   :  { %v4018_v9 = vpop.f32.mrf.mxu0 }
 0x745   :  { %v4027_v15 = vmax.f32 %v4017_v47, 0.0 }
 0x747   :  { %v4032_v41 = vpack.c.bf16 %v4027_v15, %v4026_v26 }
 0x749   :  { %4791 = vmatpush3.bf16.msra.mxu1 %v4032_v41 }
 0x74a   :  { %4792 = vmatprep.subr.bf16.mxu1 %v6343_v3 }
 0x74d   :  { %4793 = vmatpush3.bf16.msra.mxu1 %v4031_v22 }
 0x74e   :  { %4794 = vmatprep.subr.bf16.mxu1 %v6343_v3 }
 0x751   :  { %4795 = vmatpush3.bf16.msra.mxu1 %v4030_v8 }
 0x752   :  { %4796 = vmatprep.subr.bf16.mxu1 %v6343_v3 }
 0x755   :  { %4797 = vmatpush3.bf16.msra.mxu1 %v4029_v49 }
 0x758   :  { %4799 = vmatmul.mubr.msk.bf16.vlgmr.msra.gmra.mxu1 %vm4043_vm6, %v4028_v27 }
 0x818   :  { %v4081_v20 = vpop.f32.mrf.mxu1 }
 0x819   :  { %v4082_v57 = vadd.f32 %v4081_v20, %v4042_v21 }
 0x81a   :  { %v4800_v4 = vpop.f32.mrf.mxu1 }
 0x81b   :  { %v4603_v33 = vmul.f32 -1.442695, %v4082_v57 }
 0x81c   :  { %v4084_v30 = vpop.f32.mrf.mxu1 }
 0x81d   :  { %5871 = vpow2.f32 %v4603_v33 }
 0x81e   :  { %v4801_v38 = vpop.f32.mrf.mxu1 }
 0x82a   :  { %v5872_v34 = vpop.eup %5871 }
 0x82b   :  { %v4090_v46 = vadd.f32 1.0, %v5872_v34 }
 0x82d   :  { %5873 = vrcp.f32 %v4090_v46 }
 0x83a   :  { %v5874_v31 = vpop.eup %5873 }
 0x83b   :  { %4093 = vst [vmem:[%s8670_s13] sm:$0x1] %v5874_v31 }

</bundles_post_ra>
